<compile_context>
chip_gen: v5e
topology: v5e:2x2
jax: 0.10.0
libtpu: 0.0.40
codegen_flags: <defaults>
</compile_context>

<pallas_src>
import functools

import numpy as np
import jax
import jax.numpy as jnp
from jax import lax
from jax.experimental import pallas as pl
from jax.experimental.pallas import tpu as pltpu


BP = 16  # image pairs per grid step (multiple of 16 keeps every slice bf16/f32 tile-aligned)


# ----------------------------- fused Pallas kernel ---------------------------

def _make_kernel(probabilities, bp):
    R1 = 48 * bp   # conv1 output rows per step: (h-parity, image, pooled-row i1, pair)
    RM = 24 * bp   # pooled-1 rows: (image, i1, pair)
    L = 20 * bp    # conv2 output rows: base (image*12 + h2) in 0..19, pair innermost

    def kernel(x1_ref, w1_ref, b1_ref, wk_ref, b2_ref,
               fc1w_ref, fc1b_ref, fc2w_ref, fc2b_ref, fc3w_ref, fc3b_ref,
               o_ref):
        f32 = jnp.float32

        # ---- conv1: one block-Toeplitz GEMM. x1 row = 5x28 image strip (140 lanes),
        #      output lane = s1j*128 + j1*6 + c  (w_o = 2*j1 + s1j). ----
        y1 = jnp.dot(x1_ref[...], w1_ref[...], preferred_element_type=f32)   # (R1, 256)

        # ---- MaxPool2d(2,2): h-parity = two contiguous row blocks, w-parity = the two
        #      128-lane groups; then bias + ReLU (junk lanes stay exactly 0). ----
        m1 = jnp.maximum(y1[0:RM, :], y1[RM:R1, :])
        m1 = jnp.maximum(m1[:, 0:128], m1[:, 128:256])
        m1 = jnp.maximum(m1 + b1_ref[...], 0.0).astype(jnp.bfloat16)         # (RM, 128)

        # ---- conv2: 5 row-shifted views (shift = ky*bp, sublane/vreg aligned) stacked on
        #      lanes -> single (L,640)x(640,256) GEMM; output lane = s2j*128 + q*16 + o. ----
        m1s = jnp.concatenate([m1[ky * bp: ky * bp + L, :] for ky in range(5)], axis=1)
        y2 = jnp.dot(m1s, wk_ref[...], preferred_element_type=f32)           # (L, 256)

        # ---- MaxPool2d(2,2) + bias + ReLU on conv2, gathered into a lane-dense (bp,1024)
        #      feature slab; fc1 weight absorbs the NCHW flatten and the enc(x)+enc(y) sum. ----
        zs = []
        for m in range(2):              # the two images of each pair
            for p in range(4):          # pooled-2 row index
                r0 = (m * 12 + 2 * p) * bp
                blk = jnp.maximum(y2[r0:r0 + bp, :], y2[r0 + bp:r0 + 2 * bp, :])
                blk = jnp.maximum(blk[:, 0:128], blk[:, 128:256])
                zs.append(jnp.maximum(blk + b2_ref[...], 0.0))
        z = jnp.concatenate(zs, axis=1)                                      # (bp, 1024)

        # ---- classifier: three dense GEMMs with M=bp ----
        h = jnp.maximum(jnp.dot(z, fc1w_ref[...], preferred_element_type=f32)
                        + fc1b_ref[...], 0.0)                                # (bp, 120)
        h = jnp.maximum(jnp.dot(h, fc2w_ref[...], preferred_element_type=f32)
                        + fc2b_ref[...], 0.0)                                # (bp, 84)
        logits = jnp.dot(h, fc3w_ref[...], preferred_element_type=f32) + fc3b_ref[...]

        if probabilities:
            zl = logits - jnp.max(logits, axis=-1, keepdims=True)
            e = jnp.exp(zl)
            o_ref[...] = e / jnp.sum(e, axis=-1, keepdims=True)              # exact softmax
        else:
            o_ref[...] = logits

    return kernel


def _const_spec(shape):
    n = len(shape)
    return pl.BlockSpec(shape, lambda i: (0,) * n)


def fused_forward_call(x1, kp, probabilities, bp, nsteps):
    kernel = _make_kernel(probabilities, bp)
    out = pl.pallas_call(
        kernel,
        out_shape=jax.ShapeDtypeStruct((nsteps * bp, 19), jnp.float32),
        grid=(nsteps,),
        in_specs=[
            pl.BlockSpec((None, 48 * bp, 140), lambda i: (i, 0, 0)),   # conv1 strips
            _const_spec((140, 256)), _const_spec((1, 128)),            # conv1 W (Toeplitz), bias vec
            _const_spec((640, 256)), _const_spec((1, 128)),            # conv2 W (Toeplitz), bias vec
            _const_spec((1024, 120)), _const_spec((1, 120)),           # fc1 (flatten+sum absorbed)
            _const_spec((120, 84)), _const_spec((1, 84)),              # fc2
            _const_spec((84, 19)), _const_spec((1, 19)),               # fc3
        ],
        out_specs=pl.BlockSpec((bp, 19), lambda i: (i, 0)),
        compiler_params=pltpu.CompilerParams(
            dimension_semantics=("parallel",)),                        # v7x: 2 TCs share steps
    )(x1, kp["w1big"], kp["b1vec"], kp["wk"], kp["b2vec"],
      kp["fc1w"], kp["fc1b"], kp["fc2w"], kp["fc2b"], kp["fc3w"], kp["fc3b"])
    return out


# ------------------------------- parameter glue -------------------------------

def init_torch_params(key):
    # PyTorch-layout parameters (deterministic, synthetic).
    shapes = {
        "conv1_w": (6, 1, 5, 5), "conv1_b": (6,),
        "conv2_w": (16, 6, 5, 5), "conv2_b": (16,),
        "fc1_w": (120, 256), "fc1_b": (120,),
        "fc2_w": (84, 120), "fc2_b": (84,),
        "fc3_w": (19, 84), "fc3_b": (19,),
    }
    keys = jax.random.split(key, len(shapes))
    return {name: 0.1 * jax.random.normal(k, shp, dtype=jnp.float32)
            for (name, shp), k in zip(shapes.items(), keys)}


def prepare_kernel_params(tp):
    """Repack PyTorch-layout weights into the block-Toeplitz / lane-padded layouts."""
    c1w = np.asarray(tp["conv1_w"], np.float32)
    c1b = np.asarray(tp["conv1_b"], np.float32)
    c2w = np.asarray(tp["conv2_w"], np.float32)
    c2b = np.asarray(tp["conv2_b"], np.float32)
    fc1w_t = np.asarray(tp["fc1_w"], np.float32)          # (120, 256), col = o*16 + p*4 + q

    # conv1: rows = ky*28 + x (5x28 strip), cols = s1j*128 + j1*6 + c, w_o = 2*j1 + s1j
    w1big = np.zeros((140, 256), np.float32)
    for s in range(2):
        for j1 in range(12):
            wo = 2 * j1 + s
            for c in range(6):
                col = s * 128 + j1 * 6 + c
                for ky in range(5):
                    for kx in range(5):
                        w1big[ky * 28 + wo + kx, col] = c1w[c, 0, ky, kx]
    b1vec = np.zeros((1, 128), np.float32)
    for j1 in range(12):
        b1vec[0, j1 * 6:(j1 + 1) * 6] = c1b

    # conv2: rows = ky*128 + w1*6 + c, cols = s2j*128 + q*16 + o, w2 = 2*q + s2j
    wk = np.zeros((640, 256), np.float32)
    for ky in range(5):
        for s in range(2):
            for q in range(4):
                w2 = 2 * q + s
                for o in range(16):
                    col = s * 128 + q * 16 + o
                    for c in range(6):
                        for kx in range(5):
                            wk[ky * 128 + (w2 + kx) * 6 + c, col] = c2w[o, c, ky, kx]
    b2vec = np.zeros((1, 128), np.float32)
    for q in range(4):
        b2vec[0, q * 16:(q + 1) * 16] = c2b

    # fc1: rows = (m*4 + p)*128 + q*16 + o  (same weights for both images -> sum is absorbed)
    wfc1 = np.zeros((1024, 120), np.float32)
    for m in range(2):
        for p in range(4):
            blk = (m * 4 + p) * 128
            for q in range(4):
                for o in range(16):
                    wfc1[blk + q * 16 + o, :] = fc1w_t[:, o * 16 + p * 4 + q]

    return {
        "w1big": jnp.asarray(w1big, jnp.bfloat16),
        "b1vec": jnp.asarray(b1vec),
        "wk": jnp.asarray(wk, jnp.bfloat16),
        "b2vec": jnp.asarray(b2vec),
        "fc1w": jnp.asarray(wfc1),
        "fc1b": jnp.asarray(tp["fc1_b"]).reshape(1, 120),
        "fc2w": jnp.asarray(tp["fc2_w"]).T,
        "fc2b": jnp.asarray(tp["fc2_b"]).reshape(1, 84),
        "fc3w": jnp.asarray(tp["fc3_w"]).T,
        "fc3b": jnp.asarray(tp["fc3_b"]).reshape(1, 19),
    }


# ------------------------------- forward wrapper ------------------------------

@functools.partial(jax.jit, static_argnames=("batched", "probabilities"))
def separate_baseline_forward(kp, x, y, batched=True, probabilities=True):
    if not batched:
        x = x[None]
        y = y[None]
    b = x.shape[0]
    nsteps = -(-b // BP)
    bpad = nsteps * BP

    imgs = jnp.stack([x.reshape(b, 28, 28), y.reshape(b, 28, 28)], axis=1).astype(jnp.float32)
    if bpad != b:
        imgs = jnp.pad(imgs, ((0, bpad - b), (0, 0), (0, 0), (0, 0)))

    # conv1 row-strips (5 slices + layout ops, ~10 XLA ops, 4.3x raw image bytes).
    strips = jnp.stack([imgs[:, :, ky:ky + 24, :] for ky in range(5)], axis=3)  # (bp,2,24,5,28)
    strips = strips.reshape(bpad, 2, 12, 2, 140)        # [b, m, i1, s1i, ky*28+x]
    strips = strips.transpose(3, 1, 2, 0, 4)            # [s1i, m, i1, b, lane]
    strips = strips.reshape(2, 2, 12, nsteps, BP, 140)
    strips = strips.transpose(3, 0, 1, 2, 4, 5)         # [step, s1i, m, i1, b_local, lane]
    x1 = strips.reshape(nsteps, 48 * BP, 140).astype(jnp.bfloat16)

    out = fused_forward_call(x1, kp, probabilities, BP, nsteps)   # (nsteps*BP, 19)
    out = out[:b]
    if not batched:
        out = out[0]
    return out


# --------------------------- pure-JAX reference ------------------------------

def reference_forward(tp, x, y, batched=True, probabilities=True):
    if not batched:
        x, y = x[None], y[None]

    def conv2d(inp, w, b_):
        out = lax.conv_general_dilated(inp, w, (1, 1), "VALID",
                                       dimension_numbers=("NCHW", "OIHW", "NCHW"))
        return out + b_[None, :, None, None]

    def maxpool(a):
        return lax.reduce_window(a, -jnp.inf, lax.max, (1, 1, 2, 2), (1, 1, 2, 2), "VALID")

    def enc(t):
        t = jnp.maximum(maxpool(conv2d(t, tp["conv1_w"], tp["conv1_b"])), 0.0)
        t = jnp.maximum(maxpool(conv2d(t, tp["conv2_w"], tp["conv2_b"])), 0.0)
        return t

    f = (enc(x) + enc(y)).reshape(x.shape[0], 256)
    h = jnp.maximum(f @ tp["fc1_w"].T + tp["fc1_b"], 0.0)
    h = jnp.maximum(h @ tp["fc2_w"].T + tp["fc2_b"], 0.0)
    logits = h @ tp["fc3_w"].T + tp["fc3_b"]
    out = jax.nn.softmax(logits, axis=-1) if probabilities else logits
    return out[0] if not batched else out


# ----------------------------------- main ------------------------------------

if __name__ == "__main__":
    key = jax.random.PRNGKey(0)
    kp_key, kx, ky_ = jax.random.split(key, 3)
    torch_params = init_torch_params(kp_key)
    kernel_params = prepare_kernel_params(torch_params)

    B = 32  # 2 grid steps of BP=16 pairs -> both v7x TensorCores get work
    x = jax.random.normal(kx, (B, 1, 28, 28), dtype=jnp.float32)
    y = jax.random.normal(ky_, (B, 1, 28, 28), dtype=jnp.float32)

    out = separate_baseline_forward(kernel_params, x, y, batched=True, probabilities=True)
    out = jax.block_until_ready(out)

    assert out.shape == (B, 19), out.shape
    np.testing.assert_allclose(np.asarray(jnp.sum(out, axis=-1)), np.ones(B), atol=1e-4)
    ref = reference_forward(torch_params, x, y, batched=True, probabilities=True)
    np.testing.assert_allclose(np.asarray(out), np.asarray(ref), atol=3e-2, rtol=0.0)
    print("KERNEL_OK")
</pallas_src>

<mosaic_0001>
module attributes {stable_mosaic.version = 11 : i64} {
  func.func @kernel(%arg0: i32, %arg1: memref<1x768x140xbf16, #tpu.memory_space<vmem>>, %arg2: memref<140x256xbf16, #tpu.memory_space<vmem>>, %arg3: memref<1x128xf32, #tpu.memory_space<vmem>>, %arg4: memref<640x256xbf16, #tpu.memory_space<vmem>>, %arg5: memref<1x128xf32, #tpu.memory_space<vmem>>, %arg6: memref<1024x120xf32, #tpu.memory_space<vmem>>, %arg7: memref<1x120xf32, #tpu.memory_space<vmem>>, %arg8: memref<120x84xf32, #tpu.memory_space<vmem>>, %arg9: memref<1x84xf32, #tpu.memory_space<vmem>>, %arg10: memref<84x19xf32, #tpu.memory_space<vmem>>, %arg11: memref<1x19xf32, #tpu.memory_space<vmem>>, %arg12: memref<16x19xf32, #tpu.memory_space<vmem>>) attributes {dimension_semantics = [#tpu.dimension_semantics<parallel>], iteration_bounds = array<i64: 2>, scalar_prefetch = 0 : i64, scratch_operands = 0 : i64, tpu.core_type = #tpu.core_type<tc>, window_params = [{transform_indices = @transform_0, window_bounds = array<i64: 1, 768, 140>}, {pipeline_mode = #tpu.pipeline_mode<synchronous>, transform_indices = @transform_1, window_bounds = array<i64: 140, 256>}, {pipeline_mode = #tpu.pipeline_mode<synchronous>, transform_indices = @transform_2, window_bounds = array<i64: 1, 128>}, {pipeline_mode = #tpu.pipeline_mode<synchronous>, transform_indices = @transform_3, window_bounds = array<i64: 640, 256>}, {pipeline_mode = #tpu.pipeline_mode<synchronous>, transform_indices = @transform_4, window_bounds = array<i64: 1, 128>}, {pipeline_mode = #tpu.pipeline_mode<synchronous>, transform_indices = @transform_5, window_bounds = array<i64: 1024, 120>}, {pipeline_mode = #tpu.pipeline_mode<synchronous>, transform_indices = @transform_6, window_bounds = array<i64: 1, 120>}, {pipeline_mode = #tpu.pipeline_mode<synchronous>, transform_indices = @transform_7, window_bounds = array<i64: 120, 84>}, {pipeline_mode = #tpu.pipeline_mode<synchronous>, transform_indices = @transform_8, window_bounds = array<i64: 1, 84>}, {pipeline_mode = #tpu.pipeline_mode<synchronous>, transform_indices = @transform_9, window_bounds = array<i64: 84, 19>}, {pipeline_mode = #tpu.pipeline_mode<synchronous>, transform_indices = @transform_10, window_bounds = array<i64: 1, 19>}, {transform_indices = @transform_11, window_bounds = array<i64: 16, 19>}]} {
    %c0 = arith.constant 0 : index
    %c0_0 = arith.constant 0 : index
    %c0_1 = arith.constant 0 : index
    %0 = vector.load %arg1[%c0, %c0_0, %c0_1] : memref<1x768x140xbf16, #tpu.memory_space<vmem>>, vector<1x768x140xbf16>
    %1 = vector.shape_cast %0 : vector<1x768x140xbf16> to vector<768x140xbf16>
    %c0_2 = arith.constant 0 : index
    %c0_3 = arith.constant 0 : index
    %2 = vector.load %arg2[%c0_2, %c0_3] : memref<140x256xbf16, #tpu.memory_space<vmem>>, vector<140x256xbf16>
    %cst = arith.constant dense<0.000000e+00> : vector<768x256xf32>
    %3 = tpu.matmul %1, %2, %cst {dimension_numbers = #tpu.dot_dimension_numbers<[1], [0], [0], [1], [0, 0, 1, 1], [], []>} : vector<768x140xbf16>, vector<140x256xbf16>, vector<768x256xf32> -> vector<768x256xf32>
    %4 = vector.extract_strided_slice %3 {offsets = [0, 0], sizes = [384, 256], strides = [1, 1]} : vector<768x256xf32> to vector<384x256xf32>
    %5 = vector.extract_strided_slice %3 {offsets = [384, 0], sizes = [384, 256], strides = [1, 1]} : vector<768x256xf32> to vector<384x256xf32>
    %6 = arith.maximumf %4, %5 : vector<384x256xf32>
    %7 = vector.extract_strided_slice %6 {offsets = [0, 0], sizes = [384, 128], strides = [1, 1]} : vector<384x256xf32> to vector<384x128xf32>
    %8 = vector.extract_strided_slice %6 {offsets = [0, 128], sizes = [384, 128], strides = [1, 1]} : vector<384x256xf32> to vector<384x128xf32>
    %9 = arith.maximumf %7, %8 : vector<384x128xf32>
    %c0_4 = arith.constant 0 : index
    %c0_5 = arith.constant 0 : index
    %10 = vector.load %arg3[%c0_4, %c0_5] : memref<1x128xf32, #tpu.memory_space<vmem>>, vector<1x128xf32>
    %11 = vector.broadcast %10 : vector<1x128xf32> to vector<384x128xf32>
    %12 = arith.addf %9, %11 : vector<384x128xf32>
    %cst_6 = arith.constant 0.000000e+00 : f32
    %13 = vector.broadcast %cst_6 : f32 to vector<384x128xf32>
    %14 = arith.maximumf %12, %13 : vector<384x128xf32>
    %15 = arith.truncf %14 : vector<384x128xf32> to vector<384x128xbf16>
    %16 = vector.extract_strided_slice %15 {offsets = [0, 0], sizes = [320, 128], strides = [1, 1]} : vector<384x128xbf16> to vector<320x128xbf16>
    %17 = vector.extract_strided_slice %15 {offsets = [16, 0], sizes = [320, 128], strides = [1, 1]} : vector<384x128xbf16> to vector<320x128xbf16>
    %18 = vector.extract_strided_slice %15 {offsets = [32, 0], sizes = [320, 128], strides = [1, 1]} : vector<384x128xbf16> to vector<320x128xbf16>
    %19 = vector.extract_strided_slice %15 {offsets = [48, 0], sizes = [320, 128], strides = [1, 1]} : vector<384x128xbf16> to vector<320x128xbf16>
    %20 = vector.extract_strided_slice %15 {offsets = [64, 0], sizes = [320, 128], strides = [1, 1]} : vector<384x128xbf16> to vector<320x128xbf16>
    %21 = tpu.concatenate %16, %17, %18, %19, %20 in 1 : vector<320x128xbf16>, vector<320x128xbf16>, vector<320x128xbf16>, vector<320x128xbf16>, vector<320x128xbf16> -> vector<320x640xbf16>
    %c0_7 = arith.constant 0 : index
    %c0_8 = arith.constant 0 : index
    %22 = vector.load %arg4[%c0_7, %c0_8] : memref<640x256xbf16, #tpu.memory_space<vmem>>, vector<640x256xbf16>
    %cst_9 = arith.constant dense<0.000000e+00> : vector<320x256xf32>
    %23 = tpu.matmul %21, %22, %cst_9 {dimension_numbers = #tpu.dot_dimension_numbers<[1], [0], [0], [1], [0, 0, 1, 1], [], []>} : vector<320x640xbf16>, vector<640x256xbf16>, vector<320x256xf32> -> vector<320x256xf32>
    %24 = vector.extract_strided_slice %23 {offsets = [0, 0], sizes = [16, 256], strides = [1, 1]} : vector<320x256xf32> to vector<16x256xf32>
    %25 = vector.extract_strided_slice %23 {offsets = [16, 0], sizes = [16, 256], strides = [1, 1]} : vector<320x256xf32> to vector<16x256xf32>
    %26 = arith.maximumf %24, %25 : vector<16x256xf32>
    %27 = vector.extract_strided_slice %26 {offsets = [0, 0], sizes = [16, 128], strides = [1, 1]} : vector<16x256xf32> to vector<16x128xf32>
    %28 = vector.extract_strided_slice %26 {offsets = [0, 128], sizes = [16, 128], strides = [1, 1]} : vector<16x256xf32> to vector<16x128xf32>
    %29 = arith.maximumf %27, %28 : vector<16x128xf32>
    %c0_10 = arith.constant 0 : index
    %c0_11 = arith.constant 0 : index
    %30 = vector.load %arg5[%c0_10, %c0_11] : memref<1x128xf32, #tpu.memory_space<vmem>>, vector<1x128xf32>
    %31 = vector.broadcast %30 : vector<1x128xf32> to vector<16x128xf32>
    %32 = arith.addf %29, %31 : vector<16x128xf32>
    %cst_12 = arith.constant 0.000000e+00 : f32
    %33 = vector.broadcast %cst_12 : f32 to vector<16x128xf32>
    %34 = arith.maximumf %32, %33 : vector<16x128xf32>
    %35 = vector.extract_strided_slice %23 {offsets = [32, 0], sizes = [16, 256], strides = [1, 1]} : vector<320x256xf32> to vector<16x256xf32>
    %36 = vector.extract_strided_slice %23 {offsets = [48, 0], sizes = [16, 256], strides = [1, 1]} : vector<320x256xf32> to vector<16x256xf32>
    %37 = arith.maximumf %35, %36 : vector<16x256xf32>
    %38 = vector.extract_strided_slice %37 {offsets = [0, 0], sizes = [16, 128], strides = [1, 1]} : vector<16x256xf32> to vector<16x128xf32>
    %39 = vector.extract_strided_slice %37 {offsets = [0, 128], sizes = [16, 128], strides = [1, 1]} : vector<16x256xf32> to vector<16x128xf32>
    %40 = arith.maximumf %38, %39 : vector<16x128xf32>
    %c0_13 = arith.constant 0 : index
    %c0_14 = arith.constant 0 : index
    %41 = vector.load %arg5[%c0_13, %c0_14] : memref<1x128xf32, #tpu.memory_space<vmem>>, vector<1x128xf32>
    %42 = vector.broadcast %41 : vector<1x128xf32> to vector<16x128xf32>
    %43 = arith.addf %40, %42 : vector<16x128xf32>
    %cst_15 = arith.constant 0.000000e+00 : f32
    %44 = vector.broadcast %cst_15 : f32 to vector<16x128xf32>
    %45 = arith.maximumf %43, %44 : vector<16x128xf32>
    %46 = vector.extract_strided_slice %23 {offsets = [64, 0], sizes = [16, 256], strides = [1, 1]} : vector<320x256xf32> to vector<16x256xf32>
    %47 = vector.extract_strided_slice %23 {offsets = [80, 0], sizes = [16, 256], strides = [1, 1]} : vector<320x256xf32> to vector<16x256xf32>
    %48 = arith.maximumf %46, %47 : vector<16x256xf32>
    %49 = vector.extract_strided_slice %48 {offsets = [0, 0], sizes = [16, 128], strides = [1, 1]} : vector<16x256xf32> to vector<16x128xf32>
    %50 = vector.extract_strided_slice %48 {offsets = [0, 128], sizes = [16, 128], strides = [1, 1]} : vector<16x256xf32> to vector<16x128xf32>
    %51 = arith.maximumf %49, %50 : vector<16x128xf32>
    %c0_16 = arith.constant 0 : index
    %c0_17 = arith.constant 0 : index
    %52 = vector.load %arg5[%c0_16, %c0_17] : memref<1x128xf32, #tpu.memory_space<vmem>>, vector<1x128xf32>
    %53 = vector.broadcast %52 : vector<1x128xf32> to vector<16x128xf32>
    %54 = arith.addf %51, %53 : vector<16x128xf32>
    %cst_18 = arith.constant 0.000000e+00 : f32
    %55 = vector.broadcast %cst_18 : f32 to vector<16x128xf32>
    %56 = arith.maximumf %54, %55 : vector<16x128xf32>
    %57 = vector.extract_strided_slice %23 {offsets = [96, 0], sizes = [16, 256], strides = [1, 1]} : vector<320x256xf32> to vector<16x256xf32>
    %58 = vector.extract_strided_slice %23 {offsets = [112, 0], sizes = [16, 256], strides = [1, 1]} : vector<320x256xf32> to vector<16x256xf32>
    %59 = arith.maximumf %57, %58 : vector<16x256xf32>
    %60 = vector.extract_strided_slice %59 {offsets = [0, 0], sizes = [16, 128], strides = [1, 1]} : vector<16x256xf32> to vector<16x128xf32>
    %61 = vector.extract_strided_slice %59 {offsets = [0, 128], sizes = [16, 128], strides = [1, 1]} : vector<16x256xf32> to vector<16x128xf32>
    %62 = arith.maximumf %60, %61 : vector<16x128xf32>
    %c0_19 = arith.constant 0 : index
    %c0_20 = arith.constant 0 : index
    %63 = vector.load %arg5[%c0_19, %c0_20] : memref<1x128xf32, #tpu.memory_space<vmem>>, vector<1x128xf32>
    %64 = vector.broadcast %63 : vector<1x128xf32> to vector<16x128xf32>
    %65 = arith.addf %62, %64 : vector<16x128xf32>
    %cst_21 = arith.constant 0.000000e+00 : f32
    %66 = vector.broadcast %cst_21 : f32 to vector<16x128xf32>
    %67 = arith.maximumf %65, %66 : vector<16x128xf32>
    %68 = vector.extract_strided_slice %23 {offsets = [192, 0], sizes = [16, 256], strides = [1, 1]} : vector<320x256xf32> to vector<16x256xf32>
    %69 = vector.extract_strided_slice %23 {offsets = [208, 0], sizes = [16, 256], strides = [1, 1]} : vector<320x256xf32> to vector<16x256xf32>
    %70 = arith.maximumf %68, %69 : vector<16x256xf32>
    %71 = vector.extract_strided_slice %70 {offsets = [0, 0], sizes = [16, 128], strides = [1, 1]} : vector<16x256xf32> to vector<16x128xf32>
    %72 = vector.extract_strided_slice %70 {offsets = [0, 128], sizes = [16, 128], strides = [1, 1]} : vector<16x256xf32> to vector<16x128xf32>
    %73 = arith.maximumf %71, %72 : vector<16x128xf32>
    %c0_22 = arith.constant 0 : index
    %c0_23 = arith.constant 0 : index
    %74 = vector.load %arg5[%c0_22, %c0_23] : memref<1x128xf32, #tpu.memory_space<vmem>>, vector<1x128xf32>
    %75 = vector.broadcast %74 : vector<1x128xf32> to vector<16x128xf32>
    %76 = arith.addf %73, %75 : vector<16x128xf32>
    %cst_24 = arith.constant 0.000000e+00 : f32
    %77 = vector.broadcast %cst_24 : f32 to vector<16x128xf32>
    %78 = arith.maximumf %76, %77 : vector<16x128xf32>
    %79 = vector.extract_strided_slice %23 {offsets = [224, 0], sizes = [16, 256], strides = [1, 1]} : vector<320x256xf32> to vector<16x256xf32>
    %80 = vector.extract_strided_slice %23 {offsets = [240, 0], sizes = [16, 256], strides = [1, 1]} : vector<320x256xf32> to vector<16x256xf32>
    %81 = arith.maximumf %79, %80 : vector<16x256xf32>
    %82 = vector.extract_strided_slice %81 {offsets = [0, 0], sizes = [16, 128], strides = [1, 1]} : vector<16x256xf32> to vector<16x128xf32>
    %83 = vector.extract_strided_slice %81 {offsets = [0, 128], sizes = [16, 128], strides = [1, 1]} : vector<16x256xf32> to vector<16x128xf32>
    %84 = arith.maximumf %82, %83 : vector<16x128xf32>
    %c0_25 = arith.constant 0 : index
    %c0_26 = arith.constant 0 : index
    %85 = vector.load %arg5[%c0_25, %c0_26] : memref<1x128xf32, #tpu.memory_space<vmem>>, vector<1x128xf32>
    %86 = vector.broadcast %85 : vector<1x128xf32> to vector<16x128xf32>
    %87 = arith.addf %84, %86 : vector<16x128xf32>
    %cst_27 = arith.constant 0.000000e+00 : f32
    %88 = vector.broadcast %cst_27 : f32 to vector<16x128xf32>
    %89 = arith.maximumf %87, %88 : vector<16x128xf32>
    %90 = vector.extract_strided_slice %23 {offsets = [256, 0], sizes = [16, 256], strides = [1, 1]} : vector<320x256xf32> to vector<16x256xf32>
    %91 = vector.extract_strided_slice %23 {offsets = [272, 0], sizes = [16, 256], strides = [1, 1]} : vector<320x256xf32> to vector<16x256xf32>
    %92 = arith.maximumf %90, %91 : vector<16x256xf32>
    %93 = vector.extract_strided_slice %92 {offsets = [0, 0], sizes = [16, 128], strides = [1, 1]} : vector<16x256xf32> to vector<16x128xf32>
    %94 = vector.extract_strided_slice %92 {offsets = [0, 128], sizes = [16, 128], strides = [1, 1]} : vector<16x256xf32> to vector<16x128xf32>
    %95 = arith.maximumf %93, %94 : vector<16x128xf32>
    %c0_28 = arith.constant 0 : index
    %c0_29 = arith.constant 0 : index
    %96 = vector.load %arg5[%c0_28, %c0_29] : memref<1x128xf32, #tpu.memory_space<vmem>>, vector<1x128xf32>
    %97 = vector.broadcast %96 : vector<1x128xf32> to vector<16x128xf32>
    %98 = arith.addf %95, %97 : vector<16x128xf32>
    %cst_30 = arith.constant 0.000000e+00 : f32
    %99 = vector.broadcast %cst_30 : f32 to vector<16x128xf32>
    %100 = arith.maximumf %98, %99 : vector<16x128xf32>
    %101 = vector.extract_strided_slice %23 {offsets = [288, 0], sizes = [16, 256], strides = [1, 1]} : vector<320x256xf32> to vector<16x256xf32>
    %102 = vector.extract_strided_slice %23 {offsets = [304, 0], sizes = [16, 256], strides = [1, 1]} : vector<320x256xf32> to vector<16x256xf32>
    %103 = arith.maximumf %101, %102 : vector<16x256xf32>
    %104 = vector.extract_strided_slice %103 {offsets = [0, 0], sizes = [16, 128], strides = [1, 1]} : vector<16x256xf32> to vector<16x128xf32>
    %105 = vector.extract_strided_slice %103 {offsets = [0, 128], sizes = [16, 128], strides = [1, 1]} : vector<16x256xf32> to vector<16x128xf32>
    %106 = arith.maximumf %104, %105 : vector<16x128xf32>
    %c0_31 = arith.constant 0 : index
    %c0_32 = arith.constant 0 : index
    %107 = vector.load %arg5[%c0_31, %c0_32] : memref<1x128xf32, #tpu.memory_space<vmem>>, vector<1x128xf32>
    %108 = vector.broadcast %107 : vector<1x128xf32> to vector<16x128xf32>
    %109 = arith.addf %106, %108 : vector<16x128xf32>
    %cst_33 = arith.constant 0.000000e+00 : f32
    %110 = vector.broadcast %cst_33 : f32 to vector<16x128xf32>
    %111 = arith.maximumf %109, %110 : vector<16x128xf32>
    %112 = tpu.concatenate %34, %45, %56, %67, %78, %89, %100, %111 in 1 : vector<16x128xf32>, vector<16x128xf32>, vector<16x128xf32>, vector<16x128xf32>, vector<16x128xf32>, vector<16x128xf32>, vector<16x128xf32>, vector<16x128xf32> -> vector<16x1024xf32>
    %c0_34 = arith.constant 0 : index
    %c0_35 = arith.constant 0 : index
    %113 = vector.load %arg6[%c0_34, %c0_35] : memref<1024x120xf32, #tpu.memory_space<vmem>>, vector<1024x120xf32>
    %cst_36 = arith.constant dense<0.000000e+00> : vector<16x120xf32>
    %114 = tpu.matmul %112, %113, %cst_36 {dimension_numbers = #tpu.dot_dimension_numbers<[1], [0], [0], [1], [0, 0, 1, 1], [], []>} : vector<16x1024xf32>, vector<1024x120xf32>, vector<16x120xf32> -> vector<16x120xf32>
    %c0_37 = arith.constant 0 : index
    %c0_38 = arith.constant 0 : index
    %115 = vector.load %arg7[%c0_37, %c0_38] : memref<1x120xf32, #tpu.memory_space<vmem>>, vector<1x120xf32>
    %116 = vector.broadcast %115 : vector<1x120xf32> to vector<16x120xf32>
    %117 = arith.addf %114, %116 : vector<16x120xf32>
    %cst_39 = arith.constant 0.000000e+00 : f32
    %118 = vector.broadcast %cst_39 : f32 to vector<16x120xf32>
    %119 = arith.maximumf %117, %118 : vector<16x120xf32>
    %c0_40 = arith.constant 0 : index
    %c0_41 = arith.constant 0 : index
    %120 = vector.load %arg8[%c0_40, %c0_41] : memref<120x84xf32, #tpu.memory_space<vmem>>, vector<120x84xf32>
    %cst_42 = arith.constant dense<0.000000e+00> : vector<16x84xf32>
    %121 = tpu.matmul %119, %120, %cst_42 {dimension_numbers = #tpu.dot_dimension_numbers<[1], [0], [0], [1], [0, 0, 1, 1], [], []>} : vector<16x120xf32>, vector<120x84xf32>, vector<16x84xf32> -> vector<16x84xf32>
    %c0_43 = arith.constant 0 : index
    %c0_44 = arith.constant 0 : index
    %122 = vector.load %arg9[%c0_43, %c0_44] : memref<1x84xf32, #tpu.memory_space<vmem>>, vector<1x84xf32>
    %123 = vector.broadcast %122 : vector<1x84xf32> to vector<16x84xf32>
    %124 = arith.addf %121, %123 : vector<16x84xf32>
    %cst_45 = arith.constant 0.000000e+00 : f32
    %125 = vector.broadcast %cst_45 : f32 to vector<16x84xf32>
    %126 = arith.maximumf %124, %125 : vector<16x84xf32>
    %c0_46 = arith.constant 0 : index
    %c0_47 = arith.constant 0 : index
    %127 = vector.load %arg10[%c0_46, %c0_47] : memref<84x19xf32, #tpu.memory_space<vmem>>, vector<84x19xf32>
    %cst_48 = arith.constant dense<0.000000e+00> : vector<16x19xf32>
    %128 = tpu.matmul %126, %127, %cst_48 {dimension_numbers = #tpu.dot_dimension_numbers<[1], [0], [0], [1], [0, 0, 1, 1], [], []>} : vector<16x84xf32>, vector<84x19xf32>, vector<16x19xf32> -> vector<16x19xf32>
    %c0_49 = arith.constant 0 : index
    %c0_50 = arith.constant 0 : index
    %129 = vector.load %arg11[%c0_49, %c0_50] : memref<1x19xf32, #tpu.memory_space<vmem>>, vector<1x19xf32>
    %130 = vector.broadcast %129 : vector<1x19xf32> to vector<16x19xf32>
    %131 = arith.addf %128, %130 : vector<16x19xf32>
    %cst_51 = arith.constant dense<0xFF800000> : vector<16xf32>
    %132 = vector.multi_reduction <maximumf>, %131, %cst_51 [1] : vector<16x19xf32> to vector<16xf32>
    %133 = vector.shape_cast %132 : vector<16xf32> to vector<16x1xf32>
    %134 = vector.broadcast %133 : vector<16x1xf32> to vector<16x19xf32>
    %135 = arith.subf %131, %134 : vector<16x19xf32>
    %136 = math.exp %135 : vector<16x19xf32>
    %cst_52 = arith.constant dense<0.000000e+00> : vector<16xf32>
    %137 = vector.multi_reduction <add>, %136, %cst_52 [1] : vector<16x19xf32> to vector<16xf32>
    %138 = vector.shape_cast %137 : vector<16xf32> to vector<16x1xf32>
    %139 = vector.broadcast %138 : vector<16x1xf32> to vector<16x19xf32>
    %140 = arith.divf %136, %139 : vector<16x19xf32>
    %c0_53 = arith.constant 0 : index
    %c0_54 = arith.constant 0 : index
    %141 = vector.load %arg12[%c0_53, %c0_54] : memref<16x19xf32, #tpu.memory_space<vmem>>, vector<16x19xf32>
    tpu.vector_store %arg12[%c0_53, %c0_54], %140 {strides = array<i32>} : memref<16x19xf32, #tpu.memory_space<vmem>>, vector<16x19xf32>,
    return
  }
  func.func @transform_0(%arg0: i32) -> (i32, i32, i32) {
    %c0_i32 = arith.constant 0 : i32
    %c0_i32_0 = arith.constant 0 : i32
    %c0_i32_1 = arith.constant 0 : i32
    return %arg0, %c0_i32, %c0_i32_0 : i32, i32, i32
  }
  func.func @transform_1(%arg0: i32) -> (i32, i32) {
    %c0_i32 = arith.constant 0 : i32
    %c0_i32_0 = arith.constant 0 : i32
    %c0_i32_1 = arith.constant 0 : i32
    return %c0_i32, %c0_i32_0 : i32, i32
  }
  func.func @transform_2(%arg0: i32) -> (i32, i32) {
    %c0_i32 = arith.constant 0 : i32
    %c0_i32_0 = arith.constant 0 : i32
    %c0_i32_1 = arith.constant 0 : i32
    return %c0_i32, %c0_i32_0 : i32, i32
  }
  func.func @transform_3(%arg0: i32) -> (i32, i32) {
    %c0_i32 = arith.constant 0 : i32
    %c0_i32_0 = arith.constant 0 : i32
    %c0_i32_1 = arith.constant 0 : i32
    return %c0_i32, %c0_i32_0 : i32, i32
  }
  func.func @transform_4(%arg0: i32) -> (i32, i32) {
    %c0_i32 = arith.constant 0 : i32
    %c0_i32_0 = arith.constant 0 : i32
    %c0_i32_1 = arith.constant 0 : i32
    return %c0_i32, %c0_i32_0 : i32, i32
  }
  func.func @transform_5(%arg0: i32) -> (i32, i32) {
    %c0_i32 = arith.constant 0 : i32
    %c0_i32_0 = arith.constant 0 : i32
    %c0_i32_1 = arith.constant 0 : i32
    return %c0_i32, %c0_i32_0 : i32, i32
  }
  func.func @transform_6(%arg0: i32) -> (i32, i32) {
    %c0_i32 = arith.constant 0 : i32
    %c0_i32_0 = arith.constant 0 : i32
    %c0_i32_1 = arith.constant 0 : i32
    return %c0_i32, %c0_i32_0 : i32, i32
  }
  func.func @transform_7(%arg0: i32) -> (i32, i32) {
    %c0_i32 = arith.constant 0 : i32
    %c0_i32_0 = arith.constant 0 : i32
    %c0_i32_1 = arith.constant 0 : i32
    return %c0_i32, %c0_i32_0 : i32, i32
  }
  func.func @transform_8(%arg0: i32) -> (i32, i32) {
    %c0_i32 = arith.constant 0 : i32
    %c0_i32_0 = arith.constant 0 : i32
    %c0_i32_1 = arith.constant 0 : i32
    return %c0_i32, %c0_i32_0 : i32, i32
  }
  func.func @transform_9(%arg0: i32) -> (i32, i32) {
    %c0_i32 = arith.constant 0 : i32
    %c0_i32_0 = arith.constant 0 : i32
    %c0_i32_1 = arith.constant 0 : i32
    return %c0_i32, %c0_i32_0 : i32, i32
  }
  func.func @transform_10(%arg0: i32) -> (i32, i32) {
    %c0_i32 = arith.constant 0 : i32
    %c0_i32_0 = arith.constant 0 : i32
    %c0_i32_1 = arith.constant 0 : i32
    return %c0_i32, %c0_i32_0 : i32, i32
  }
  func.func @transform_11(%arg0: i32) -> (i32, i32) {
    %c0_i32 = arith.constant 0 : i32
    %c0_i32_0 = arith.constant 0 : i32
    return %arg0, %c0_i32 : i32, i32
  }
}

</mosaic_0001>

<bundles_post_ra>
// kernel: separate_baseline_forward.1
= control target key start
LH: loop header
LB: loop body
LE: loop exit
PB: predicated region body
PF: predicated region fallthrough
CT: control target
= control target key end

     0   :  { %s5891_s17 = smov 0   ;;  %s8864_s0 = inlined_call_operand.vmem [shape: bf16[2,768,140], index: 0, kind: input, shape index: {}]   ;;  %s8865_s1 = inlined_call_operand.vmem [shape: bf16[140,256], index: 1, kind: input, shape index: {}]   ;;  %s8866_s2 = inlined_call_operand.vmem [shape: f32[1,128], index: 2, kind: input, shape index: {}]   ;;  %s8867_s3 = inlined_call_operand.vmem [shape: bf16[640,256], index: 3, kind: input, shape index: {}]   ;;  %s8868_s4 = inlined_call_operand.vmem [shape: f32[1,128], index: 4, kind: input, shape index: {}]   ;;  %s8869_s5 = inlined_call_operand.vmem [shape: f32[1024,120], index: 5, kind: input, shape index: {}]   ;;  %s8870_s6 = inlined_call_operand.vmem [shape: f32[1,120], index: 6, kind: input, shape index: {}]   ;;  %s8871_s7 = inlined_call_operand.vmem [shape: f32[120,84], index: 7, kind: input, shape index: {}]   ;;  %s8872_s8 = inlined_call_operand.vmem [shape: f32[1,84], index: 8, kind: input, shape index: {}]   ;;  %s8873_s9 = inlined_call_operand.vmem [shape: f32[84,19], index: 9, kind: input, shape index: {}]   ;;  %s8874_s10 = inlined_call_operand.vmem [shape: f32[1,19], index: 10, kind: input, shape index: {}]   ;;  %s8875_s11 = inlined_call_operand.vmem [shape: f32[32,19], index: 11, kind: output, shape index: {}]  }
   0x1 LB: > { %s5897_s18 = sadd.s32 4294967295, %s5829_s17   ;;  %p4710_p0 = scmp.ge.s32.totalorder %s5829_s17, 1  ;;  %s5829_s17 = sphi %s5891_s17, %s21_s17  }
   0x2   : > { %p337_p1 = scmp.lt.s32.totalorder %s5829_s17, 3 }
   0x4   : > { %p338_p2 = pnand %p4710_p0, %p337_p1 }
   0x6   : > { %341 = sbr.rel (%p338_p2) target bundleno = 2744 (0xab8), region = 64 }
   0xb   : > { %v5156_v0 = vld [vmem:[%s8865_s1 + $0x70] sm:$0xf]  ;;  %v5704_v1 = vld [vmem:[%s8865_s1 + $0x74] sm:$0xf0]  ;;  %v5148_v2 = vld [vmem:[%s8865_s1 + $0x60] sm:$0xf] }
   0xc   : > { %v5157_v3 = vor.u32 %v5704_v1, %v5156_v0  ;;  %v5702_v4 = vld [vmem:[%s8865_s1 + $0x64] sm:$0xf0]  ;;  %v5164_v5 = vld [vmem:[%s8865_s1 + $0x80] sm:$0xf]  ;;  %vm1168_vm0 = vcmask 1045504   ;;  %p377_p3 = scmp.lt.s32.totalorder %s5897_s18, 1 }
   0xd   : > { %v5706_v6 = vld [vmem:[%s8865_s1 + $0x84] sm:$0x30]  ;;  %v5149_v8 = vor.u32 %v5702_v4, %v5148_v2  ;;  %v5140_v10 = vld [vmem:[%s8865_s1 + $0x50] sm:$0xf]  ;;  %v5700_v11 = vld [vmem:[%s8865_s1 + $0x54] sm:$0xf0] }
   0xe   : > { %v5165_v7 = vor.u32 %v5706_v6, %v5164_v5  ;;  %1175 = vmatpush.bf16.msra.mxu0 %v5157_v3  ;;  %s378_s12 = scalar_select %p377_p3, %s5897_s18, 1  ;;  %v5132_v12 = vld [vmem:[%s8865_s1 + $0x40] sm:$0xf]  ;;  %v5141_v13 = vor.u32 %v5700_v11, %v5140_v10  ;;  %v5698_v14 = vld [vmem:[%s8865_s1 + $0x44] sm:$0xf0]  ;;  %vm1023_vm1 = vcmask 97280  }
   0xf   : > { %v5705_v15 = vld [vmem:[%s8865_s1 + $0x84] sm:$0xf]  ;;  %v5166_v16 = vld [vmem:[%s8865_s1 + $0x88] sm:$0x30]  ;;  %v5133_v21 = vor.u32 %v5698_v14, %v5132_v12  ;;  %v5124_v25 = vld [vmem:[%s8865_s1 + $0x30] sm:$0xf] }
  0x10   : > { %v1170_v9 = vsel %vm1168_vm0, %v5165_v7, 0  ;;  %s5800_s19 = smul.u32 768, %s378_s12  ;;  %v5169_v17 = vor.u32 %v5705_v15, %v5166_v16  ;;  %v5696_v26 = vld [vmem:[%s8865_s1 + $0x34] sm:$0xf0]  ;;  %v5116_v29 = vld [vmem:[%s8865_s1 + $0x20] sm:$0xf] }
  0x11   : > { %5787 = vmatpush.bf16.msra.mxu2 %v1170_v9  ;;  %1431 = vmatpush.bf16.msra.mxu1 %v1170_v9  ;;  %v5125_v28 = vor.u32 %v5696_v26, %v5124_v25  ;;  %v5694_v30 = vld [vmem:[%s8865_s1 + $0x24] sm:$0xf0]  ;;  %v5108_v32 = vld [vmem:[%s8865_s1 + $0x10] sm:$0xf]  ;;  %v5692_v33 = vld [vmem:[%s8865_s1 + $0x14] sm:$0xf0] }
  0x12   : > { %1176 = vmatpush.bf16.msra.mxu0 %v5149_v8  ;;  %s5943_s30 = scalar_lea.vmem %s8864_s0, %s5800_s19  ;;  %v1173_v24 = vsel %vm1168_vm0, %v5169_v17, 0  ;;  %v5117_v31 = vor.u32 %v5694_v30, %v5116_v29  ;;  %v5109_v36 = vor.u32 %v5692_v33, %v5108_v32  ;;  %v5100_v40 = vld [vmem:[%s8865_s1] sm:$0xf]  ;;  %v5690_v41 = vld [vmem:[%s8865_s1 + $0x4] sm:$0xf0]  ;;  %vm4572_vm2 = vcmask 1043456  }
  0x13   : > { %v5679_v18 = vld [vmem:[%s5943_s30 + $0x2b4] sm:$0xf]  ;;  %v5062_v19 = vld [vmem:[%s5943_s30 + $0x2b8] sm:$0xf0]  ;;  %v5593_v22 = vld [vmem:[%s5943_s30 + $0x4] sm:$0xf]  ;;  %5788 = vmatpush.bf16.msra.mxu3 %v1173_v24  ;;  %v5101_v45 = vor.u32 %v5690_v41, %v5100_v40 }
  0x14   : > { %v5947_v20 = vor.u32 %v5679_v18, %v5062_v19  ;;  %v4718_v23 = vld [vmem:[%s5943_s30 + $0x8] sm:$0xf0]  ;;  %v5681_v34 = vld [vmem:[%s5943_s30 + $0x2c4] sm:$0xf]  ;;  %v5595_v37 = vld [vmem:[%s5943_s30 + $0x14] sm:$0xf] }
  0x15   : > { %v5960_v27 = vor.u32 %v5593_v22, %v4718_v23  ;;  %v5070_v35 = vld [vmem:[%s5943_s30 + $0x2c8] sm:$0xf0]  ;;  %v4726_v38 = vld [vmem:[%s5943_s30 + $0x18] sm:$0xf0]  ;;  %v5703_v43 = vld [vmem:[%s8865_s1 + $0x74] sm:$0xf] }
  0x16   : > { %1177 = vmatpush.bf16.msra.mxu0 %v5141_v13  ;;  %5213 = vmatmul.msk.bf16.vlgmr.msra.gmra.mxu2 %vm1023_vm1, %v5947_v20  ;;  %v5980_v39 = vor.u32 %v5681_v34, %v5070_v35  ;;  %v5988_v42 = vor.u32 %v5595_v37, %v4726_v38  ;;  %v5158_v44 = vld [vmem:[%s8865_s1 + $0x78] sm:$0xf0]  ;;  %v4716_v46 = vld [vmem:[%s5943_s30] sm:$0xf]  ;;  %v5594_v47 = vld [vmem:[%s5943_s30 + $0x4] sm:$0xf0] }
  0x17   : > { %8940 = vst [vmem:[#allocation2_spill] sm:$0xff] %v5960_v27  ;;  %5170 = vmatmul.msk.bf16.vlgmr.msra.gmra.mxu1 %vm1023_vm1, %v5960_v27  ;;  %v5161_v48 = vor.u32 %v5703_v43, %v5158_v44  ;;  %v5701_v49 = vld [vmem:[%s8865_s1 + $0x64] sm:$0xf]  ;;  %v5150_v50 = vld [vmem:[%s8865_s1 + $0x68] sm:$0xf0]  ;;  %v6006_v52 = vor.u32 %v5594_v47, %v4716_v46  ;;  %vm4518_vm3 = vcmask 982016  }
  0x18   : > { %8941 = vst [vmem:[#allocation3_spill] sm:$0xff] %v5988_v42  ;;  %v5153_v51 = vor.u32 %v5701_v49, %v5150_v50  ;;  %v5699_v53 = vld [vmem:[%s8865_s1 + $0x54] sm:$0xf]  ;;  %v5142_v54 = vld [vmem:[%s8865_s1 + $0x58] sm:$0xf0]  ;;  %vm4565_vm4 = vcmask 687104  }
  0x19   : > { %1673 = vmatpush.bf16.msrb.mxu2 %v5161_v48  ;;  %v5697_v55 = vld [vmem:[%s8865_s1 + $0x44] sm:$0xf]  ;;  %v5145_v56 = vor.u32 %v5699_v53, %v5142_v54  ;;  %v5134_v57 = vld [vmem:[%s8865_s1 + $0x48] sm:$0xf0]  ;;  %v5683_v58 = vld [vmem:[%s5943_s30 + $0x2d4] sm:$0xf] }
  0x1a   : > { %1178 = vmatpush.bf16.msra.mxu0 %v5133_v21  ;;  %v5078_v59 = vld [vmem:[%s5943_s30 + $0x2d8] sm:$0xf0]  ;;  %v5137_v60 = vor.u32 %v5697_v55, %v5134_v57  ;;  %v5597_v61 = vld [vmem:[%s5943_s30 + $0x24] sm:$0xf]  ;;  %v4734_v62 = vld [vmem:[%s5943_s30 + $0x28] sm:$0xf0] }
  0x1b   : > { %v6027_v63 = vor.u32 %v5683_v58, %v5078_v59  ;;  %v6029_v0 = vor.u32 %v5597_v61, %v4734_v62  ;;  %v5695_v1 = vld [vmem:[%s8865_s1 + $0x34] sm:$0xf]  ;;  %v5126_v2 = vld [vmem:[%s8865_s1 + $0x38] sm:$0xf0]  ;;  %v4724_v3 = vld [vmem:[%s5943_s30 + $0x10] sm:$0xf] }
  0x1c   : > { %v5596_v4 = vld [vmem:[%s5943_s30 + $0x14] sm:$0xf0]  ;;  %v5129_v5 = vor.u32 %v5695_v1, %v5126_v2  ;;  %v5693_v6 = vld [vmem:[%s8865_s1 + $0x24] sm:$0xf]  ;;  %v5118_v7 = vld [vmem:[%s8865_s1 + $0x28] sm:$0xf0] }
  0x1d   : > { %1674 = vmatpush.bf16.msrb.mxu2 %v5153_v51  ;;  %8942 = vst [vmem:[#allocation4_spill] sm:$0xff] %v6029_v0  ;;  %v5121_v8 = vor.u32 %v5693_v6, %v5118_v7  ;;  %v4725_v9 = vor.u32 %v5596_v4, %v4724_v3  ;;  %v5691_v10 = vld [vmem:[%s8865_s1 + $0x14] sm:$0xf]  ;;  %v5110_v11 = vld [vmem:[%s8865_s1 + $0x18] sm:$0xf0]  ;;  %vm4599_vm5 = vcmask 154624  }
  0x1e   : > { %1179 = vmatpush.bf16.msra.mxu0 %v5125_v28  ;;  %v5689_v12 = vld [vmem:[%s8865_s1 + $0x4] sm:$0xf]  ;;  %v5113_v13 = vor.u32 %v5691_v10, %v5110_v11  ;;  %v5102_v14 = vld [vmem:[%s8865_s1 + $0x8] sm:$0xf0]  ;;  %v5599_v18 = vld [vmem:[%s5943_s30 + $0x34] sm:$0xf] }
  0x1f   : > { %v5685_v15 = vld [vmem:[%s5943_s30 + $0x2e4] sm:$0xf]  ;;  %v5086_v16 = vld [vmem:[%s5943_s30 + $0x2e8] sm:$0xf0]  ;;  %v5105_v17 = vor.u32 %v5689_v12, %v5102_v14  ;;  %v4742_v19 = vld [vmem:[%s5943_s30 + $0x38] sm:$0xf0] }
  0x20   : > { %v6065_v21 = vor.u32 %v5685_v15, %v5086_v16  ;;  %v6067_v22 = vor.u32 %v5599_v18, %v4742_v19  ;;  %v4732_v23 = vld [vmem:[%s5943_s30 + $0x20] sm:$0xf]  ;;  %v5687_v26 = vld [vmem:[%s5943_s30 + $0x2f4] sm:$0xf]  ;;  %v5094_v28 = vld [vmem:[%s5943_s30 + $0x2f8] sm:$0xf0] }
  0x21   : > { %1675 = vmatpush.bf16.msrb.mxu2 %v5145_v56  ;;  %v5601_v29 = vld [vmem:[%s5943_s30 + $0x44] sm:$0xf]  ;;  %v4750_v30 = vld [vmem:[%s5943_s30 + $0x48] sm:$0xf0]  ;;  %v4740_v33 = vld [vmem:[%s5943_s30 + $0x30] sm:$0xf] }
  0x22   : > { %1180 = vmatpush.bf16.msra.mxu0 %v5117_v31  ;;  %8943 = vst [vmem:[#allocation5_spill] sm:$0xff] %v6067_v22  ;;  %v6079_v31 = vor.u32 %v5687_v26, %v5094_v28  ;;  %v6081_v32 = vor.u32 %v5601_v29, %v4750_v30  ;;  %v5600_v34 = vld [vmem:[%s5943_s30 + $0x34] sm:$0xf0]  ;;  %v4758_v37 = vld [vmem:[%s5943_s30 + $0x58] sm:$0xf0]  ;;  %s4712_s28 = sshll.u32 %s5897_s18, 1 }
  0x23   : > { %v4741_v35 = vor.u32 %v5600_v34, %v4740_v33  ;;  %v4748_v40 = vld [vmem:[%s5943_s30 + $0x40] sm:$0xf]  ;;  %v5602_v41 = vld [vmem:[%s5943_s30 + $0x44] sm:$0xf0]  ;;  %v5605_v44 = vld [vmem:[%s5943_s30 + $0x64] sm:$0xf] }
  0x24   : > { %8944 = vst [vmem:[#allocation6_spill] sm:$0xff] %v6079_v31  ;;  %v4749_v43 = vor.u32 %v5602_v41, %v4748_v40  ;;  %v4756_v47 = vld [vmem:[%s5943_s30 + $0x50] sm:$0xf]  ;;  %v5604_v48 = vld [vmem:[%s5943_s30 + $0x54] sm:$0xf0]  ;;  %p383_p4 = scmp.lt.s32.totalorder %s4712_s28, 3 }
  0x25   : > { %1676 = vmatpush.bf16.msrb.mxu2 %v5137_v60  ;;  %8945 = vst [vmem:[#allocation7_spill] sm:$0xff] %v6081_v32  ;;  %v4757_v49 = vor.u32 %v5604_v48, %v4756_v47  ;;  %v5607_v50 = vld [vmem:[%s5943_s30 + $0x74] sm:$0xf]  ;;  %v4774_v51 = vld [vmem:[%s5943_s30 + $0x78] sm:$0xf0] }
  0x26   : > { %1181 = vmatpush.bf16.msra.mxu0 %v5109_v36  ;;  %5214 = vmatmul.msk.bf16.gmra.mxu2 %vm1023_vm1, %v5980_v39  ;;  %v5603_v36 = vld [vmem:[%s5943_s30 + $0x54] sm:$0xf]  ;;  %v4764_v53 = vld [vmem:[%s5943_s30 + $0x60] sm:$0xf]  ;;  %v5606_v54 = vld [vmem:[%s5943_s30 + $0x64] sm:$0xf0] }
  0x27   : > { %5171 = vmatmul.msk.bf16.gmra.mxu1 %vm1023_vm1, %v5988_v42  ;;  %v4761_v38 = vor.u32 %v5603_v36, %v4758_v37  ;;  %v4765_v55 = vor.u32 %v5606_v54, %v4764_v53  ;;  %v5609_v56 = vld [vmem:[%s5943_s30 + $0x84] sm:$0xf]  ;;  %v4782_v57 = vld [vmem:[%s5943_s30 + $0x88] sm:$0xf0]  ;;  %v4772_v59 = vld [vmem:[%s5943_s30 + $0x70] sm:$0xf] }
  0x28   : > { %v4785_v58 = vor.u32 %v5609_v56, %v4782_v57  ;;  %v5608_v60 = vld [vmem:[%s5943_s30 + $0x74] sm:$0xf0]  ;;  %v5611_v2 = vld [vmem:[%s5943_s30 + $0x94] sm:$0xf]  ;;  %v4790_v3 = vld [vmem:[%s5943_s30 + $0x98] sm:$0xf0] }
  0x29   : > { %1677 = vmatpush.bf16.msrb.mxu2 %v5129_v5  ;;  %5223 = vmatmul.msk.bf16.vlgmr.msra.gmra.mxu3 %vm1023_vm1, %v4761_v38  ;;  %v6113_v62 = vor.u32 %v5608_v60, %v4772_v59  ;;  %v4793_v4 = vor.u32 %v5611_v2, %v4790_v3  ;;  %v4780_v7 = vld [vmem:[%s5943_s30 + $0x80] sm:$0xf]  ;;  %v5613_v14 = vld [vmem:[%s5943_s30 + $0xa4] sm:$0xf]  ;;  %v4798_v15 = vld [vmem:[%s5943_s30 + $0xa8] sm:$0xf0] }
  0x2a   : > { %1182 = vmatpush.bf16.msra.mxu0 %v5101_v45  ;;  %v4766_v45 = vld [vmem:[%s5943_s30 + $0x68] sm:$0xf0]  ;;  %v4801_v16 = vor.u32 %v5613_v14, %v4798_v15  ;;  %v5615_v34 = vld [vmem:[%s5943_s30 + $0xb4] sm:$0xf]  ;;  %v4804_v57 = vld [vmem:[%s5943_s30 + $0xb0] sm:$0xf] }
  0x2b   : > { %v4769_v46 = vor.u32 %v5605_v44, %v4766_v45  ;;  %v5614_v44 = vld [vmem:[%s5943_s30 + $0xa4] sm:$0xf0]  ;;  %v4812_v14 = vld [vmem:[%s5943_s30 + $0xc0] sm:$0xf]  ;;  %s9252_s28 = smov (!%p383_p4, %s4712_s28), 3 }
  0x2c   : > { %v5618_v15 = vld [vmem:[%s5943_s30 + $0xc4] sm:$0xf0]  ;;  %s4713_s29 = sshll.u32 %s9252_s28, 3 }
  0x2d   : > { %1183 = vmatmul.bf16.vlgmr.msra.gmra.mxu0 %v6006_v52  ;;  %1678 = vmatpush.bf16.msrb.mxu2 %v5121_v8  ;;  %v5610_v8 = vld [vmem:[%s5943_s30 + $0x84] sm:$0xf0]  ;;  %s386_s13 = scalar_lea.vmem %s8875_s11, %s4713_s29 }
  0x2e   : > { %1929 = vmatpush.bf16.msrb.mxu0 %v1173_v24  ;;  %v5598_v24 = vld [vmem:[%s5943_s30 + $0x24] sm:$0xf0]  ;;  %v6126_v10 = vor.u32 %v5610_v8, %v4780_v7 }
  0x2f   : > { %v4733_v25 = vor.u32 %v5598_v24, %v4732_v23  ;;  %v4788_v24 = vld [vmem:[%s5943_s30 + $0x90] sm:$0xf] }
  0x31   : > { %1679 = vmatpush.bf16.msrb.mxu2 %v5113_v13 }
  0x35   : > { %1680 = vmatpush.bf16.msrb.mxu2 %v5105_v17 }
  0x36   : > { %5215 = vmatmul.msk.bf16.gmra.mxu2 %vm1023_vm1, %v6027_v63 }
  0x37   : > { %5172 = vmatmul.msk.bf16.gmra.mxu1 %vm1023_vm1, %v6029_v0  ;;  %v4902_v0 = vld [vmem:[%s5943_s30 + $0x178] sm:$0xf0] }
  0x39   : > { %5224 = vmatmul.msk.bf16.gmra.mxu3 %vm1023_vm1, %v4769_v46 }
  0x3d   : > { %1188 = vmatmul.bf16.gmra.mxu0 %v4725_v9 }
  0x46   : > { %5216 = vmatmul.msk.bf16.gmra.mxu2 %vm1023_vm1, %v6065_v21 }
  0x47   : > { %5173 = vmatmul.msk.bf16.gmra.mxu1 %vm1023_vm1, %v6067_v22 }
  0x4d   : > { %1193 = vmatmul.bf16.gmra.mxu0 %v4733_v25 }
  0x56   : > { %5217 = vmatmul.msk.bf16.gmra.mxu2 %vm1023_vm1, %v6079_v31 }
  0x57   : > { %5174 = vmatmul.msk.bf16.gmra.mxu1 %vm1023_vm1, %v6081_v32  ;;  %v5634_v32 = vld [vmem:[%s5943_s30 + $0x144] sm:$0xf0] }
  0x5d   : > { %1198 = vmatmul.bf16.gmra.mxu0 %v4741_v35 }
  0x66   : > { %1681 = vmatmul.bf16.vlgmr.msrb.gmra.mxu2 %v6006_v52  ;;  %v4777_v52 = vor.u32 %v5607_v50, %v4774_v51  ;;  %v5617_v50 = vld [vmem:[%s5943_s30 + $0xc4] sm:$0xf]  ;;  %v4814_v51 = vld [vmem:[%s5943_s30 + $0xc8] sm:$0xf0] }
  0x67   : > { %5175 = vmatmul.msk.bf16.gmra.mxu1 %vm1023_vm1, %v4761_v38 }
  0x68   : > { %5225 = vmatmul.msk.bf16.gmra.mxu3 %vm1023_vm1, %v4777_v52 }
  0x6d   : > { %1203 = vmatmul.bf16.gmra.mxu0 %v4749_v43 }
  0x76   : > { %1686 = vmatmul.bf16.gmra.mxu2 %v4725_v9 }
  0x77   : > { %5176 = vmatmul.msk.bf16.gmra.mxu1 %vm1023_vm1, %v4769_v46 }
  0x78   : > { %5226 = vmatmul.msk.bf16.gmra.mxu3 %vm1023_vm1, %v4785_v58 }
  0x7d   : > { %1208 = vmatmul.bf16.gmra.mxu0 %v4757_v49 }
  0x86   : > { %1691 = vmatmul.bf16.gmra.mxu2 %v4733_v25  ;;  %v5612_v25 = vld [vmem:[%s5943_s30 + $0x94] sm:$0xf0] }
  0x87   : > { %5177 = vmatmul.msk.bf16.gmra.mxu1 %vm1023_vm1, %v4777_v52  ;;  %v6143_v28 = vor.u32 %v5612_v25, %v4788_v24  ;;  %v4817_v52 = vor.u32 %v5617_v50, %v4814_v51 }
  0x88   : > { %5227 = vmatmul.msk.bf16.gmra.mxu3 %vm1023_vm1, %v4793_v4 }
  0x8d   : > { %1213 = vmatmul.bf16.gmra.mxu0 %v4765_v55 }
  0x94   : > { %v1433_v61 = vpop.f32.mrf.mxu1 }
  0x96   : > { %1696 = vmatmul.bf16.gmra.mxu2 %v4741_v35  ;;  %v4806_v35 = vld [vmem:[%s5943_s30 + $0xb8] sm:$0xf0] }
  0x97   : > { %5178 = vmatmul.msk.bf16.gmra.mxu1 %vm1023_vm1, %v4785_v58  ;;  %v4809_v36 = vor.u32 %v5615_v34, %v4806_v35  ;;  %v5616_v58 = vld [vmem:[%s5943_s30 + $0xb4] sm:$0xf0] }
  0x98   : > { %5228 = vmatmul.msk.bf16.gmra.mxu3 %vm1023_vm1, %v4801_v16  ;;  %v6178_v60 = vor.u32 %v5616_v58, %v4804_v57 }
  0x99   : > { %v6116_v1 = vpop.f32.mrf.mxu2 }
  0x9a   : > { %8946 = vst [vmem:[#allocation8_spill] sm:$0xff] %v6116_v1  ;;  %v5639_v1 = vld [vmem:[%s5943_s30 + $0x174] sm:$0xf] }
  0x9b   : > { %v4905_v42 = vor.u32 %v5639_v1, %v4902_v0 }
  0x9c   : > { %v1435_v5 = vpop.f32.mrf.mxu1 }
  0x9d   : > { %1218 = vmatmul.bf16.gmra.mxu0 %v6113_v62 }
  0xa1   : > { %v6122_v6 = vpop.f32.mrf.mxu2 }
  0xa2   : > { %8947 = vst [vmem:[#allocation9_spill] sm:$0xff] %v6122_v6 }
  0xa4   : > { %v1438_v9 = vpop.f32.mrf.mxu1 }
  0xa6   : > { %1701 = vmatmul.bf16.gmra.mxu2 %v4749_v43  ;;  %v4796_v43 = vld [vmem:[%s5943_s30 + $0xa0] sm:$0xf] }
  0xa7   : > { %5179 = vmatmul.msk.bf16.gmra.mxu1 %vm1023_vm1, %v4793_v4  ;;  %v6160_v46 = vor.u32 %v5614_v44, %v4796_v43  ;;  %v5619_v4 = vld [vmem:[%s5943_s30 + $0xd4] sm:$0xf]  ;;  %v5620_v43 = vld [vmem:[%s5943_s30 + $0xd4] sm:$0xf0] }
  0xa8   : > { %5229 = vmatmul.msk.bf16.gmra.mxu3 %vm1023_vm1, %v4809_v36 }
  0xa9   : > { %v6129_v11 = vpop.f32.mrf.mxu2 }
  0xaa   : > { %8948 = vst [vmem:[#allocation10_spill] sm:$0xff] %v6129_v11  ;;  %v1184_v12 = vpop.f32.mrf.mxu0 }
  0xab   : > { %v6131_v13 = vadd.f32 %v1433_v61, %v1184_v12 }
  0xac   : > { %v1440_v17 = vpop.f32.mrf.mxu1 }
  0xad   : > { %8949 = vst [vmem:[#allocation11_spill] sm:$0xff] %v6131_v13  ;;  %1223 = vmatmul.bf16.gmra.mxu0 %v6126_v10 }
  0xb1   : > { %v6137_v18 = vpop.f32.mrf.mxu2 }
  0xb2   : > { %8950 = vst [vmem:[#allocation12_spill] sm:$0xff] %v6137_v18  ;;  %v1186_v19 = vpop.f32.mrf.mxu0 }
  0xb3   : > { %v6139_v23 = vadd.f32 %v1435_v5, %v1186_v19  ;;  %v4822_v5 = vld [vmem:[%s5943_s30 + $0xd8] sm:$0xf0] }
  0xb4   : > { %v1443_v26 = vpop.f32.mrf.mxu1  ;;  %v4825_v7 = vor.u32 %v5619_v4, %v4822_v5  ;;  %v5738_v4 = vld [vmem:[%s8867_s3 + $0xf4] sm:$0xf0] }
  0xb5   : > { %8951 = vst [vmem:[#allocation13_spill] sm:$0xff] %v6139_v23 }
  0xb6   : > { %1706 = vmatmul.bf16.gmra.mxu2 %v4757_v49 }
  0xb7   : > { %5180 = vmatmul.msk.bf16.gmra.mxu1 %vm1023_vm1, %v4801_v16 }
  0xb8   : > { %5230 = vmatmul.msk.bf16.gmra.mxu3 %vm1023_vm1, %v4817_v52 }
  0xb9   : > { %v6146_v29 = vpop.f32.mrf.mxu2 }
  0xba   : > { %8952 = vst [vmem:[#allocation14_spill] sm:$0xff] %v6146_v29  ;;  %v1189_v30 = vpop.f32.mrf.mxu0  ;;  %v4876_v29 = vld [vmem:[%s5943_s30 + $0x140] sm:$0xf] }
  0xbb   : > { %v6148_v33 = vadd.f32 %v1438_v9, %v1189_v30  ;;  %v4830_v30 = vld [vmem:[%s5943_s30 + $0xe8] sm:$0xf0] }
  0xbc   : > { %v1445_v37 = vpop.f32.mrf.mxu1 }
  0xbd   : > { %8953 = vst [vmem:[#allocation15_spill] sm:$0xff] %v6148_v33  ;;  %1228 = vmatmul.bf16.gmra.mxu0 %v6143_v28 }
  0xc1   : > { %v6154_v38 = vpop.f32.mrf.mxu2 }
  0xc2   : > { %8954 = vst [vmem:[#allocation16_spill] sm:$0xff] %v6154_v38  ;;  %v1191_v40 = vpop.f32.mrf.mxu0  ;;  %v5633_v38 = vld [vmem:[%s5943_s30 + $0x144] sm:$0xf] }
  0xc3   : > { %v6156_v41 = vadd.f32 %v1440_v17, %v1191_v40  ;;  %v6196_v17 = vor.u32 %v5618_v15, %v4812_v14  ;;  %v4820_v40 = vld [vmem:[%s5943_s30 + $0xd0] sm:$0xf]  ;;  %v5722_v15 = vld [vmem:[%s8867_s3 + $0x74] sm:$0xf0] }
  0xc4   : > { %v1448_v45 = vpop.f32.mrf.mxu1  ;;  %v5324_v14 = vld [vmem:[%s8867_s3 + $0x70] sm:$0xf] }
  0xc5   : > { %8955 = vst [vmem:[#allocation17_spill] sm:$0xff] %v6156_v41  ;;  %v4996_v41 = vld [vmem:[%s5943_s30 + $0x230] sm:$0xf] }
  0xc6   : > { %1711 = vmatmul.bf16.gmra.mxu2 %v4765_v55 }
  0xc7   : > { %5181 = vmatmul.msk.bf16.gmra.mxu1 %vm1023_vm1, %v4809_v36 }
  0xc8   : > { %5231 = vmatmul.msk.bf16.gmra.mxu3 %vm1023_vm1, %v4825_v7 }
  0xc9   : > { %v6163_v47 = vpop.f32.mrf.mxu2 }
  0xca   : > { %8956 = vst [vmem:[#allocation18_spill] sm:$0xff] %v6163_v47  ;;  %v1194_v48 = vpop.f32.mrf.mxu0 }
  0xcb   : > { %v6165_v49 = vadd.f32 %v1443_v26, %v1194_v48  ;;  %v5621_v26 = vld [vmem:[%s5943_s30 + $0xe4] sm:$0xf] }
  0xcc   : > { %v1450_v53 = vpop.f32.mrf.mxu1  ;;  %v4833_v34 = vor.u32 %v5621_v26, %v4830_v30 }
  0xcd   : > { %8957 = vst [vmem:[#allocation19_spill] sm:$0xff] %v6165_v49  ;;  %1233 = vmatmul.bf16.gmra.mxu0 %v6160_v46 }
  0xd1   : > { %v6171_v54 = vpop.f32.mrf.mxu2 }
  0xd2   : > { %8958 = vst [vmem:[#allocation20_spill] sm:$0xff] %v6171_v54  ;;  %v1196_v55 = vpop.f32.mrf.mxu0  ;;  %v4870_v54 = vld [vmem:[%s5943_s30 + $0x138] sm:$0xf0] }
  0xd3   : > { %v6173_v56 = vadd.f32 %v1445_v37, %v1196_v55 }
  0xd4   : > { %v1453_v59 = vpop.f32.mrf.mxu1 }
  0xd5   : > { %8959 = vst [vmem:[#allocation21_spill] sm:$0xff] %v6173_v56 }
  0xd6   : > { %1716 = vmatmul.bf16.gmra.mxu2 %v6113_v62 }
  0xd7   : > { %5182 = vmatmul.msk.bf16.gmra.mxu1 %vm1023_vm1, %v4817_v52  ;;  %v5623_v52 = vld [vmem:[%s5943_s30 + $0xf4] sm:$0xf] }
  0xd8   : > { %5232 = vmatmul.msk.bf16.gmra.mxu3 %vm1023_vm1, %v4833_v34 }
  0xd9   : > { %v6181_v61 = vpop.f32.mrf.mxu2 }
  0xda   : > { %8960 = vst [vmem:[#allocation22_spill] sm:$0xff] %v6181_v61  ;;  %v1199_v2 = vpop.f32.mrf.mxu0 }
  0xdb   : > { %v6183_v3 = vadd.f32 %v1448_v45, %v1199_v2  ;;  %v6214_v45 = vor.u32 %v5620_v43, %v4820_v40  ;;  %v5388_v2 = vld [vmem:[%s8867_s3 + $0xf0] sm:$0xf] }
  0xdc   : > { %v1455_v8 = vpop.f32.mrf.mxu1  ;;  %v5389_v5 = vor.u32 %v5738_v4, %v5388_v2 }
  0xdd   : > { %8961 = vst [vmem:[#allocation23_spill] sm:$0xff] %v6183_v3  ;;  %1238 = vmatmul.bf16.gmra.mxu0 %v6178_v60 }
  0xde   : > { %3188 = vmatpush.bf16.msrb.mxu3 %v5389_v5 }
  0xe1   : > { %v6189_v62 = vpop.f32.mrf.mxu2 }
  0xe2   : > { %8962 = vst [vmem:[#allocation24_spill] sm:$0xff] %v6189_v62  ;;  %v1201_v9 = vpop.f32.mrf.mxu0 }
  0xe3   : > { %v6191_v12 = vadd.f32 %v1450_v53, %v1201_v9  ;;  %v4838_v53 = vld [vmem:[%s5943_s30 + $0xf8] sm:$0xf0] }
  0xe4   : > { %v1458_v16 = vpop.f32.mrf.mxu1  ;;  %v4841_v55 = vor.u32 %v5623_v52, %v4838_v53  ;;  %v4836_v53 = vld [vmem:[%s5943_s30 + $0xf0] sm:$0xf] }
  0xe5   : > { %8963 = vst [vmem:[#allocation25_spill] sm:$0xff] %v6191_v12 }
  0xe6   : > { %1721 = vmatmul.bf16.gmra.mxu2 %v6126_v10 }
  0xe7   : > { %5183 = vmatmul.msk.bf16.gmra.mxu1 %vm1023_vm1, %v4825_v7  ;;  %v4828_v7 = vld [vmem:[%s5943_s30 + $0xe0] sm:$0xf] }
  0xe8   : > { %5233 = vmatmul.msk.bf16.gmra.mxu3 %vm1023_vm1, %v4841_v55 }
  0xe9   : > { %v6199_v19 = vpop.f32.mrf.mxu2 }
  0xea   : > { %8964 = vst [vmem:[#allocation26_spill] sm:$0xff] %v6199_v19  ;;  %v1204_v24 = vpop.f32.mrf.mxu0 }
  0xeb   : > { %v6201_v25 = vadd.f32 %v1453_v59, %v1204_v24 }
  0xec   : > { %v1460_v35 = vpop.f32.mrf.mxu1 }
  0xed   : > { %8965 = vst [vmem:[#allocation27_spill] sm:$0xff] %v6201_v25  ;;  %1243 = vmatmul.bf16.gmra.mxu0 %v6196_v17 }
  0xf1   : > { %v6207_v10 = vpop.f32.mrf.mxu2 }
  0xf2   : > { %8966 = vst [vmem:[#allocation28_spill] sm:$0xff] %v6207_v10  ;;  %v1206_v36 = vpop.f32.mrf.mxu0 }
  0xf3   : > { %v6209_v37 = vadd.f32 %v1455_v8, %v1206_v36  ;;  %v5622_v8 = vld [vmem:[%s5943_s30 + $0xe4] sm:$0xf0] }
  0xf4   : > { %v1463_v44 = vpop.f32.mrf.mxu1  ;;  %v6244_v24 = vor.u32 %v5622_v8, %v4828_v7  ;;  %v1956_v7 = vpop.f32.mrf.mxu3  ;;  %v5627_v8 = vld [vmem:[%s5943_s30 + $0x114] sm:$0xf] }
  0xf5   : > { %8967 = vst [vmem:[#allocation29_spill] sm:$0xff] %v6209_v37 }
  0xf6   : > { %1726 = vmatmul.bf16.gmra.mxu2 %v6143_v28 }
  0xf7   : > { %5184 = vmatmul.msk.bf16.gmra.mxu1 %vm1023_vm1, %v4833_v34  ;;  %v5625_v34 = vld [vmem:[%s5943_s30 + $0x104] sm:$0xf] }
  0xf9   : > { %v6217_v48 = vpop.f32.mrf.mxu2 }
  0xfa   : > { %8968 = vst [vmem:[#allocation30_spill] sm:$0xff] %v6217_v48  ;;  %v1209_v50 = vpop.f32.mrf.mxu0  ;;  %v4878_v48 = vld [vmem:[%s5943_s30 + $0x148] sm:$0xf0] }
  0xfb   : > { %v6219_v51 = vadd.f32 %v1458_v16, %v1209_v50  ;;  %v5325_v16 = vor.u32 %v5722_v15, %v5324_v14  ;;  %v4854_v14 = vld [vmem:[%s5943_s30 + $0x118] sm:$0xf0]  ;;  %v4881_v10 = vor.u32 %v5633_v38, %v4878_v48 }
  0xfc   : > { %v1465_v57 = vpop.f32.mrf.mxu1  ;;  %v4857_v15 = vor.u32 %v5627_v8, %v4854_v14  ;;  %v5629_v14 = vld [vmem:[%s5943_s30 + $0x124] sm:$0xf] }
  0xfd   : > { %1248 = vmatmul.bf16.gmra.mxu0 %v6214_v45  ;;  %3087 = vmatpush.bf16.msrb.mxu1 %v5325_v16 }
 0x101   : > { %v6225_v28 = vpop.f32.mrf.mxu2 }
 0x102   : > { %8969 = vst [vmem:[#allocation31_spill] sm:$0xff] %v6225_v28  ;;  %v1211_v58 = vpop.f32.mrf.mxu0 }
 0x103   : > { %v6227_v59 = vadd.f32 %v1460_v35, %v1211_v58  ;;  %v4846_v35 = vld [vmem:[%s5943_s30 + $0x108] sm:$0xf0] }
 0x104   : > { %v1468_v9 = vpop.f32.mrf.mxu1  ;;  %v4849_v36 = vor.u32 %v5625_v34, %v4846_v35  ;;  %v1958_v34 = vpop.f32.mrf.mxu3  ;;  %v4844_v35 = vld [vmem:[%s5943_s30 + $0x100] sm:$0xf] }
 0x106   : > { %1731 = vmatmul.bf16.gmra.mxu2 %v6160_v46  ;;  %5234 = vmatmul.msk.bf16.gmra.mxu3 %vm1023_vm1, %v4849_v36 }
 0x107   : > { %5185 = vmatmul.msk.bf16.gmra.mxu1 %vm1023_vm1, %v4841_v55  ;;  %v5624_v55 = vld [vmem:[%s5943_s30 + $0xf4] sm:$0xf0] }
 0x109   : > { %v6247_v26 = vpop.f32.mrf.mxu2 }
 0x10a   : > { %8970 = vst [vmem:[#allocation32_spill] sm:$0xff] %v6247_v26  ;;  %v1214_v30 = vpop.f32.mrf.mxu0 }
 0x10b   : > { %v6249_v46 = vadd.f32 %v1463_v44, %v1214_v30  ;;  %v6262_v44 = vor.u32 %v5624_v55, %v4836_v53 }
 0x10c   : > { %v1470_v40 = vpop.f32.mrf.mxu1 }
 0x10d   : > { %1253 = vmatmul.bf16.gmra.mxu0 %v6244_v24 }
 0x111   : > { %v6255_v43 = vpop.f32.mrf.mxu2 }
 0x112   : > { %8971 = vst [vmem:[#allocation33_spill] sm:$0xff] %v6255_v43  ;;  %v1216_v50 = vpop.f32.mrf.mxu0  ;;  %v5631_v43 = vld [vmem:[%s5943_s30 + $0x134] sm:$0xf] }
 0x113   : > { %v6257_v52 = vadd.f32 %v1465_v57, %v1216_v50  ;;  %v4873_v26 = vor.u32 %v5631_v43, %v4870_v54 }
 0x114   : > { %v1473_v58 = vpop.f32.mrf.mxu1 }
 0x116   : > { %1736 = vmatmul.bf16.gmra.mxu2 %v6178_v60  ;;  %5235 = vmatmul.msk.bf16.gmra.mxu3 %vm1023_vm1, %v4857_v15 }
 0x117   : > { %5186 = vmatmul.msk.bf16.gmra.mxu1 %vm1023_vm1, %v4849_v36 }
 0x119   : > { %v6265_v2 = vpop.f32.mrf.mxu2 }
 0x11a   : > { %8972 = vst [vmem:[#allocation34_spill] sm:$0xff] %v6265_v2  ;;  %v1219_v4 = vpop.f32.mrf.mxu0 }
 0x11b   : > { %v6267_v5 = vadd.f32 %v1468_v9, %v1219_v4  ;;  %v5626_v9 = vld [vmem:[%s5943_s30 + $0x104] sm:$0xf0]  ;;  %v1961_v4 = vpop.f32.mrf.mxu3 }
 0x11c   : > { %v1475_v57 = vpop.f32.mrf.mxu1  ;;  %v6280_v50 = vor.u32 %v5626_v9, %v4844_v35  ;;  %v4852_v9 = vld [vmem:[%s5943_s30 + $0x110] sm:$0xf] }
 0x11d   : > { %1258 = vmatmul.bf16.gmra.mxu0 %v6262_v44 }
 0x121   : > { %v6272_v16 = vpop.f32.mrf.mxu2 }
 0x122   : > { %8973 = vst [vmem:[#allocation35_spill] sm:$0xff] %v6272_v16  ;;  %v1221_v60 = vpop.f32.mrf.mxu0 }
 0x123   : > { %v6274_v30 = vadd.f32 %v1470_v40, %v1221_v60  ;;  %v4862_v60 = vld [vmem:[%s5943_s30 + $0x128] sm:$0xf0] }
 0x124   : > { %v1478_v36 = vpop.f32.mrf.mxu1  ;;  %v4865_v16 = vor.u32 %v5629_v14, %v4862_v60 }
 0x126   : > { %1741 = vmatmul.bf16.gmra.mxu2 %v6196_v17 }
 0x127   : > { %5187 = vmatmul.msk.bf16.gmra.mxu1 %vm1023_vm1, %v4857_v15  ;;  %v1963_v15 = vpop.f32.mrf.mxu3  ;;  %5236 = vmatmul.msk.bf16.gmra.mxu3 %vm1023_vm1, %v4865_v16 }
 0x129   : > { %v6283_v53 = vpop.f32.mrf.mxu2 }
 0x12a   : > { %8974 = vst [vmem:[#allocation36_spill] sm:$0xff] %v6283_v53  ;;  %v1224_v55 = vpop.f32.mrf.mxu0 }
 0x12b   : > { %v6285_v40 = vadd.f32 %v1473_v58, %v1224_v55  ;;  %v5628_v58 = vld [vmem:[%s5943_s30 + $0x114] sm:$0xf0] }
 0x12c   : > { %v1480_v8 = vpop.f32.mrf.mxu1  ;;  %v6298_v53 = vor.u32 %v5628_v58, %v4852_v9 }
 0x12d   : > { %1263 = vmatmul.bf16.gmra.mxu0 %v6280_v50 }
 0x131   : > { %v6290_v62 = vpop.f32.mrf.mxu2 }
 0x132   : > { %8975 = vst [vmem:[#allocation37_spill] sm:$0xff] %v6290_v62  ;;  %v1226_v17 = vpop.f32.mrf.mxu0  ;;  %v1966_v62 = vpop.f32.mrf.mxu3 }
 0x133   : > { %v6292_v35 = vadd.f32 %v1475_v57, %v1226_v17 }
 0x134   : > { %v1483_v55 = vpop.f32.mrf.mxu1 }
 0x136   : > { %1746 = vmatmul.bf16.gmra.mxu2 %v6214_v45 }
 0x137   : > { %5188 = vmatmul.msk.bf16.gmra.mxu1 %vm1023_vm1, %v4865_v16 }
 0x139   : > { %v1707_v14 = vpop.f32.mrf.mxu2 }
 0x13a   : > { %v1229_v60 = vpop.f32.mrf.mxu0  ;;  %v6301_v57 = vadd.f32 %v1956_v7, %v1707_v14  ;;  %v1968_v28 = vpop.f32.mrf.mxu3  ;;  %5237 = vmatmul.msk.bf16.gmra.mxu3 %vm1023_vm1, %v4873_v26  ;;  %v4860_v7 = vld [vmem:[%s5943_s30 + $0x120] sm:$0xf] }
 0x13b   : > { %v6303_v17 = vadd.f32 %v1478_v36, %v1229_v60  ;;  %v5630_v36 = vld [vmem:[%s5943_s30 + $0x124] sm:$0xf0] }
 0x13c   : > { %v1485_v2 = vpop.f32.mrf.mxu1  ;;  %v6316_v60 = vor.u32 %v5630_v36, %v4860_v7 }
 0x13d   : > { %1268 = vmatmul.bf16.gmra.mxu0 %v6298_v53 }
 0x141   : > { %v1709_v45 = vpop.f32.mrf.mxu2 }
 0x142   : > { %v1231_v9 = vpop.f32.mrf.mxu0  ;;  %v6308_v58 = vadd.f32 %v1958_v34, %v1709_v45  ;;  %v1971_v45 = vpop.f32.mrf.mxu3 }
 0x143   : > { %v6310_v16 = vadd.f32 %v1480_v8, %v1231_v9 }
 0x144   : > { %v1488_v14 = vpop.f32.mrf.mxu1 }
 0x146   : > { %1751 = vmatmul.bf16.gmra.mxu2 %v6244_v24 }
 0x147   : > { %5189 = vmatmul.msk.bf16.gmra.mxu1 %vm1023_vm1, %v4873_v26 }
 0x149   : > { %v1712_v54 = vpop.f32.mrf.mxu2 }
 0x14a   : > { %v1234_v43 = vpop.f32.mrf.mxu0  ;;  %v6319_v34 = vadd.f32 %v1961_v4, %v1712_v54  ;;  %v1973_v18 = vpop.f32.mrf.mxu3  ;;  %5238 = vmatmul.msk.bf16.gmra.mxu3 %vm1023_vm1, %v4881_v10  ;;  %v4868_v4 = vld [vmem:[%s5943_s30 + $0x130] sm:$0xf]  ;;  %v5632_v54 = vld [vmem:[%s5943_s30 + $0x134] sm:$0xf0] }
 0x14b   : > { %v6321_v8 = vadd.f32 %v1483_v55, %v1234_v43  ;;  %v6334_v43 = vor.u32 %v5632_v54, %v4868_v4  ;;  %v5635_v54 = vld [vmem:[%s5943_s30 + $0x154] sm:$0xf] }
 0x14c   : > { %v1490_v9 = vpop.f32.mrf.mxu1 }
 0x14d   : > { %1273 = vmatmul.bf16.gmra.mxu0 %v6316_v60 }
 0x151   : > { %v1714_v24 = vpop.f32.mrf.mxu2 }
 0x152   : > { %v1236_v7 = vpop.f32.mrf.mxu0  ;;  %v6326_v36 = vadd.f32 %v1963_v15, %v1714_v24  ;;  %v1976_v24 = vpop.f32.mrf.mxu3 }
 0x153   : > { %v6328_v26 = vadd.f32 %v1485_v2, %v1236_v7  ;;  %v5380_v7 = vld [vmem:[%s8867_s3 + $0xe0] sm:$0xf] }
 0x154   : > { %v1493_v55 = vpop.f32.mrf.mxu1 }
 0x156   : > { %1756 = vmatmul.bf16.gmra.mxu2 %v6262_v44  ;;  %v5736_v44 = vld [vmem:[%s8867_s3 + $0xe4] sm:$0xf0] }
 0x157   : > { %5190 = vmatmul.msk.bf16.gmra.mxu1 %vm1023_vm1, %v4881_v10  ;;  %v5381_v4 = vor.u32 %v5736_v44, %v5380_v7  ;;  %v5720_v10 = vld [vmem:[%s8867_s3 + $0x64] sm:$0xf0] }
 0x159   : > { %v1717_v38 = vpop.f32.mrf.mxu2  ;;  %3189 = vmatpush.bf16.msrb.mxu3 %v5381_v4  ;;  %v6364_v4 = vor.u32 %v5634_v32, %v4876_v29 }
 0x15a   : > { %v1239_v48 = vpop.f32.mrf.mxu0  ;;  %v6337_v15 = vadd.f32 %v1966_v62, %v1717_v38  ;;  %v5316_v62 = vld [vmem:[%s8867_s3 + $0x60] sm:$0xf]  ;;  %v4886_v38 = vld [vmem:[%s5943_s30 + $0x158] sm:$0xf0]  ;;  %v1978_v47 = vpop.f32.mrf.mxu3 }
 0x15b   : > { %v6339_v2 = vadd.f32 %v1488_v14, %v1239_v48  ;;  %v5317_v48 = vor.u32 %v5720_v10, %v5316_v62  ;;  %v4889_v19 = vor.u32 %v5635_v54, %v4886_v38 }
 0x15c   : > { %v1495_v14 = vpop.f32.mrf.mxu1 }
 0x15d   : > { %1278 = vmatmul.bf16.gmra.mxu0 %v6334_v43  ;;  %3088 = vmatpush.bf16.msrb.mxu1 %v5317_v48  ;;  %v5637_v48 = vld [vmem:[%s5943_s30 + $0x164] sm:$0xf] }
 0x15e   : > { %5239 = vmatmul.msk.bf16.gmra.mxu3 %vm1023_vm1, %v4889_v19 }
 0x161   : > { %v1719_v7 = vpop.f32.mrf.mxu2 }
 0x162   : > { %v1241_v44 = vpop.f32.mrf.mxu0  ;;  %v6356_v6 = vadd.f32 %v1968_v28, %v1719_v7  ;;  %v1981_v54 = vpop.f32.mrf.mxu3  ;;  %v4894_v7 = vld [vmem:[%s5943_s30 + $0x168] sm:$0xf0] }
 0x163   : > { %v6358_v61 = vadd.f32 %v1490_v9, %v1241_v44  ;;  %v4897_v44 = vor.u32 %v5637_v48, %v4894_v7 }
 0x164   : > { %v1498_v11 = vpop.f32.mrf.mxu1 }
 0x166   : > { %1761 = vmatmul.bf16.gmra.mxu2 %v6280_v50 }
 0x167   : > { %5191 = vmatmul.msk.bf16.gmra.mxu1 %vm1023_vm1, %v4889_v19 }
 0x169   : > { %v1722_v62 = vpop.f32.mrf.mxu2 }
 0x16a   : > { %v1244_v28 = vpop.f32.mrf.mxu0  ;;  %v6367_v9 = vadd.f32 %v1971_v45, %v1722_v62  ;;  %v1983_v22 = vpop.f32.mrf.mxu3  ;;  %v4884_v45 = vld [vmem:[%s5943_s30 + $0x150] sm:$0xf] }
 0x16b   : > { %v6369_v10 = vadd.f32 %v1493_v55, %v1244_v28  ;;  %v5636_v55 = vld [vmem:[%s5943_s30 + $0x154] sm:$0xf0] }
 0x16c   : > { %v1500_v38 = vpop.f32.mrf.mxu1  ;;  %v6382_v28 = vor.u32 %v5636_v55, %v4884_v45 }
 0x16d   : > { %1283 = vmatmul.bf16.gmra.mxu0 %v6364_v4 }
 0x16e   : > { %5240 = vmatmul.msk.bf16.gmra.mxu3 %vm1023_vm1, %v4897_v44 }
 0x171   : > { %v1724_v50 = vpop.f32.mrf.mxu2 }
 0x172   : > { %v1246_v32 = vpop.f32.mrf.mxu0  ;;  %v6374_v29 = vadd.f32 %v1973_v18, %v1724_v50  ;;  %v1986_v50 = vpop.f32.mrf.mxu3 }
 0x173   : > { %v6376_v19 = vadd.f32 %v1495_v14, %v1246_v32 }
 0x174   : > { %v1503_v62 = vpop.f32.mrf.mxu1 }
 0x176   : > { %1766 = vmatmul.bf16.gmra.mxu2 %v6298_v53 }
 0x177   : > { %5192 = vmatmul.msk.bf16.gmra.mxu1 %vm1023_vm1, %v4897_v44 }
 0x179   : > { %v1727_v48 = vpop.f32.mrf.mxu2 }
 0x17a   : > { %v1249_v18 = vpop.f32.mrf.mxu0  ;;  %v6385_v14 = vadd.f32 %v1976_v24, %v1727_v48  ;;  %v1988_v27 = vpop.f32.mrf.mxu3  ;;  %v5638_v24 = vld [vmem:[%s5943_s30 + $0x164] sm:$0xf0] }
 0x17b   : > { %v6387_v7 = vadd.f32 %v1498_v11, %v1249_v18  ;;  %v4892_v11 = vld [vmem:[%s5943_s30 + $0x160] sm:$0xf] }
 0x17c   : > { %8976 = vst [vmem:[#allocation38_spill] sm:$0xff] %v6385_v14  ;;  %v1505_v32 = vpop.f32.mrf.mxu1  ;;  %v6400_v18 = vor.u32 %v5638_v24, %v4892_v11 }
 0x17d   : > { %8977 = vst [vmem:[#allocation39_spill] sm:$0xff] %v6387_v7  ;;  %1288 = vmatmul.bf16.gmra.mxu0 %v6382_v28 }
 0x17e   : > { %5241 = vmatmul.msk.bf16.gmra.mxu3 %vm1023_vm1, %v4905_v42 }
 0x181   : > { %v1729_v53 = vpop.f32.mrf.mxu2 }
 0x182   : > { %v1251_v45 = vpop.f32.mrf.mxu0  ;;  %v6392_v55 = vadd.f32 %v1978_v47, %v1729_v53  ;;  %v1991_v53 = vpop.f32.mrf.mxu3 }
 0x183   : > { %v6394_v44 = vadd.f32 %v1500_v38, %v1251_v45 }
 0x184   : > { %8978 = vst [vmem:[#allocation40_spill] sm:$0xff] %v6392_v55  ;;  %v1508_v48 = vpop.f32.mrf.mxu1  ;;  %v4910_v55 = vld [vmem:[%s5943_s30 + $0x188] sm:$0xf0] }
 0x185   : > { %8979 = vst [vmem:[#allocation41_spill] sm:$0xff] %v6394_v44  ;;  %v5641_v44 = vld [vmem:[%s5943_s30 + $0x184] sm:$0xf] }
 0x186   : > { %1771 = vmatmul.bf16.gmra.mxu2 %v6316_v60  ;;  %v4913_v31 = vor.u32 %v5641_v44, %v4910_v55 }
 0x187   : > { %5193 = vmatmul.msk.bf16.gmra.mxu1 %vm1023_vm1, %v4905_v42 }
 0x189   : > { %v1732_v0 = vpop.f32.mrf.mxu2 }
 0x18a   : > { %v1254_v1 = vpop.f32.mrf.mxu0  ;;  %v6403_v47 = vadd.f32 %v1981_v54, %v1732_v0  ;;  %v1993_v7 = vpop.f32.mrf.mxu3  ;;  %v4900_v54 = vld [vmem:[%s5943_s30 + $0x170] sm:$0xf] }
 0x18b   : > { %v6405_v38 = vadd.f32 %v1503_v62, %v1254_v1  ;;  %v5640_v62 = vld [vmem:[%s5943_s30 + $0x174] sm:$0xf0] }
 0x18c   : > { %8980 = vst [vmem:[#allocation42_spill] sm:$0xff] %v6403_v47  ;;  %v1510_v45 = vpop.f32.mrf.mxu1  ;;  %v6418_v1 = vor.u32 %v5640_v62, %v4900_v54 }
 0x18d   : > { %8981 = vst [vmem:[#allocation43_spill] sm:$0xff] %v6405_v38  ;;  %1293 = vmatmul.bf16.gmra.mxu0 %v6400_v18 }
 0x18e   : > { %5242 = vmatmul.msk.bf16.gmra.mxu3 %vm1023_vm1, %v4913_v31 }
 0x191   : > { %v1734_v60 = vpop.f32.mrf.mxu2 }
 0x192   : > { %v1256_v11 = vpop.f32.mrf.mxu0  ;;  %v6410_v24 = vadd.f32 %v1983_v22, %v1734_v60  ;;  %v1996_v60 = vpop.f32.mrf.mxu3 }
 0x193   : > { %v6412_v42 = vadd.f32 %v1505_v32, %v1256_v11 }
 0x194   : > { %8982 = vst [vmem:[#allocation44_spill] sm:$0xff] %v6410_v24  ;;  %v1513_v0 = vpop.f32.mrf.mxu1  ;;  %v4918_v24 = vld [vmem:[%s5943_s30 + $0x198] sm:$0xf0] }
 0x195   : > { %8983 = vst [vmem:[#allocation45_spill] sm:$0xff] %v6412_v42  ;;  %v5643_v42 = vld [vmem:[%s5943_s30 + $0x194] sm:$0xf] }
 0x196   : > { %1776 = vmatmul.bf16.gmra.mxu2 %v6334_v43  ;;  %v4921_v38 = vor.u32 %v5643_v42, %v4918_v24 }
 0x197   : > { %5194 = vmatmul.msk.bf16.gmra.mxu1 %vm1023_vm1, %v4913_v31 }
 0x199   : > { %v1737_v55 = vpop.f32.mrf.mxu2 }
 0x19a   : > { %v1259_v22 = vpop.f32.mrf.mxu0  ;;  %v6421_v32 = vadd.f32 %v1986_v50, %v1737_v55  ;;  %v1998_v47 = vpop.f32.mrf.mxu3  ;;  %v4908_v50 = vld [vmem:[%s5943_s30 + $0x180] sm:$0xf] }
 0x19b   : > { %v6423_v44 = vadd.f32 %v1508_v48, %v1259_v22  ;;  %v5642_v48 = vld [vmem:[%s5943_s30 + $0x184] sm:$0xf0] }
 0x19c   : > { %8984 = vst [vmem:[#allocation46_spill] sm:$0xff] %v6421_v32  ;;  %v1515_v11 = vpop.f32.mrf.mxu1  ;;  %v6436_v22 = vor.u32 %v5642_v48, %v4908_v50  ;;  %v4926_v48 = vld [vmem:[%s5943_s30 + $0x1a8] sm:$0xf0] }
 0x19d   : > { %8985 = vst [vmem:[#allocation47_spill] sm:$0xff] %v6423_v44  ;;  %1298 = vmatmul.bf16.gmra.mxu0 %v6418_v1  ;;  %v5718_v44 = vld [vmem:[%s8867_s3 + $0x54] sm:$0xf0] }
 0x19e   : > { %5243 = vmatmul.msk.bf16.gmra.mxu3 %vm1023_vm1, %v4921_v38 }
 0x1a1   : > { %v1739_v43 = vpop.f32.mrf.mxu2 }
 0x1a2   : > { %v1261_v54 = vpop.f32.mrf.mxu0  ;;  %v6428_v62 = vadd.f32 %v1988_v27, %v1739_v43  ;;  %v2001_v43 = vpop.f32.mrf.mxu3 }
 0x1a3   : > { %v6430_v31 = vadd.f32 %v1510_v45, %v1261_v54  ;;  %v5372_v54 = vld [vmem:[%s8867_s3 + $0xd0] sm:$0xf] }
 0x1a4   : > { %8986 = vst [vmem:[#allocation48_spill] sm:$0xff] %v6428_v62  ;;  %v1518_v55 = vpop.f32.mrf.mxu1  ;;  %v5308_v62 = vld [vmem:[%s8867_s3 + $0x50] sm:$0xf] }
 0x1a5   : > { %8987 = vst [vmem:[#allocation49_spill] sm:$0xff] %v6430_v31 }
 0x1a6   : > { %1781 = vmatmul.bf16.gmra.mxu2 %v6364_v4  ;;  %v5734_v4 = vld [vmem:[%s8867_s3 + $0xd4] sm:$0xf0] }
 0x1a7   : > { %5195 = vmatmul.msk.bf16.gmra.mxu1 %vm1023_vm1, %v4921_v38  ;;  %v5645_v38 = vld [vmem:[%s5943_s30 + $0x1a4] sm:$0xf] }
 0x1a9   : > { %v1742_v24 = vpop.f32.mrf.mxu2 }
 0x1aa   : > { %v1264_v42 = vpop.f32.mrf.mxu0  ;;  %v6439_v27 = vadd.f32 %v1991_v53, %v1742_v24  ;;  %v5373_v53 = vor.u32 %v5734_v4, %v5372_v54  ;;  %v2003_v31 = vpop.f32.mrf.mxu3  ;;  %v5309_v54 = vor.u32 %v5718_v44, %v5308_v62  ;;  %v4916_v4 = vld [vmem:[%s5943_s30 + $0x190] sm:$0xf] }
 0x1ab   : > { %v6441_v45 = vadd.f32 %v1513_v0, %v1264_v42  ;;  %v4929_v0 = vor.u32 %v5645_v38, %v4926_v48  ;;  %v5644_v38 = vld [vmem:[%s5943_s30 + $0x194] sm:$0xf0] }
 0x1ac   : > { %8988 = vst [vmem:[#allocation50_spill] sm:$0xff] %v6439_v27  ;;  %v1520_v50 = vpop.f32.mrf.mxu1  ;;  %3190 = vmatpush.bf16.msrb.mxu3 %v5373_v53  ;;  %3089 = vmatpush.bf16.msrb.mxu1 %v5309_v54  ;;  %v4934_v54 = vld [vmem:[%s5943_s30 + $0x1b8] sm:$0xf0] }
 0x1ad   : > { %8989 = vst [vmem:[#allocation51_spill] sm:$0xff] %v6441_v45  ;;  %1303 = vmatmul.bf16.gmra.mxu0 %v6436_v22 }
 0x1ae   : > { %5244 = vmatmul.msk.bf16.gmra.mxu3 %vm1023_vm1, %v4929_v0 }
 0x1b1   : > { %v1744_v24 = vpop.f32.mrf.mxu2 }
 0x1b2   : > { %v1266_v42 = vpop.f32.mrf.mxu0  ;;  %v6452_v45 = vadd.f32 %v1993_v7, %v1744_v24  ;;  %v2006_v44 = vpop.f32.mrf.mxu3 }
 0x1b3   : > { %v6454_v27 = vadd.f32 %v1515_v11, %v1266_v42  ;;  %v6466_v11 = vor.u32 %v5644_v38, %v4916_v4 }
 0x1b4   : > { %8990 = vst [vmem:[#allocation52_spill] sm:$0xff] %v6452_v45  ;;  %v1523_v7 = vpop.f32.mrf.mxu1 }
 0x1b5   : > { %8991 = vst [vmem:[#allocation53_spill] sm:$0xff] %v6454_v27  ;;  %v5647_v27 = vld [vmem:[%s5943_s30 + $0x1b4] sm:$0xf] }
 0x1b6   : > { %1786 = vmatmul.bf16.gmra.mxu2 %v6382_v28  ;;  %v4937_v45 = vor.u32 %v5647_v27, %v4934_v54 }
 0x1b7   : > { %5196 = vmatmul.msk.bf16.gmra.mxu1 %vm1023_vm1, %v4929_v0 }
 0x1b9   : > { %v1747_v48 = vpop.f32.mrf.mxu2 }
 0x1ba   : > { %v1269_v53 = vpop.f32.mrf.mxu0  ;;  %v6469_v24 = vadd.f32 %v1996_v60, %v1747_v48  ;;  %v2008_v32 = vpop.f32.mrf.mxu3  ;;  %v4924_v60 = vld [vmem:[%s5943_s30 + $0x1a0] sm:$0xf] }
 0x1bb   : > { %v6471_v42 = vadd.f32 %v1518_v55, %v1269_v53  ;;  %v5646_v55 = vld [vmem:[%s5943_s30 + $0x1a4] sm:$0xf0] }
 0x1bc   : > { %8992 = vst [vmem:[#allocation54_spill] sm:$0xff] %v6469_v24  ;;  %v1525_v62 = vpop.f32.mrf.mxu1  ;;  %v6484_v53 = vor.u32 %v5646_v55, %v4924_v60 }
 0x1bd   : > { %8993 = vst [vmem:[#allocation55_spill] sm:$0xff] %v6471_v42  ;;  %1308 = vmatmul.bf16.gmra.mxu0 %v6466_v11 }
 0x1be   : > { %5245 = vmatmul.msk.bf16.gmra.mxu3 %vm1023_vm1, %v4937_v45 }
 0x1c1   : > { %v1749_v28 = vpop.f32.mrf.mxu2 }
 0x1c2   : > { %v1271_v4 = vpop.f32.mrf.mxu0  ;;  %v6476_v38 = vadd.f32 %v1998_v47, %v1749_v28  ;;  %v2011_v28 = vpop.f32.mrf.mxu3 }
 0x1c3   : > { %v6478_v0 = vadd.f32 %v1520_v50, %v1271_v4 }
 0x1c4   : > { %8994 = vst [vmem:[#allocation56_spill] sm:$0xff] %v6476_v38  ;;  %v1528_v48 = vpop.f32.mrf.mxu1  ;;  %v4942_v38 = vld [vmem:[%s5943_s30 + $0x1c8] sm:$0xf0] }
 0x1c5   : > { %8995 = vst [vmem:[#allocation57_spill] sm:$0xff] %v6478_v0  ;;  %v5649_v0 = vld [vmem:[%s5943_s30 + $0x1c4] sm:$0xf] }
 0x1c6   : > { %1791 = vmatmul.bf16.gmra.mxu2 %v6400_v18  ;;  %v4945_v42 = vor.u32 %v5649_v0, %v4942_v38 }
 0x1c7   : > { %5197 = vmatmul.msk.bf16.gmra.mxu1 %vm1023_vm1, %v4937_v45 }
 0x1c9   : > { %v1752_v27 = vpop.f32.mrf.mxu2 }
 0x1ca   : > { %v1274_v47 = vpop.f32.mrf.mxu0  ;;  %v6487_v50 = vadd.f32 %v2001_v43, %v1752_v27  ;;  %v2013_v24 = vpop.f32.mrf.mxu3  ;;  %v4932_v43 = vld [vmem:[%s5943_s30 + $0x1b0] sm:$0xf] }
 0x1cb   : > { %v6489_v54 = vadd.f32 %v1523_v7, %v1274_v47  ;;  %v5648_v7 = vld [vmem:[%s5943_s30 + $0x1b4] sm:$0xf0] }
 0x1cc   : > { %8996 = vst [vmem:[#allocation58_spill] sm:$0xff] %v6487_v50  ;;  %v1530_v4 = vpop.f32.mrf.mxu1  ;;  %v6502_v47 = vor.u32 %v5648_v7, %v4932_v43 }
 0x1cd   : > { %8997 = vst [vmem:[#allocation59_spill] sm:$0xff] %v6489_v54  ;;  %1313 = vmatmul.bf16.gmra.mxu0 %v6484_v53 }
 0x1ce   : > { %5246 = vmatmul.msk.bf16.gmra.mxu3 %vm1023_vm1, %v4945_v42 }
 0x1d1   : > { %v1754_v18 = vpop.f32.mrf.mxu2 }
 0x1d2   : > { %v1276_v60 = vpop.f32.mrf.mxu0  ;;  %v6494_v55 = vadd.f32 %v2003_v31, %v1754_v18  ;;  %v2016_v18 = vpop.f32.mrf.mxu3 }
 0x1d3   : > { %v6496_v45 = vadd.f32 %v1525_v62, %v1276_v60 }
 0x1d4   : > { %8998 = vst [vmem:[#allocation60_spill] sm:$0xff] %v6494_v55  ;;  %v1533_v27 = vpop.f32.mrf.mxu1  ;;  %v4950_v55 = vld [vmem:[%s5943_s30 + $0x1d8] sm:$0xf0] }
 0x1d5   : > { %8999 = vst [vmem:[#allocation61_spill] sm:$0xff] %v6496_v45  ;;  %v5651_v45 = vld [vmem:[%s5943_s30 + $0x1d4] sm:$0xf] }
 0x1d6   : > { %1796 = vmatmul.bf16.gmra.mxu2 %v6418_v1  ;;  %v4953_v54 = vor.u32 %v5651_v45, %v4950_v55 }
 0x1d7   : > { %5198 = vmatmul.msk.bf16.gmra.mxu1 %vm1023_vm1, %v4945_v42 }
 0x1d9   : > { %v1757_v38 = vpop.f32.mrf.mxu2 }
 0x1da   : > { %v1279_v31 = vpop.f32.mrf.mxu0  ;;  %v6505_v62 = vadd.f32 %v2006_v44, %v1757_v38  ;;  %v2018_v50 = vpop.f32.mrf.mxu3  ;;  %v4940_v44 = vld [vmem:[%s5943_s30 + $0x1c0] sm:$0xf] }
 0x1db   : > { %v6507_v0 = vadd.f32 %v1528_v48, %v1279_v31  ;;  %v5650_v48 = vld [vmem:[%s5943_s30 + $0x1c4] sm:$0xf0] }
 0x1dc   : > { %9000 = vst [vmem:[#allocation62_spill] sm:$0xff] %v6505_v62  ;;  %v1535_v60 = vpop.f32.mrf.mxu1  ;;  %v6520_v31 = vor.u32 %v5650_v48, %v4940_v44  ;;  %v5653_v44 = vld [vmem:[%s5943_s30 + $0x1e4] sm:$0xf]  ;;  %v4958_v48 = vld [vmem:[%s5943_s30 + $0x1e8] sm:$0xf0] }
 0x1dd   : > { %9001 = vst [vmem:[#allocation63_spill] sm:$0xff] %v6507_v0  ;;  %1318 = vmatmul.bf16.gmra.mxu0 %v6502_v47  ;;  %v5652_v0 = vld [vmem:[%s5943_s30 + $0x1d4] sm:$0xf0] }
 0x1de   : > { %5247 = vmatmul.msk.bf16.gmra.mxu3 %vm1023_vm1, %v4953_v54 }
 0x1e1   : > { %v1759_v1 = vpop.f32.mrf.mxu2 }
 0x1e2   : > { %v1281_v43 = vpop.f32.mrf.mxu0  ;;  %v6512_v7 = vadd.f32 %v2008_v32, %v1759_v1  ;;  %v2021_v1 = vpop.f32.mrf.mxu3 }
 0x1e3   : > { %v6514_v42 = vadd.f32 %v1530_v4, %v1281_v43  ;;  %v5516_v43 = vld [vmem:[%s8867_s3 + $0x1f0] sm:$0xf] }
 0x1e4   : > { %9002 = vst [vmem:[#allocation64_spill] sm:$0xff] %v6512_v7  ;;  %v1538_v38 = vpop.f32.mrf.mxu1  ;;  %v4948_v7 = vld [vmem:[%s5943_s30 + $0x1d0] sm:$0xf] }
 0x1e5   : > { %9003 = vst [vmem:[#allocation65_spill] sm:$0xff] %v6514_v42  ;;  %v6544_v14 = vor.u32 %v5652_v0, %v4948_v7 }
 0x1e6   : > { %1801 = vmatmul.bf16.gmra.mxu2 %v6436_v22  ;;  %v5770_v22 = vld [vmem:[%s8867_s3 + $0x1f4] sm:$0xf0] }
 0x1e7   : > { %5199 = vmatmul.msk.bf16.gmra.mxu1 %vm1023_vm1, %v4953_v54 }
 0x1e9   : > { %v1762_v55 = vpop.f32.mrf.mxu2 }
 0x1ea   : > { %v1284_v45 = vpop.f32.mrf.mxu0  ;;  %v6523_v32 = vadd.f32 %v2011_v28, %v1762_v55  ;;  %v5517_v28 = vor.u32 %v5770_v22, %v5516_v43 }
 0x1eb   : > { %v6525_v4 = vadd.f32 %v1533_v27, %v1284_v45  ;;  %v4961_v27 = vor.u32 %v5653_v44, %v4958_v48 }
 0x1ec   : > { %9004 = vst [vmem:[#allocation66_spill] sm:$0xff] %v6523_v32  ;;  %v1540_v54 = vpop.f32.mrf.mxu1  ;;  %3390 = vmatpush.bf16.msra.mxu2 %v5517_v28  ;;  %v2023_v32 = vpop.f32.mrf.mxu3  ;;  %v5655_v28 = vld [vmem:[%s5943_s30 + $0x1f4] sm:$0xf] }
 0x1ed   : > { %9005 = vst [vmem:[#allocation67_spill] sm:$0xff] %v6525_v4  ;;  %1323 = vmatmul.bf16.gmra.mxu0 %v6520_v31 }
 0x1ee   : > { %5248 = vmatmul.msk.bf16.gmra.mxu3 %vm1023_vm1, %v4961_v27 }
 0x1f1   : > { %v1764_v55 = vpop.f32.mrf.mxu2 }
 0x1f2   : > { %v1286_v45 = vpop.f32.mrf.mxu0  ;;  %v6536_v42 = vadd.f32 %v2013_v24, %v1764_v55  ;;  %v4966_v55 = vld [vmem:[%s5943_s30 + $0x1f8] sm:$0xf0] }
 0x1f3   : > { %v6538_v4 = vadd.f32 %v1535_v60, %v1286_v45  ;;  %v4969_v45 = vor.u32 %v5655_v28, %v4966_v55  ;;  %v5732_v28 = vld [vmem:[%s8867_s3 + $0xc4] sm:$0xf0] }
 0x1f4   : > { %v1543_v62 = vpop.f32.mrf.mxu1  ;;  %v2026_v44 = vpop.f32.mrf.mxu3 }
 0x1f5   : > { %9006 = vst [vmem:[#allocation68_spill] sm:$0xff] %v6538_v4 }
 0x1f6   : > { %1806 = vmatmul.bf16.gmra.mxu2 %v6466_v11 }
 0x1f7   : > { %5200 = vmatmul.msk.bf16.gmra.mxu1 %vm1023_vm1, %v4961_v27 }
 0x1f9   : > { %v1767_v43 = vpop.f32.mrf.mxu2 }
 0x1fa   : > { %v1289_v24 = vpop.f32.mrf.mxu0  ;;  %v6547_v60 = vadd.f32 %v2016_v18, %v1767_v43  ;;  %v4956_v18 = vld [vmem:[%s5943_s30 + $0x1e0] sm:$0xf]  ;;  %v5654_v43 = vld [vmem:[%s5943_s30 + $0x1e4] sm:$0xf0] }
 0x1fb   : > { %v6549_v22 = vadd.f32 %v1538_v38, %v1289_v24  ;;  %v5364_v24 = vld [vmem:[%s8867_s3 + $0xc0] sm:$0xf] }
 0x1fc   : > { %9007 = vst [vmem:[#allocation69_spill] sm:$0xff] %v6547_v60  ;;  %v1545_v48 = vpop.f32.mrf.mxu1  ;;  %v2028_v4 = vpop.f32.mrf.mxu3 }
 0x1fd   : > { %9008 = vst [vmem:[#allocation70_spill] sm:$0xff] %v6549_v22  ;;  %1328 = vmatmul.bf16.gmra.mxu0 %v6544_v14 }
 0x1fe   : > { %5249 = vmatmul.msk.bf16.gmra.mxu3 %vm1023_vm1, %v4969_v45 }
 0x201   : > { %v1769_v11 = vpop.f32.mrf.mxu2 }
 0x202   : > { %v1291_v0 = vpop.f32.mrf.mxu0  ;;  %v6554_v7 = vadd.f32 %v2018_v50, %v1769_v11  ;;  %v5365_v50 = vor.u32 %v5732_v28, %v5364_v24  ;;  %v4974_v24 = vld [vmem:[%s5943_s30 + $0x208] sm:$0xf0] }
 0x203   : > { %v6556_v27 = vadd.f32 %v1540_v54, %v1291_v0  ;;  %v6568_v54 = vor.u32 %v5654_v43, %v4956_v18  ;;  %v5716_v18 = vld [vmem:[%s8867_s3 + $0x44] sm:$0xf0] }
 0x204   : > { %9009 = vst [vmem:[#allocation71_spill] sm:$0xff] %v6554_v7  ;;  %v1548_v38 = vpop.f32.mrf.mxu1  ;;  %3191 = vmatpush.bf16.msrb.mxu3 %v5365_v50  ;;  %v5300_v7 = vld [vmem:[%s8867_s3 + $0x40] sm:$0xf] }
 0x205   : > { %9010 = vst [vmem:[#allocation72_spill] sm:$0xff] %v6556_v27  ;;  %v2031_v27 = vpop.f32.mrf.mxu3  ;;  %v5301_v43 = vor.u32 %v5716_v18, %v5300_v7  ;;  %v5656_v7 = vld [vmem:[%s5943_s30 + $0x1f4] sm:$0xf0] }
 0x206   : > { %1811 = vmatmul.bf16.gmra.mxu2 %v6484_v53 }
 0x207   : > { %5201 = vmatmul.msk.bf16.gmra.mxu1 %vm1023_vm1, %v4969_v45 }
 0x208   : > { %3090 = vmatpush.bf16.msrb.mxu1 %v5301_v43 }
 0x209   : > { %v1772_v55 = vpop.f32.mrf.mxu2 }
 0x20a   : > { %v1294_v11 = vpop.f32.mrf.mxu0  ;;  %v6571_v0 = vadd.f32 %v2021_v1, %v1772_v55  ;;  %v5657_v1 = vld [vmem:[%s5943_s30 + $0x204] sm:$0xf] }
 0x20b   : > { %v6573_v53 = vadd.f32 %v1543_v62, %v1294_v11  ;;  %v4977_v62 = vor.u32 %v5657_v1, %v4974_v24 }
 0x20c   : > { %9011 = vst [vmem:[#allocation73_spill] sm:$0xff] %v6571_v0  ;;  %v1550_v45 = vpop.f32.mrf.mxu1  ;;  %v4964_v0 = vld [vmem:[%s5943_s30 + $0x1f0] sm:$0xf] }
 0x20d   : > { %9012 = vst [vmem:[#allocation74_spill] sm:$0xff] %v6573_v53  ;;  %1333 = vmatmul.bf16.gmra.mxu0 %v6568_v54  ;;  %v2033_v53 = vpop.f32.mrf.mxu3  ;;  %v6592_v43 = vor.u32 %v5656_v7, %v4964_v0 }
 0x20e   : > { %5250 = vmatmul.msk.bf16.gmra.mxu3 %vm1023_vm1, %v4977_v62 }
 0x211   : > { %v1774_v28 = vpop.f32.mrf.mxu2 }
 0x212   : > { %v1296_v50 = vpop.f32.mrf.mxu0  ;;  %v6584_v55 = vadd.f32 %v2023_v32, %v1774_v28 }
 0x213   : > { %v6586_v11 = vadd.f32 %v1545_v48, %v1296_v50 }
 0x214   : > { %9013 = vst [vmem:[#allocation75_spill] sm:$0xff] %v6584_v55  ;;  %v1553_v18 = vpop.f32.mrf.mxu1  ;;  %v4982_v55 = vld [vmem:[%s5943_s30 + $0x218] sm:$0xf0] }
 0x215   : > { %9014 = vst [vmem:[#allocation76_spill] sm:$0xff] %v6586_v11  ;;  %v2036_v28 = vpop.f32.mrf.mxu3  ;;  %v5659_v11 = vld [vmem:[%s5943_s30 + $0x214] sm:$0xf] }
 0x216   : > { %1816 = vmatmul.bf16.gmra.mxu2 %v6502_v47  ;;  %v4985_v22 = vor.u32 %v5659_v11, %v4982_v55 }
 0x217   : > { %5202 = vmatmul.msk.bf16.gmra.mxu1 %vm1023_vm1, %v4977_v62 }
 0x219   : > { %v1777_v1 = vpop.f32.mrf.mxu2 }
 0x21a   : > { %v1299_v32 = vpop.f32.mrf.mxu0  ;;  %v6595_v48 = vadd.f32 %v2026_v44, %v1777_v1  ;;  %v4972_v44 = vld [vmem:[%s5943_s30 + $0x200] sm:$0xf] }
 0x21b   : > { %v6597_v24 = vadd.f32 %v1548_v38, %v1299_v32  ;;  %v5658_v38 = vld [vmem:[%s5943_s30 + $0x204] sm:$0xf0] }
 0x21c   : > { %v1555_v50 = vpop.f32.mrf.mxu1  ;;  %v6610_v32 = vor.u32 %v5658_v38, %v4972_v44  ;;  %v4990_v44 = vld [vmem:[%s5943_s30 + $0x228] sm:$0xf0] }
 0x21d   : > { %9015 = vst [vmem:[#allocation77_spill] sm:$0xff] %v6597_v24  ;;  %1338 = vmatmul.bf16.gmra.mxu0 %v6592_v43  ;;  %v2038_v60 = vpop.f32.mrf.mxu3 }
 0x21e   : > { %5251 = vmatmul.msk.bf16.gmra.mxu3 %vm1023_vm1, %v4985_v22 }
 0x221   : > { %v1779_v47 = vpop.f32.mrf.mxu2 }
 0x222   : > { %v1301_v0 = vpop.f32.mrf.mxu0  ;;  %v6602_v7 = vadd.f32 %v2028_v4, %v1779_v47 }
 0x223   : > { %v6604_v62 = vadd.f32 %v1550_v45, %v1301_v0  ;;  %v5660_v0 = vld [vmem:[%s5943_s30 + $0x214] sm:$0xf0] }
 0x224   : > { %9016 = vst [vmem:[#allocation78_spill] sm:$0xff] %v6602_v7  ;;  %v1558_v1 = vpop.f32.mrf.mxu1 }
 0x225   : > { %9017 = vst [vmem:[#allocation79_spill] sm:$0xff] %v6604_v62  ;;  %v2041_v47 = vpop.f32.mrf.mxu3 }
 0x226   : > { %1821 = vmatmul.bf16.gmra.mxu2 %v6520_v31  ;;  %v5661_v31 = vld [vmem:[%s5943_s30 + $0x224] sm:$0xf] }
 0x227   : > { %5203 = vmatmul.msk.bf16.gmra.mxu1 %vm1023_vm1, %v4985_v22  ;;  %v4993_v38 = vor.u32 %v5661_v31, %v4990_v44 }
 0x229   : > { %v1782_v55 = vpop.f32.mrf.mxu2 }
 0x22a   : > { %v1304_v11 = vpop.f32.mrf.mxu0  ;;  %v6613_v4 = vadd.f32 %v2031_v27, %v1782_v55 }
 0x22b   : > { %v6615_v45 = vadd.f32 %v1553_v18, %v1304_v11  ;;  %v4980_v11 = vld [vmem:[%s5943_s30 + $0x210] sm:$0xf]  ;;  %v5662_v18 = vld [vmem:[%s5943_s30 + $0x224] sm:$0xf0] }
 0x22c   : > { %9018 = vst [vmem:[#allocation80_spill] sm:$0xff] %v6613_v4  ;;  %v1560_v62 = vpop.f32.mrf.mxu1  ;;  %v6632_v31 = vor.u32 %v5660_v0, %v4980_v11  ;;  %v4998_v0 = vld [vmem:[%s5943_s30 + $0x238] sm:$0xf0] }
 0x22d   : > { %9019 = vst [vmem:[#allocation81_spill] sm:$0xff] %v6615_v45  ;;  %1343 = vmatmul.bf16.gmra.mxu0 %v6610_v32  ;;  %v2043_v55 = vpop.f32.mrf.mxu3 }
 0x22e   : > { %5252 = vmatmul.msk.bf16.gmra.mxu3 %vm1023_vm1, %v4993_v38 }
 0x231   : > { %v1784_v7 = vpop.f32.mrf.mxu2 }
 0x232   : > { %v1306_v22 = vpop.f32.mrf.mxu0  ;;  %v6622_v24 = vadd.f32 %v2033_v53, %v1784_v7 }
 0x233   : > { %v6624_v27 = vadd.f32 %v1555_v50, %v1306_v22 }
 0x234   : > { %9020 = vst [vmem:[#allocation82_spill] sm:$0xff] %v6622_v24  ;;  %v1563_v45 = vpop.f32.mrf.mxu1 }
 0x235   : > { %9021 = vst [vmem:[#allocation83_spill] sm:$0xff] %v6624_v27  ;;  %v2046_v22 = vpop.f32.mrf.mxu3 }
 0x236   : > { %1826 = vmatmul.bf16.gmra.mxu2 %v6544_v14  ;;  %v5663_v14 = vld [vmem:[%s5943_s30 + $0x234] sm:$0xf] }
 0x237   : > { %5204 = vmatmul.msk.bf16.gmra.mxu1 %vm1023_vm1, %v4993_v38  ;;  %v5001_v11 = vor.u32 %v5663_v14, %v4998_v0 }
 0x239   : > { %v1787_v53 = vpop.f32.mrf.mxu2 }
 0x23a   : > { %v1309_v50 = vpop.f32.mrf.mxu0  ;;  %v6635_v7 = vadd.f32 %v2036_v28, %v1787_v53 }
 0x23b   : > { %v6637_v44 = vadd.f32 %v1558_v1, %v1309_v50  ;;  %v4988_v50 = vld [vmem:[%s5943_s30 + $0x220] sm:$0xf] }
 0x23c   : > { %9022 = vst [vmem:[#allocation84_spill] sm:$0xff] %v6635_v7  ;;  %v1565_v27 = vpop.f32.mrf.mxu1  ;;  %v6654_v14 = vor.u32 %v5662_v18, %v4988_v50  ;;  %v5768_v18 = vld [vmem:[%s8867_s3 + $0x1e4] sm:$0xf0] }
 0x23d   : > { %9023 = vst [vmem:[#allocation85_spill] sm:$0xff] %v6637_v44  ;;  %1348 = vmatmul.bf16.gmra.mxu0 %v6632_v31  ;;  %v2048_v53 = vpop.f32.mrf.mxu3 }
 0x23e   : > { %5253 = vmatmul.msk.bf16.gmra.mxu3 %vm1023_vm1, %v5001_v11 }
 0x241   : > { %v1789_v23 = vpop.f32.mrf.mxu2 }
 0x242   : > { %v1311_v38 = vpop.f32.mrf.mxu0  ;;  %v6644_v24 = vadd.f32 %v2038_v60, %v1789_v23 }
 0x243   : > { %v6646_v28 = vadd.f32 %v1560_v62, %v1311_v38 }
 0x244   : > { %9024 = vst [vmem:[#allocation86_spill] sm:$0xff] %v6644_v24  ;;  %v1568_v44 = vpop.f32.mrf.mxu1  ;;  %v5664_v24 = vld [vmem:[%s5943_s30 + $0x234] sm:$0xf0] }
 0x245   : > { %9025 = vst [vmem:[#allocation87_spill] sm:$0xff] %v6646_v28  ;;  %v2051_v38 = vpop.f32.mrf.mxu3 }
 0x246   : > { %1831 = vmatmul.bf16.gmra.mxu2 %v6568_v54  ;;  %v5508_v54 = vld [vmem:[%s8867_s3 + $0x1e0] sm:$0xf] }
 0x247   : > { %5205 = vmatmul.msk.bf16.gmra.mxu1 %vm1023_vm1, %v5001_v11  ;;  %v5665_v11 = vld [vmem:[%s5943_s30 + $0x244] sm:$0xf]  ;;  %v5509_v50 = vor.u32 %v5768_v18, %v5508_v54  ;;  %v6682_v54 = vor.u32 %v5664_v24, %v4996_v41  ;;  %v5730_v41 = vld [vmem:[%s8867_s3 + $0xb4] sm:$0xf0]  ;;  %v5667_v24 = vld [vmem:[%s5943_s30 + $0x254] sm:$0xf] }
 0x249   : > { %v1792_v23 = vpop.f32.mrf.mxu2  ;;  %3391 = vmatpush.bf16.msra.mxu2 %v5509_v50 }
 0x24a   : > { %v1314_v60 = vpop.f32.mrf.mxu0  ;;  %v6657_v62 = vadd.f32 %v2041_v47, %v1792_v23 }
 0x24b   : > { %v6659_v0 = vadd.f32 %v1563_v45, %v1314_v60  ;;  %v5006_v45 = vld [vmem:[%s5943_s30 + $0x248] sm:$0xf0] }
 0x24c   : > { %9026 = vst [vmem:[#allocation88_spill] sm:$0xff] %v6657_v62  ;;  %v1570_v47 = vpop.f32.mrf.mxu1  ;;  %v5009_v23 = vor.u32 %v5665_v11, %v5006_v45 }
 0x24d   : > { %9027 = vst [vmem:[#allocation89_spill] sm:$0xff] %v6659_v0  ;;  %1353 = vmatmul.bf16.gmra.mxu0 %v6654_v14  ;;  %v2053_v62 = vpop.f32.mrf.mxu3 }
 0x24e   : > { %5254 = vmatmul.msk.bf16.gmra.mxu3 %vm1023_vm1, %v5009_v23 }
 0x251   : > { %v1794_v60 = vpop.f32.mrf.mxu2 }
 0x252   : > { %v1316_v1 = vpop.f32.mrf.mxu0  ;;  %v6672_v0 = vadd.f32 %v2043_v55, %v1794_v60  ;;  %v5714_v60 = vld [vmem:[%s8867_s3 + $0x34] sm:$0xf0] }
 0x253   : > { %v6674_v49 = vadd.f32 %v1565_v27, %v1316_v1 }
 0x254   : > { %9028 = vst [vmem:[#allocation90_spill] sm:$0xff] %v6672_v0  ;;  %v1573_v33 = vpop.f32.mrf.mxu1 }
 0x255   : > { %9029 = vst [vmem:[#allocation91_spill] sm:$0xff] %v6674_v49  ;;  %v2056_v11 = vpop.f32.mrf.mxu3  ;;  %v5666_v49 = vld [vmem:[%s5943_s30 + $0x244] sm:$0xf0] }
 0x256   : > { %1836 = vmatmul.bf16.gmra.mxu2 %v6592_v43  ;;  %v5356_v43 = vld [vmem:[%s8867_s3 + $0xb0] sm:$0xf] }
 0x257   : > { %5206 = vmatmul.msk.bf16.gmra.mxu1 %vm1023_vm1, %v5009_v23  ;;  %v5292_v23 = vld [vmem:[%s8867_s3 + $0x30] sm:$0xf] }
 0x259   : > { %v1797_v55 = vpop.f32.mrf.mxu2 }
 0x25a   : > { %v1319_v27 = vpop.f32.mrf.mxu0  ;;  %v6685_v1 = vadd.f32 %v2046_v22, %v1797_v55  ;;  %v5357_v22 = vor.u32 %v5730_v41, %v5356_v43  ;;  %v5293_v55 = vor.u32 %v5714_v60, %v5292_v23 }
 0x25b   : > { %v6687_v18 = vadd.f32 %v1568_v44, %v1319_v27  ;;  %v5014_v44 = vld [vmem:[%s5943_s30 + $0x258] sm:$0xf0] }
 0x25c   : > { %9030 = vst [vmem:[#allocation92_spill] sm:$0xff] %v6685_v1  ;;  %v1575_v50 = vpop.f32.mrf.mxu1  ;;  %3192 = vmatpush.bf16.msrb.mxu3 %v5357_v22  ;;  %v5017_v27 = vor.u32 %v5667_v24, %v5014_v44  ;;  %3091 = vmatpush.bf16.msrb.mxu1 %v5293_v55  ;;  %v5004_v1 = vld [vmem:[%s5943_s30 + $0x240] sm:$0xf]  ;;  %v5668_v44 = vld [vmem:[%s5943_s30 + $0x254] sm:$0xf0] }
 0x25d   : > { %9031 = vst [vmem:[#allocation93_spill] sm:$0xff] %v6687_v18  ;;  %1358 = vmatmul.bf16.gmra.mxu0 %v6682_v54  ;;  %v2058_v43 = vpop.f32.mrf.mxu3  ;;  %v6716_v24 = vor.u32 %v5666_v49, %v5004_v1  ;;  %v5022_v49 = vld [vmem:[%s5943_s30 + $0x268] sm:$0xf0] }
 0x25e   : > { %5255 = vmatmul.msk.bf16.gmra.mxu3 %vm1023_vm1, %v5017_v27 }
 0x261   : > { %v1799_v45 = vpop.f32.mrf.mxu2 }
 0x262   : > { %v1321_v28 = vpop.f32.mrf.mxu0  ;;  %v6706_v18 = vadd.f32 %v2048_v53, %v1799_v45 }
 0x263   : > { %v6708_v3 = vadd.f32 %v1570_v47, %v1321_v28 }
 0x264   : > { %9032 = vst [vmem:[#allocation94_spill] sm:$0xff] %v6706_v18  ;;  %v1578_v23 = vpop.f32.mrf.mxu1 }
 0x265   : > { %9033 = vst [vmem:[#allocation95_spill] sm:$0xff] %v6708_v3  ;;  %v2061_v22 = vpop.f32.mrf.mxu3 }
 0x266   : > { %1841 = vmatmul.bf16.gmra.mxu2 %v6610_v32  ;;  %v5669_v32 = vld [vmem:[%s5943_s30 + $0x264] sm:$0xf] }
 0x267   : > { %5207 = vmatmul.msk.bf16.gmra.mxu1 %vm1023_vm1, %v5017_v27  ;;  %v5025_v1 = vor.u32 %v5669_v32, %v5022_v49 }
 0x269   : > { %v1802_v53 = vpop.f32.mrf.mxu2 }
 0x26a   : > { %v1324_v28 = vpop.f32.mrf.mxu0  ;;  %v6719_v47 = vadd.f32 %v2051_v38, %v1802_v53 }
 0x26b   : > { %v6721_v45 = vadd.f32 %v1573_v33, %v1324_v28  ;;  %v5012_v28 = vld [vmem:[%s5943_s30 + $0x250] sm:$0xf]  ;;  %v5670_v33 = vld [vmem:[%s5943_s30 + $0x264] sm:$0xf0] }
 0x26c   : > { %9034 = vst [vmem:[#allocation96_spill] sm:$0xff] %v6719_v47  ;;  %v1580_v60 = vpop.f32.mrf.mxu1  ;;  %v6738_v32 = vor.u32 %v5668_v44, %v5012_v28  ;;  %v5030_v44 = vld [vmem:[%s5943_s30 + $0x278] sm:$0xf0]  ;;  %v5678_v47 = vld [vmem:[%s5943_s30 + $0x2a4] sm:$0xf0] }
 0x26d   : > { %9035 = vst [vmem:[#allocation97_spill] sm:$0xff] %v6721_v45  ;;  %1363 = vmatmul.bf16.gmra.mxu0 %v6716_v24  ;;  %v2063_v53 = vpop.f32.mrf.mxu3 }
 0x26e   : > { %5256 = vmatmul.msk.bf16.gmra.mxu3 %vm1023_vm1, %v5025_v1 }
 0x271   : > { %v1804_v55 = vpop.f32.mrf.mxu2 }
 0x272   : > { %v1326_v27 = vpop.f32.mrf.mxu0  ;;  %v6728_v41 = vadd.f32 %v2053_v62, %v1804_v55 }
 0x273   : > { %v6730_v38 = vadd.f32 %v1575_v50, %v1326_v27 }
 0x274   : > { %9036 = vst [vmem:[#allocation98_spill] sm:$0xff] %v6728_v41  ;;  %v1583_v45 = vpop.f32.mrf.mxu1 }
 0x275   : > { %9037 = vst [vmem:[#allocation99_spill] sm:$0xff] %v6730_v38  ;;  %v2066_v27 = vpop.f32.mrf.mxu3 }
 0x276   : > { %1846 = vmatmul.bf16.gmra.mxu2 %v6632_v31  ;;  %v5671_v31 = vld [vmem:[%s5943_s30 + $0x274] sm:$0xf] }
 0x277   : > { %5208 = vmatmul.msk.bf16.gmra.mxu1 %vm1023_vm1, %v5025_v1  ;;  %v5033_v28 = vor.u32 %v5671_v31, %v5030_v44 }
 0x279   : > { %v1807_v62 = vpop.f32.mrf.mxu2 }
 0x27a   : > { %v1329_v50 = vpop.f32.mrf.mxu0  ;;  %v6741_v49 = vadd.f32 %v2056_v11, %v1807_v62 }
 0x27b   : > { %v6743_v55 = vadd.f32 %v1578_v23, %v1329_v50  ;;  %v5020_v50 = vld [vmem:[%s5943_s30 + $0x260] sm:$0xf]  ;;  %v5672_v23 = vld [vmem:[%s5943_s30 + $0x274] sm:$0xf0] }
 0x27c   : > { %9038 = vst [vmem:[#allocation100_spill] sm:$0xff] %v6741_v49  ;;  %v1585_v38 = vpop.f32.mrf.mxu1  ;;  %v6760_v31 = vor.u32 %v5670_v33, %v5020_v50  ;;  %v5038_v33 = vld [vmem:[%s5943_s30 + $0x288] sm:$0xf0] }
 0x27d   : > { %1368 = vmatmul.bf16.gmra.mxu0 %v6738_v32  ;;  %v2068_v62 = vpop.f32.mrf.mxu3 }
 0x27e   : > { %5257 = vmatmul.msk.bf16.gmra.mxu3 %vm1023_vm1, %v5033_v28 }
 0x281   : > { %v1809_v37 = vpop.f32.mrf.mxu2 }
 0x282   : > { %v1331_v1 = vpop.f32.mrf.mxu0  ;;  %v6750_v25 = vadd.f32 %v2058_v43, %v1809_v37 }
 0x283   : > { %v6752_v11 = vadd.f32 %v1580_v60, %v1331_v1 }
 0x284   : > { %9039 = vst [vmem:[#allocation101_spill] sm:$0xff] %v6750_v25  ;;  %v1588_v3 = vpop.f32.mrf.mxu1 }
 0x285   : > { %v2071_v1 = vpop.f32.mrf.mxu3 }
 0x286   : > { %1851 = vmatmul.bf16.gmra.mxu2 %v6654_v14  ;;  %v5673_v14 = vld [vmem:[%s5943_s30 + $0x284] sm:$0xf] }
 0x287   : > { %5209 = vmatmul.msk.bf16.gmra.mxu1 %vm1023_vm1, %v5033_v28  ;;  %v5041_v50 = vor.u32 %v5673_v14, %v5038_v33 }
 0x289   : > { %v1812_v37 = vpop.f32.mrf.mxu2 }
 0x28a   : > { %v1334_v43 = vpop.f32.mrf.mxu0  ;;  %v6763_v60 = vadd.f32 %v2061_v22, %v1812_v37 }
 0x28b   : > { %v6765_v44 = vadd.f32 %v1583_v45, %v1334_v43  ;;  %v5028_v43 = vld [vmem:[%s5943_s30 + $0x270] sm:$0xf]  ;;  %v5674_v45 = vld [vmem:[%s5943_s30 + $0x284] sm:$0xf0] }
 0x28c   : > { %9040 = vst [vmem:[#allocation102_spill] sm:$0xff] %v6763_v60  ;;  %v1590_v12 = vpop.f32.mrf.mxu1  ;;  %v6782_v14 = vor.u32 %v5672_v23, %v5028_v43  ;;  %v5046_v23 = vld [vmem:[%s5943_s30 + $0x298] sm:$0xf0] }
 0x28d   : > { %1373 = vmatmul.bf16.gmra.mxu0 %v6760_v31  ;;  %v2073_v37 = vpop.f32.mrf.mxu3 }
 0x28e   : > { %5258 = vmatmul.msk.bf16.gmra.mxu3 %vm1023_vm1, %v5041_v50 }
 0x291   : > { %v1814_v18 = vpop.f32.mrf.mxu2 }
 0x292   : > { %v1336_v28 = vpop.f32.mrf.mxu0  ;;  %v6772_v56 = vadd.f32 %v2063_v53, %v1814_v18 }
 0x293   : > { %v6774_v22 = vadd.f32 %v1585_v38, %v1336_v28 }
 0x294   : > { %9041 = vst [vmem:[#allocation103_spill] sm:$0xff] %v6772_v56  ;;  %v1593_v0 = vpop.f32.mrf.mxu1 }
 0x295   : > { %v2076_v28 = vpop.f32.mrf.mxu3 }
 0x296   : > { %1856 = vmatmul.bf16.gmra.mxu2 %v6682_v54  ;;  %v5675_v54 = vld [vmem:[%s5943_s30 + $0x294] sm:$0xf] }
 0x297   : > { %5210 = vmatmul.msk.bf16.gmra.mxu1 %vm1023_vm1, %v5041_v50  ;;  %v5049_v43 = vor.u32 %v5675_v54, %v5046_v23 }
 0x299   : > { %v1817_v18 = vpop.f32.mrf.mxu2 }
 0x29a   : > { %v1339_v38 = vpop.f32.mrf.mxu0  ;;  %v6785_v53 = vadd.f32 %v2066_v27, %v1817_v18 }
 0x29b   : > { %v6787_v33 = vadd.f32 %v1588_v3, %v1339_v38  ;;  %v5036_v38 = vld [vmem:[%s5943_s30 + $0x280] sm:$0xf]  ;;  %v5676_v3 = vld [vmem:[%s5943_s30 + $0x294] sm:$0xf0] }
 0x29c   : > { %9042 = vst [vmem:[#allocation104_spill] sm:$0xff] %v6785_v53  ;;  %v1595_v56 = vpop.f32.mrf.mxu1  ;;  %v6804_v54 = vor.u32 %v5674_v45, %v5036_v38  ;;  %v5677_v45 = vld [vmem:[%s5943_s30 + $0x2a4] sm:$0xf]  ;;  %v5054_v38 = vld [vmem:[%s5943_s30 + $0x2a8] sm:$0xf0] }
 0x29d   : > { %1378 = vmatmul.bf16.gmra.mxu0 %v6782_v14  ;;  %v2078_v18 = vpop.f32.mrf.mxu3 }
 0x29e   : > { %5259 = vmatmul.msk.bf16.gmra.mxu3 %vm1023_vm1, %v5049_v43 }
 0x2a1   : > { %v1819_v60 = vpop.f32.mrf.mxu2 }
 0x2a2   : > { %v1341_v50 = vpop.f32.mrf.mxu0  ;;  %v6794_v25 = vadd.f32 %v2068_v62, %v1819_v60 }
 0x2a3   : > { %v6796_v27 = vadd.f32 %v1590_v12, %v1341_v50 }
 0x2a4   : > { %9043 = vst [vmem:[#allocation105_spill] sm:$0xff] %v6794_v25  ;;  %v1598_v53 = vpop.f32.mrf.mxu1  ;;  %v5057_v25 = vor.u32 %v5677_v45, %v5054_v38  ;;  %v5500_v45 = vld [vmem:[%s8867_s3 + $0x1d0] sm:$0xf] }
 0x2a5   : > { %v6811_v50 = vpop.f32.mrf.mxu3 }
 0x2a6   : > { %1861 = vmatmul.bf16.gmra.mxu2 %v6716_v24 }
 0x2a7   : > { %5211 = vmatmul.msk.bf16.gmra.mxu1 %vm1023_vm1, %v5049_v43 }
 0x2a9   : > { %v1822_v62 = vpop.f32.mrf.mxu2 }
 0x2aa   : > { %v1344_v12 = vpop.f32.mrf.mxu0  ;;  %v6807_v60 = vadd.f32 %v2071_v1, %v1822_v62 }
 0x2ab   : > { %v6809_v23 = vadd.f32 %v1593_v0, %v1344_v12  ;;  %v5044_v12 = vld [vmem:[%s5943_s30 + $0x290] sm:$0xf] }
 0x2ac   : > { %9044 = vst [vmem:[#allocation106_spill] sm:$0xff] %v6807_v60  ;;  %v1600_v24 = vpop.f32.mrf.mxu1 }
 0x2ad   : > { %1383 = vmatmul.bf16.gmra.mxu0 %v6804_v54  ;;  %v6822_v0 = vpop.f32.mrf.mxu3 }
 0x2ae   : > { %5260 = vmatmul.msk.bf16.gmra.mxu3 %vm1023_vm1, %v5057_v25 }
 0x2b1   : > { %v1824_v43 = vpop.f32.mrf.mxu2 }
 0x2b2   : > { %v1346_v49 = vpop.f32.mrf.mxu0  ;;  %v6818_v7 = vadd.f32 %v2073_v37, %v1824_v43  ;;  %v6836_v37 = vor.u32 %v5676_v3, %v5044_v12  ;;  %v9046_v3 = vmax.f32 %v6219_v51, %v6743_v55  ;;  %v5712_v12 = vld [vmem:[%s8867_s3 + $0x24] sm:$0xf0] }
 0x2b3   : > { %v6820_v1 = vadd.f32 %v1595_v56, %v1346_v49  ;;  %v5766_v56 = vld [vmem:[%s8867_s3 + $0x1d4] sm:$0xf0] }
 0x2b4   : > { %9045 = vst [vmem:[#allocation107_spill] sm:$0xff] %v6818_v7  ;;  %v1603_v60 = vpop.f32.mrf.mxu1  ;;  %v5501_v49 = vor.u32 %v5766_v56, %v5500_v45 }
 0x2b6   : > { %1866 = vmatmul.bf16.gmra.mxu2 %v6738_v32  ;;  %v6841_v32 = vpop.f32.mrf.mxu3 }
 0x2b7   : > { %5212 = vmatmul.msk.bf16.gmra.mxu1 %vm1023_vm1, %v5057_v25  ;;  %3392 = vmatpush.bf16.msra.mxu2 %v5501_v49 }
 0x2b9   : > { %v1827_v38 = vpop.f32.mrf.mxu2 }
 0x2ba   : > { %v1349_v43 = vpop.f32.mrf.mxu0  ;;  %v2077_v62 = vadd.f32 %v2076_v28, %v1827_v38  ;;  %v6853_v28 = vld [vmem:[%s8866_s2] ss:$0 sm:$0xff] }
 0x2bb   : > { %v6839_v7 = vadd.f32 %v1598_v53, %v1349_v43  ;;  %v5348_v53 = vld [vmem:[%s8867_s3 + $0xa0] sm:$0xf] }
 0x2bc   : > { %v2192_v41 = vmax.f32 %v6301_v57, %v2077_v62  ;;  %v1605_v45 = vpop.f32.mrf.mxu1  ;;  %v5728_v57 = vld [vmem:[%s8867_s3 + $0xa4] sm:$0xf0]  ;;  %v5284_v62 = vld [vmem:[%s8867_s3 + $0x20] sm:$0xf] }
 0x2bd   : > { %1388 = vmatmul.bf16.gmra.mxu0 %v6836_v37  ;;  %v5349_v55 = vor.u32 %v5728_v57, %v5348_v53  ;;  %v5285_v43 = vor.u32 %v5712_v12, %v5284_v62  ;;  %v5052_v57 = vld [vmem:[%s5943_s30 + $0x2a0] sm:$0xf] }
 0x2be   : > { %v2277_v25 = vmax.f32 %v9046_v3, %v2192_v41  ;;  %v6870_v3 = vpop.f32.mrf.mxu3  ;;  %5261 = vmatmul.msk.bf16.gmra.mxu3 %vm1023_vm1, %v5947_v20  ;;  %v6884_v20 = vor.u32 %v5678_v47, %v5052_v57 }
 0x2bf   : > { %3193 = vmatpush.bf16.msrb.mxu3 %v5349_v55  ;;  %3092 = vmatpush.bf16.msrb.mxu1 %v5285_v43 }
 0x2c0   : > { %v2329_v56 = vadd.f32 %v6853_v28, %v2277_v25 }
 0x2c1   : > { %v1829_v51 = vpop.f32.mrf.mxu2 }
 0x2c2   : > { %v1351_v41 = vpop.f32.mrf.mxu0  ;;  %v2079_v49 = vadd.f32 %v2078_v18, %v1829_v51  ;;  %v2377_v25 = vmax.f32 %v2329_v56, 0.0  ;;  %v9047_v18 = vmax.f32 %v6227_v59, %v6752_v11 }
 0x2c3   : > { %v6868_v38 = vadd.f32 %v1600_v24, %v1351_v41 }
 0x2c4   : > { %v2194_v13 = vmax.f32 %v6308_v58, %v2079_v49  ;;  %v1608_v4 = vpop.f32.mrf.mxu1  ;;  %v2425_v41 = vpack.c.bf16 %v2377_v25, %v2377_v25 }
 0x2c5   : > { %v2209_v53 = vmax.f32 %v6310_v16, %v6868_v38  ;;  %v9061_v16 = vld [vmem:[#allocation42_spill] sm:$0xff] }
 0x2c6   : > { %v2278_v24 = vmax.f32 %v9047_v18, %v2194_v13  ;;  %1871 = vmatmul.bf16.gmra.mxu2 %v6760_v31  ;;  %v6889_v43 = vpop.f32.mrf.mxu3  ;;  %v2513_v11 = vunpack.c.l.b16 %v2425_v41  ;;  %v5680_v41 = vld [vmem:[%s5943_s30 + $0x2b4] sm:$0xf0] }
 0x2c8   : > { %v2330_v62 = vadd.f32 %v6853_v28, %v2278_v24 }
 0x2c9   : > { %v1832_v51 = vpop.f32.mrf.mxu2 }
 0x2ca   : > { %v1354_v58 = vpop.f32.mrf.mxu0  ;;  %v2378_v55 = vmax.f32 %v2330_v62, 0.0  ;;  %v2082_v12 = vadd.f32 %v6811_v50, %v1832_v51  ;;  %v9048_v50 = vmax.f32 %v6249_v46, %v6765_v44  ;;  %v5060_v44 = vld [vmem:[%s5943_s30 + $0x2b0] sm:$0xf] }
 0x2cb   : > { %v6887_v49 = vadd.f32 %v1603_v60, %v1354_v58 }
 0x2cc   : > { %v2426_v56 = vpack.c.bf16 %v2378_v55, %v2378_v55  ;;  %v2196_v59 = vmax.f32 %v6319_v34, %v2082_v12  ;;  %v1610_v47 = vpop.f32.mrf.mxu1 }
 0x2cd   : > { %v2211_v13 = vmax.f32 %v6321_v8, %v6887_v49  ;;  %1393 = vmatmul.bf16.gmra.mxu0 %v6884_v20 }
 0x2ce   : > { %v2514_v31 = vunpack.c.l.b16 %v2426_v56  ;;  %v2279_v60 = vmax.f32 %v9048_v50, %v2196_v59  ;;  %v6904_v51 = vpop.f32.mrf.mxu3  ;;  %5262 = vmatmul.msk.bf16.gmra.mxu3 %vm1023_vm1, %v5980_v39  ;;  %v9049_v56 = vmax.f32 %v6257_v52, %v6774_v22  ;;  %v6918_v59 = vor.u32 %v5680_v41, %v5060_v44 }
 0x2d0   : > { %v6898_v57 = vpack.c.b16 %v2514_v31, %v2513_v11  ;;  %v2331_v34 = vadd.f32 %v6853_v28, %v2279_v60 }
 0x2d1   : > { %v1834_v25 = vpop.f32.mrf.mxu2 }
 0x2d2   : > { %v1356_v18 = vpop.f32.mrf.mxu0  ;;  %v2084_v24 = vadd.f32 %v6822_v0, %v1834_v25  ;;  %v2379_v12 = vmax.f32 %v2331_v34, 0.0 }
 0x2d3   : > { %v6902_v62 = vadd.f32 %v1605_v45, %v1356_v18 }
 0x2d4   : > { %v2198_v58 = vmax.f32 %v6326_v36, %v2084_v24  ;;  %v1613_v55 = vpop.f32.mrf.mxu1  ;;  %v2427_v36 = vpack.c.bf16 %v2379_v12, %v2379_v12 }
 0x2d5   : > { %v2213_v46 = vmax.f32 %v6328_v26, %v6902_v62  ;;  %v5764_v26 = vld [vmem:[%s8867_s3 + $0x1c4] sm:$0xf0] }
 0x2d6   : > { %v2280_v0 = vmax.f32 %v9049_v56, %v2198_v58  ;;  %1876 = vmatmul.bf16.gmra.mxu2 %v6782_v14  ;;  %v6923_v25 = vpop.f32.mrf.mxu3  ;;  %v2515_v34 = vunpack.c.l.b16 %v2427_v36 }
 0x2d8   : > { %v2332_v45 = vadd.f32 %v6853_v28, %v2280_v0 }
 0x2d9   : > { %v1837_v39 = vpop.f32.mrf.mxu2 }
 0x2da   : > { %v1359_v11 = vpop.f32.mrf.mxu0  ;;  %v2380_v31 = vmax.f32 %v2332_v45, 0.0  ;;  %v2087_v50 = vadd.f32 %v6841_v32, %v1837_v39  ;;  %v9050_v32 = vmax.f32 %v6267_v5, %v6787_v33  ;;  %v5068_v33 = vld [vmem:[%s5943_s30 + $0x2c0] sm:$0xf]  ;;  %v5682_v39 = vld [vmem:[%s5943_s30 + $0x2c4] sm:$0xf0] }
 0x2db   : > { %v6921_v60 = vadd.f32 %v1608_v4, %v1359_v11 }
 0x2dc   : > { %v2428_v18 = vpack.c.bf16 %v2380_v31, %v2380_v31  ;;  %v2200_v52 = vmax.f32 %v6337_v15, %v2087_v50  ;;  %v1615_v14 = vpop.f32.mrf.mxu1  ;;  %v9052_v31 = vmax.f32 %v6274_v30, %v6796_v27  ;;  %v6952_v50 = vor.u32 %v5682_v39, %v5068_v33 }
 0x2dd   : > { %v2215_v22 = vmax.f32 %v6339_v2, %v6921_v60  ;;  %1398 = vmatmul.bf16.gmra.mxu0 %v6918_v59 }
 0x2de   : > { %v2516_v24 = vunpack.c.l.b16 %v2428_v18  ;;  %v2281_v4 = vmax.f32 %v9050_v32, %v2200_v52  ;;  %v6938_v0 = vpop.f32.mrf.mxu3  ;;  %5263 = vmatmul.msk.bf16.gmra.mxu3 %vm1023_vm1, %v6027_v63 }
 0x2e0   : > { %v6932_v58 = vpack.c.b16 %v2516_v24, %v2515_v34  ;;  %v2333_v15 = vadd.f32 %v6853_v28, %v2281_v4 }
 0x2e1   : > { %v1839_v44 = vpop.f32.mrf.mxu2 }
 0x2e2   : > { %9051 = vst [vmem:[#allocation108_spill] sm:$0xff] %v6932_v58  ;;  %v1361_v41 = vpop.f32.mrf.mxu0  ;;  %v2089_v12 = vadd.f32 %v6870_v3, %v1839_v44  ;;  %v2381_v36 = vmax.f32 %v2333_v15, 0.0 }
 0x2e3   : > { %v6936_v56 = vadd.f32 %v1610_v47, %v1361_v41 }
 0x2e4   : > { %v2202_v45 = vmax.f32 %v6356_v6, %v2089_v12  ;;  %v1618_v11 = vpop.f32.mrf.mxu1  ;;  %v2429_v6 = vpack.c.bf16 %v2381_v36, %v2381_v36 }
 0x2e5   : > { %v2217_v5 = vmax.f32 %v6358_v61, %v6936_v56  ;;  %v9070_v61 = vld [vmem:[#allocation51_spill] sm:$0xff] }
 0x2e6   : > { %v2282_v3 = vmax.f32 %v9052_v31, %v2202_v45  ;;  %1881 = vmatmul.bf16.gmra.mxu2 %v6804_v54  ;;  %v6957_v32 = vpop.f32.mrf.mxu3  ;;  %v2517_v44 = vunpack.c.l.b16 %v2429_v6 }
 0x2e8   : > { %v2334_v47 = vadd.f32 %v6853_v28, %v2282_v3  ;;  %v5684_v3 = vld [vmem:[%s5943_s30 + $0x2d4] sm:$0xf0] }
 0x2e9   : > { %v1842_v63 = vpop.f32.mrf.mxu2 }
 0x2ea   : > { %v1364_v18 = vpop.f32.mrf.mxu0  ;;  %v2382_v52 = vmax.f32 %v2334_v47, 0.0  ;;  %v2092_v34 = vadd.f32 %v6889_v43, %v1842_v63  ;;  %v9053_v43 = vmax.f32 %v6285_v40, %v6809_v23  ;;  %v5076_v23 = vld [vmem:[%s5943_s30 + $0x2d0] sm:$0xf]  ;;  %v9054_v63 = vmax.f32 %v6292_v35, %v6820_v1  ;;  %v9055_v35 = vld [vmem:[#allocation38_spill] sm:$0xff] }
 0x2eb   : > { %v6955_v24 = vadd.f32 %v1613_v55, %v1364_v18  ;;  %v6986_v6 = vor.u32 %v5684_v3, %v5076_v23 }
 0x2ec   : > { %v2430_v4 = vpack.c.bf16 %v2382_v52, %v2382_v52  ;;  %v2204_v30 = vmax.f32 %v6367_v9, %v2092_v34  ;;  %v1620_v54 = vpop.f32.mrf.mxu1 }
 0x2ed   : > { %v2219_v27 = vmax.f32 %v6369_v10, %v6955_v24  ;;  %1403 = vmatmul.bf16.gmra.mxu0 %v6952_v50 }
 0x2ee   : > { %v2518_v41 = vunpack.c.l.b16 %v2430_v4  ;;  %v2283_v55 = vmax.f32 %v9053_v43, %v2204_v30  ;;  %v6972_v36 = vpop.f32.mrf.mxu3  ;;  %5264 = vmatmul.msk.bf16.gmra.mxu3 %vm1023_vm1, %v6065_v21 }
 0x2f0   : > { %v6966_v15 = vpack.c.b16 %v2518_v41, %v2517_v44  ;;  %v2335_v9 = vadd.f32 %v6853_v28, %v2283_v55 }
 0x2f1   : > { %v1844_v12 = vpop.f32.mrf.mxu2 }
 0x2f2   : > { %v1366_v45 = vpop.f32.mrf.mxu0  ;;  %v2094_v33 = vadd.f32 %v6904_v51, %v1844_v12  ;;  %v2383_v47 = vmax.f32 %v2335_v9, 0.0 }
 0x2f3   : > { %v6970_v39 = vadd.f32 %v1615_v14, %v1366_v45  ;;  %v9057_v45 = vmax.f32 %v6303_v17, %v6839_v7  ;;  %v9060_v17 = vld [vmem:[#allocation41_spill] sm:$0xff] }
 0x2f4   : > { %v2206_v31 = vmax.f32 %v6374_v29, %v2094_v33  ;;  %v1623_v51 = vpop.f32.mrf.mxu1  ;;  %v2431_v29 = vpack.c.bf16 %v2383_v47, %v2383_v47 }
 0x2f5   : > { %v2221_v40 = vmax.f32 %v6376_v19, %v6970_v39  ;;  %v9076_v19 = vld [vmem:[#allocation3_spill] sm:$0xff] }
 0x2f6   : > { %v2284_v18 = vmax.f32 %v9054_v63, %v2206_v31  ;;  %1886 = vmatmul.bf16.gmra.mxu2 %v6836_v37  ;;  %v6991_v44 = vpop.f32.mrf.mxu3  ;;  %v9056_v37 = vld [vmem:[#allocation39_spill] sm:$0xff]  ;;  %v2519_v55 = vunpack.c.l.b16 %v2431_v29 }
 0x2f7   : > { %v5686_v29 = vld [vmem:[%s5943_s30 + $0x2e4] sm:$0xf0] }
 0x2f8   : > { %v2336_v14 = vadd.f32 %v6853_v28, %v2284_v18  ;;  %v9058_v18 = vld [vmem:[#allocation6_spill] sm:$0xff] }
 0x2f9   : > { %v1847_v21 = vpop.f32.mrf.mxu2 }
 0x2fa   : > { %v1369_v52 = vpop.f32.mrf.mxu0  ;;  %v2384_v34 = vmax.f32 %v2336_v14, 0.0  ;;  %v2097_v4 = vadd.f32 %v6923_v25, %v1847_v21  ;;  %v9059_v14 = vld [vmem:[#allocation40_spill] sm:$0xff] }
 0x2fb   : > { %v6989_v30 = vadd.f32 %v1618_v11, %v1369_v52  ;;  %v5084_v52 = vld [vmem:[%s5943_s30 + $0x2e0] sm:$0xf] }
 0x2fc   : > { %v2432_v41 = vpack.c.bf16 %v2384_v34, %v2384_v34  ;;  %v2208_v1 = vmax.f32 %v9055_v35, %v2097_v4  ;;  %v1625_v9 = vpop.f32.mrf.mxu1 }
 0x2fd   : > { %v2223_v43 = vmax.f32 %v9056_v37, %v6989_v30  ;;  %1408 = vmatmul.bf16.gmra.mxu0 %v6986_v6 }
 0x2fe   : > { %v2520_v12 = vunpack.c.l.b16 %v2432_v41  ;;  %v2285_v25 = vmax.f32 %v9057_v45, %v2208_v1  ;;  %v7006_v63 = vpop.f32.mrf.mxu3  ;;  %5265 = vmatmul.msk.bf16.gmra.mxu3 %vm1023_vm1, %v9058_v18 }
 0x300   : > { %v7000_v11 = vpack.c.b16 %v2520_v12, %v2519_v55  ;;  %v2337_v23 = vadd.f32 %v6853_v28, %v2285_v25 }
 0x301   : > { %v1849_v33 = vpop.f32.mrf.mxu2 }
 0x302   : > { %v1371_v31 = vpop.f32.mrf.mxu0  ;;  %v2099_v3 = vadd.f32 %v6938_v0, %v1849_v33  ;;  %v2385_v34 = vmax.f32 %v2337_v23, 0.0 }
 0x303   : > { %v7004_v47 = vadd.f32 %v1620_v54, %v1371_v31  ;;  %v7020_v54 = vor.u32 %v5686_v29, %v5084_v52 }
 0x304   : > { %v2210_v21 = vmax.f32 %v9059_v14, %v2099_v3  ;;  %v2433_v1 = vpack.c.bf16 %v2385_v34, %v2385_v34  ;;  %v1628_v25 = vpop.f32.mrf.mxu1  ;;  %v5726_v14 = vld [vmem:[%s8867_s3 + $0x94] sm:$0xf0] }
 0x305   : > { %v2225_v7 = vmax.f32 %v9060_v17, %v7004_v47  ;;  %v9080_v17 = vld [vmem:[#allocation4_spill] sm:$0xff] }
 0x306   : > { %v2286_v4 = vmax.f32 %v2209_v53, %v2210_v21  ;;  %1891 = vmatmul.bf16.gmra.mxu2 %v6884_v20  ;;  %v7025_v33 = vpop.f32.mrf.mxu3  ;;  %v9062_v53 = vld [vmem:[#allocation43_spill] sm:$0xff]  ;;  %v2521_v23 = vunpack.c.l.b16 %v2433_v1 }
 0x308   : > { %v2338_v0 = vadd.f32 %v6853_v28, %v2286_v4  ;;  %v9063_v4 = vld [vmem:[#allocation44_spill] sm:$0xff] }
 0x309   : > { %v1852_v41 = vpop.f32.mrf.mxu2 }
 0x30a   : > { %v1374_v35 = vpop.f32.mrf.mxu0  ;;  %v2386_v55 = vmax.f32 %v2338_v0, 0.0  ;;  %v2102_v12 = vadd.f32 %v6957_v32, %v1852_v41  ;;  %v9064_v41 = vld [vmem:[#allocation45_spill] sm:$0xff] }
 0x30b   : > { %v7023_v45 = vadd.f32 %v1623_v51, %v1374_v35  ;;  %v5340_v51 = vld [vmem:[%s8867_s3 + $0x90] sm:$0xf] }
 0x30c   : > { %v2434_v31 = vpack.c.bf16 %v2386_v55, %v2386_v55  ;;  %v2212_v38 = vmax.f32 %v9061_v16, %v2102_v12  ;;  %v5341_v34 = vor.u32 %v5726_v14, %v5340_v51  ;;  %v1630_v1 = vpop.f32.mrf.mxu1  ;;  %v5092_v12 = vld [vmem:[%s5943_s30 + $0x2f0] sm:$0xf] }
 0x30d   : > { %v2227_v20 = vmax.f32 %v9062_v53, %v7023_v45  ;;  %1413 = vmatmul.bf16.gmra.mxu0 %v7020_v54 }
 0x30e   : > { %v2522_v3 = vunpack.c.l.b16 %v2434_v31  ;;  %v2287_v18 = vmax.f32 %v2211_v13, %v2212_v38  ;;  %v7046_v13 = vpop.f32.mrf.mxu3  ;;  %3194 = vmatpush.bf16.msrb.mxu3 %v5341_v34  ;;  %v5688_v31 = vld [vmem:[%s5943_s30 + $0x2f4] sm:$0xf0]  ;;  %v5492_v38 = vld [vmem:[%s8867_s3 + $0x1c0] sm:$0xf] }
 0x310   : > { %v7034_v32 = vpack.c.b16 %v2522_v3, %v2521_v23  ;;  %v2339_v21 = vadd.f32 %v6853_v28, %v2287_v18 }
 0x311   : > { %v1854_v52 = vpop.f32.mrf.mxu2 }
 0x312   : > { %v1376_v29 = vpop.f32.mrf.mxu0  ;;  %v2104_v8 = vadd.f32 %v6972_v36, %v1854_v52  ;;  %v2387_v55 = vmax.f32 %v2339_v21, 0.0  ;;  %v5276_v36 = vld [vmem:[%s8867_s3 + $0x10] sm:$0xf] }
 0x313   : > { %v7044_v49 = vadd.f32 %v1625_v9, %v1376_v29  ;;  %v5710_v9 = vld [vmem:[%s8867_s3 + $0x14] sm:$0xf0] }
 0x314   : > { %v2214_v0 = vmax.f32 %v9063_v4, %v2104_v8  ;;  %v5277_v23 = vor.u32 %v5710_v9, %v5276_v36  ;;  %v2435_v51 = vpack.c.bf16 %v2387_v55, %v2387_v55  ;;  %v9065_v8 = vld [vmem:[#allocation46_spill] sm:$0xff]  ;;  %v1633_v36 = vpop.f32.mrf.mxu1 }
 0x315   : > { %v2229_v35 = vmax.f32 %v9064_v41, %v7044_v49  ;;  %v9085_v49 = vld [vmem:[#allocation5_spill] sm:$0xff] }
 0x316   : > { %v2288_v16 = vmax.f32 %v2213_v46, %v2214_v0  ;;  %1896 = vmatmul.bf16.gmra.mxu2 %v6918_v59  ;;  %v7070_v46 = vor.u32 %v5688_v31, %v5092_v12  ;;  %v5493_v59 = vor.u32 %v5764_v26, %v5492_v38  ;;  %3093 = vmatpush.bf16.msrb.mxu1 %v5277_v23  ;;  %v2116_v29 = vpop.f32.mrf.mxu3  ;;  %v9066_v0 = vld [vmem:[#allocation47_spill] sm:$0xff]  ;;  %v2523_v12 = vunpack.c.l.b16 %v2435_v51 }
 0x318   : > { %v2340_v62 = vadd.f32 %v6853_v28, %v2288_v16  ;;  %3393 = vmatpush.bf16.msra.mxu2 %v5493_v59  ;;  %v9067_v59 = vld [vmem:[#allocation48_spill] sm:$0xff] }
 0x319   : > { %v1857_v3 = vpop.f32.mrf.mxu2 }
 0x31a   : > { %v1379_v18 = vpop.f32.mrf.mxu0  ;;  %v2388_v14 = vmax.f32 %v2340_v62, 0.0  ;;  %v2107_v21 = vadd.f32 %v6991_v44, %v1857_v3 }
 0x31b   : > { %v7073_v52 = vadd.f32 %v1628_v25, %v1379_v18  ;;  %v9068_v18 = vld [vmem:[#allocation49_spill] sm:$0xff] }
 0x31c   : > { %v2436_v34 = vpack.c.bf16 %v2388_v14, %v2388_v14  ;;  %v2216_v4 = vmax.f32 %v9065_v8, %v2107_v21 }
 0x31d   : > { %v2231_v16 = vmax.f32 %v9066_v0, %v7073_v52  ;;  %1418 = vmatmul.bf16.gmra.mxu0 %v7070_v46  ;;  %v5332_v52 = vld [vmem:[%s8867_s3 + $0x80] sm:$0xf]  ;;  %v5724_v0 = vld [vmem:[%s8867_s3 + $0x84] sm:$0xf0] }
 0x31e   : > { %v2524_v31 = vunpack.c.l.b16 %v2436_v34  ;;  %v2289_v55 = vmax.f32 %v2215_v22, %v2216_v4  ;;  %v2118_v62 = vpop.f32.mrf.mxu3  ;;  %v1635_v22 = vpop.f32.mrf.mxu1 }
 0x320   : > { %v7082_v44 = vpack.c.b16 %v2524_v31, %v2523_v12  ;;  %v2341_v38 = vadd.f32 %v6853_v28, %v2289_v55  ;;  %v9069_v55 = vld [vmem:[#allocation50_spill] sm:$0xff] }
 0x321   : > { %v1859_v25 = vpop.f32.mrf.mxu2 }
 0x322   : > { %v1381_v9 = vpop.f32.mrf.mxu0  ;;  %v2109_v23 = vadd.f32 %v7006_v63, %v1859_v25  ;;  %v2389_v14 = vmax.f32 %v2341_v38, 0.0 }
 0x323   : > { %v7086_v26 = vadd.f32 %v1630_v1, %v1381_v9 }
 0x324   : > { %v2218_v3 = vmax.f32 %v9067_v59, %v2109_v23  ;;  %v2437_v1 = vpack.c.bf16 %v2389_v14, %v2389_v14 }
 0x325   : > { %v2233_v51 = vmax.f32 %v9068_v18, %v7086_v26  ;;  %v9087_v26 = vld [vmem:[#allocation10_spill] sm:$0xff] }
 0x326   : > { %v2290_v2 = vmax.f32 %v2217_v5, %v2218_v3  ;;  %1901 = vmatmul.bf16.gmra.mxu2 %v6952_v50  ;;  %v2121_v12 = vpop.f32.mrf.mxu3  ;;  %v9071_v5 = vld [vmem:[#allocation2_spill] sm:$0xff]  ;;  %v2525_v50 = vunpack.c.l.b16 %v2437_v1  ;;  %v9073_v1 = vld [vmem:[#allocation53_spill] sm:$0xff] }
 0x328   : > { %v2342_v60 = vadd.f32 %v6853_v28, %v2290_v2 }
 0x329   : > { %v1862_v21 = vpop.f32.mrf.mxu2 }
 0x32a   : > { %v1384_v63 = vpop.f32.mrf.mxu0  ;;  %v2390_v34 = vmax.f32 %v2342_v60, 0.0  ;;  %v2112_v8 = vadd.f32 %v7025_v33, %v1862_v21  ;;  %v1638_v60 = vpop.f32.mrf.mxu1  ;;  %v9072_v21 = vld [vmem:[#allocation52_spill] sm:$0xff] }
 0x32b   : > { %v7097_v4 = vadd.f32 %v1633_v36, %v1384_v63 }
 0x32c   : > { %v2438_v31 = vpack.c.bf16 %v2390_v34, %v2390_v34  ;;  %v2220_v25 = vmax.f32 %v9069_v55, %v2112_v8 }
 0x32d   : > { %v2235_v56 = vmax.f32 %v9070_v61, %v7097_v4  ;;  %5218 = vmatmul.msk.bf16.vlgmr.msrb.gmra.mxu0 %vm1023_vm1, %v9071_v5 }
 0x32e   : > { %v2526_v9 = vunpack.c.l.b16 %v2438_v31  ;;  %v2291_v38 = vmax.f32 %v2219_v27, %v2220_v25  ;;  %v2123_v2 = vpop.f32.mrf.mxu3 }
 0x330   : > { %v7107_v23 = vpack.c.b16 %v2526_v9, %v2525_v50  ;;  %v2343_v59 = vadd.f32 %v6853_v28, %v2291_v38  ;;  %v9074_v9 = vld [vmem:[#allocation54_spill] sm:$0xff] }
 0x331   : > { %v1864_v33 = vpop.f32.mrf.mxu2 }
 0x332   : > { %v1386_v36 = vpop.f32.mrf.mxu0  ;;  %v2114_v3 = vadd.f32 %v7046_v13, %v1864_v33  ;;  %v2391_v8 = vmax.f32 %v2343_v59, 0.0  ;;  %v9075_v33 = vld [vmem:[#allocation55_spill] sm:$0xff]  ;;  %v7128_v39 = vpop.f32.mrf.mxu1 }
 0x333   : > { %v7111_v14 = vadd.f32 %v1635_v22, %v1386_v36 }
 0x334   : > { %v2222_v63 = vmax.f32 %v9072_v21, %v2114_v3  ;;  %v2439_v22 = vpack.c.bf16 %v2391_v8, %v2391_v8 }
 0x335   : > { %v2237_v34 = vmax.f32 %v9073_v1, %v7111_v14 }
 0x336   : > { %v2292_v10 = vmax.f32 %v2221_v40, %v2222_v63  ;;  %1906 = vmatmul.bf16.gmra.mxu2 %v6986_v6  ;;  %v2126_v5 = vpop.f32.mrf.mxu3  ;;  %v2527_v40 = vunpack.c.l.b16 %v2439_v22 }
 0x338   : > { %v2344_v24 = vadd.f32 %v6853_v28, %v2292_v10  ;;  %v9077_v10 = vld [vmem:[#allocation56_spill] sm:$0xff] }
 0x339   : > { %v1867_v27 = vpop.f32.mrf.mxu2 }
 0x33a   : > { %v1389_v13 = vpop.f32.mrf.mxu0  ;;  %v2392_v31 = vmax.f32 %v2344_v24, 0.0  ;;  %v2117_v55 = vadd.f32 %v2116_v29, %v1867_v27  ;;  %v1643_v30 = vpop.f32.mrf.mxu1 }
 0x33b   : > { %v7121_v25 = vadd.f32 %v1638_v60, %v1389_v13 }
 0x33c   : > { %v2440_v50 = vpack.c.bf16 %v2392_v31, %v2392_v31  ;;  %v2224_v38 = vmax.f32 %v9074_v9, %v2117_v55 }
 0x33d   : > { %v2239_v36 = vmax.f32 %v9075_v33, %v7121_v25  ;;  %5219 = vmatmul.msk.bf16.gmra.mxu0 %vm1023_vm1, %v9076_v19  ;;  %v9078_v19 = vld [vmem:[#allocation58_spill] sm:$0xff] }
 0x33e   : > { %v2528_v6 = vunpack.c.l.b16 %v2440_v50  ;;  %v2293_v29 = vmax.f32 %v2223_v43, %v2224_v38  ;;  %v2128_v8 = vpop.f32.mrf.mxu3 }
 0x340   : > { %v7133_v59 = vpack.c.b16 %v2528_v6, %v2527_v40  ;;  %v2345_v21 = vadd.f32 %v6853_v28, %v2293_v29  ;;  %v9079_v6 = vld [vmem:[#allocation59_spill] sm:$0xff] }
 0x341   : > { %v1869_v3 = vpop.f32.mrf.mxu2 }
 0x342   : > { %v7135_v60 = vpop.f32.mrf.mxu0  ;;  %v2119_v63 = vadd.f32 %v2118_v62, %v1869_v3  ;;  %v2393_v27 = vmax.f32 %v2345_v21, 0.0 }
 0x344   : > { %v2226_v24 = vmax.f32 %v9077_v10, %v2119_v63  ;;  %v2441_v31 = vpack.c.bf16 %v2393_v27, %v2393_v27  ;;  %v9081_v27 = vld [vmem:[#allocation60_spill] sm:$0xff] }
 0x346   : > { %v2294_v13 = vmax.f32 %v2225_v7, %v2226_v24  ;;  %1911 = vmatmul.bf16.gmra.mxu2 %v7020_v54  ;;  %v2131_v62 = vpop.f32.mrf.mxu3  ;;  %v2529_v7 = vunpack.c.l.b16 %v2441_v31 }
 0x348   : > { %v2346_v37 = vadd.f32 %v6853_v28, %v2294_v13 }
 0x349   : > { %v1872_v43 = vpop.f32.mrf.mxu2 }
 0x34a   : > { %v1394_v22 = vpop.f32.mrf.mxu0  ;;  %v2394_v55 = vmax.f32 %v2346_v37, 0.0  ;;  %v2122_v50 = vadd.f32 %v2121_v12, %v1872_v43 }
 0x34b   : > { %v7144_v9 = vadd.f32 %v1643_v30, %v1394_v22 }
 0x34c   : > { %v2442_v38 = vpack.c.bf16 %v2394_v55, %v2394_v55  ;;  %v2228_v40 = vmax.f32 %v9078_v19, %v2122_v50  ;;  %v9082_v55 = vld [vmem:[#allocation8_spill] sm:$0xff] }
 0x34d   : > { %v2243_v47 = vmax.f32 %v9079_v6, %v7144_v9  ;;  %5220 = vmatmul.msk.bf16.gmra.mxu0 %vm1023_vm1, %v9080_v17 }
 0x34e   : > { %v2530_v54 = vunpack.c.l.b16 %v2442_v38  ;;  %v2295_v29 = vmax.f32 %v2227_v20, %v2228_v40  ;;  %v2133_v24 = vpop.f32.mrf.mxu3  ;;  %v9083_v38 = vld [vmem:[#allocation62_spill] sm:$0xff]  ;;  %v9084_v40 = vld [vmem:[#allocation63_spill] sm:$0xff] }
 0x350   : > { %v7154_v3 = vpack.c.b16 %v2530_v54, %v2529_v7  ;;  %v2347_v63 = vadd.f32 %v6853_v28, %v2295_v29 }
 0x351   : > { %v1874_v12 = vpop.f32.mrf.mxu2 }
 0x352   : > { %v7156_v21 = vpop.f32.mrf.mxu0  ;;  %v2124_v10 = vadd.f32 %v2123_v2, %v1874_v12  ;;  %v2395_v30 = vmax.f32 %v2347_v63, 0.0 }
 0x354   : > { %v2230_v13 = vmax.f32 %v9081_v27, %v2124_v10  ;;  %v2443_v43 = vpack.c.bf16 %v2395_v30, %v2395_v30  ;;  %v9086_v10 = vld [vmem:[#allocation64_spill] sm:$0xff] }
 0x356   : > { %v2296_v37 = vmax.f32 %v2229_v35, %v2230_v13  ;;  %1916 = vmatmul.bf16.gmra.mxu2 %v7070_v46  ;;  %v2136_v41 = vpop.f32.mrf.mxu3  ;;  %v2531_v35 = vunpack.c.l.b16 %v2443_v43 }
 0x358   : > { %v2348_v45 = vadd.f32 %v6853_v28, %v2296_v37  ;;  %v5333_v37 = vor.u32 %v5724_v0, %v5332_v52  ;;  %v5484_v52 = vld [vmem:[%s8867_s3 + $0x1b0] sm:$0xf]  ;;  %v5762_v0 = vld [vmem:[%s8867_s3 + $0x1b4] sm:$0xf0] }
 0x359   : > { %v1877_v53 = vpop.f32.mrf.mxu2 }
 0x35a   : > { %v1399_v20 = vpop.f32.mrf.mxu0  ;;  %v2396_v22 = vmax.f32 %v2348_v45, 0.0  ;;  %v2127_v31 = vadd.f32 %v2126_v5, %v1877_v53  ;;  %3195 = vmatpush.bf16.msrb.mxu3 %v5333_v37  ;;  %v5485_v37 = vor.u32 %v5762_v0, %v5484_v52 }
 0x35b   : > { %v7166_v50 = vadd.f32 %v9082_v55, %v1399_v20 }
 0x35c   : > { %v2444_v2 = vpack.c.bf16 %v2396_v22, %v2396_v22  ;;  %v2232_v19 = vmax.f32 %v9083_v38, %v2127_v31  ;;  %v9088_v31 = vld [vmem:[#allocation66_spill] sm:$0xff]  ;;  %3394 = vmatpush.bf16.msra.mxu2 %v5485_v37 }
 0x35d   : > { %v2247_v17 = vmax.f32 %v9084_v40, %v7166_v50  ;;  %5221 = vmatmul.msk.bf16.gmra.mxu0 %vm1023_vm1, %v9085_v49  ;;  %v9096_v37 = vld [vmem:[#allocation18_spill] sm:$0xff]  ;;  %v5754_v50 = vld [vmem:[%s8867_s3 + $0x174] sm:$0xf0] }
 0x35e   : > { %v2532_v46 = vunpack.c.l.b16 %v2444_v2  ;;  %v2297_v7 = vmax.f32 %v2231_v16, %v2232_v19  ;;  %v2138_v16 = vpop.f32.mrf.mxu3  ;;  %v9089_v2 = vld [vmem:[#allocation67_spill] sm:$0xff] }
 0x35f   : > { %v9090_v19 = vld [vmem:[#allocation7_spill] sm:$0xff] }
 0x360   : > { %v7176_v5 = vpack.c.b16 %v2532_v46, %v2531_v35  ;;  %v2349_v12 = vadd.f32 %v6853_v28, %v2297_v7 }
 0x361   : > { %v1879_v54 = vpop.f32.mrf.mxu2 }
 0x362   : > { %v7178_v29 = vpop.f32.mrf.mxu0  ;;  %v2129_v63 = vadd.f32 %v2128_v8, %v1879_v54  ;;  %v2397_v13 = vmax.f32 %v2349_v12, 0.0  ;;  %v5708_v54 = vld [vmem:[%s8867_s3 + $0x4] sm:$0xf0] }
 0x364   : > { %v2234_v27 = vmax.f32 %v9086_v10, %v2129_v63  ;;  %v2445_v20 = vpack.c.bf16 %v2397_v13, %v2397_v13 }
 0x366   : > { %v2298_v30 = vmax.f32 %v2233_v51, %v2234_v27  ;;  %v2533_v49 = vunpack.c.l.b16 %v2445_v20  ;;  %v2141_v12 = vpop.f32.mrf.mxu3 }
 0x368   : > { %v2350_v45 = vadd.f32 %v6853_v28, %v2298_v30 }
 0x369   : > { %v1882_v8 = vpop.f32.mrf.mxu2 }
 0x36a   : > { %v1404_v53 = vpop.f32.mrf.mxu0  ;;  %v2398_v43 = vmax.f32 %v2350_v45, 0.0  ;;  %v2132_v22 = vadd.f32 %v2131_v62, %v1882_v8  ;;  %v5268_v62 = vld [vmem:[%s8867_s3] sm:$0xf] }
 0x36b   : > { %v7193_v18 = vadd.f32 %v9087_v26, %v1404_v53  ;;  %v5269_v27 = vor.u32 %v5708_v54, %v5268_v62 }
 0x36c   : > { %v2446_v51 = vpack.c.bf16 %v2398_v43, %v2398_v43  ;;  %v2236_v55 = vmax.f32 %v9088_v31, %v2132_v22  ;;  %v9091_v43 = vld [vmem:[#allocation14_spill] sm:$0xff]  ;;  %v9092_v22 = vld [vmem:[#allocation69_spill] sm:$0xff] }
 0x36d   : > { %v2251_v38 = vmax.f32 %v9089_v2, %v7193_v18  ;;  %5222 = vmatmul.msk.bf16.gmra.mxu0 %vm1023_vm1, %v9090_v19  ;;  %3094 = vmatpush.bf16.msrb.mxu1 %v5269_v27  ;;  %v9094_v27 = vld [vmem:[#allocation57_spill] sm:$0xff] }
 0x36e   : > { %v2534_v35 = vunpack.c.l.b16 %v2446_v51  ;;  %v2299_v46 = vmax.f32 %v2235_v56, %v2236_v55  ;;  %v2143_v1 = vpop.f32.mrf.mxu3  ;;  %v9093_v51 = vld [vmem:[#allocation70_spill] sm:$0xff] }
 0x370   : > { %v7203_v7 = vpack.c.b16 %v2534_v35, %v2533_v49  ;;  %v2351_v13 = vadd.f32 %v6853_v28, %v2299_v46  ;;  %v1641_v35 = vadd.f32 %v7128_v39, %v7135_v60 }
 0x371   : > { %v1884_v63 = vpop.f32.mrf.mxu2 }
 0x372   : > { %v7211_v10 = vpop.f32.mrf.mxu0  ;;  %v2134_v30 = vadd.f32 %v2133_v24, %v1884_v63  ;;  %v2399_v61 = vmax.f32 %v2351_v13, 0.0  ;;  %v2241_v13 = vmax.f32 %v9094_v27, %v1641_v35  ;;  %v9100_v27 = vld [vmem:[#allocation75_spill] sm:$0xff] }
 0x374   : > { %v2238_v4 = vmax.f32 %v6536_v42, %v2134_v30  ;;  %v2447_v42 = vpack.c.bf16 %v2399_v61, %v2399_v61  ;;  %v9095_v30 = vld [vmem:[#allocation71_spill] sm:$0xff] }
 0x376   : > { %v2300_v56 = vmax.f32 %v2237_v34, %v2238_v4  ;;  %v2535_v55 = vunpack.c.l.b16 %v2447_v42  ;;  %v2146_v61 = vpop.f32.mrf.mxu3  ;;  %v9098_v42 = vld [vmem:[#allocation74_spill] sm:$0xff] }
 0x378   : > { %v2352_v45 = vadd.f32 %v6853_v28, %v2300_v56 }
 0x379   : > { %v1887_v24 = vpop.f32.mrf.mxu2 }
 0x37a   : > { %v1409_v8 = vpop.f32.mrf.mxu0  ;;  %v2400_v53 = vmax.f32 %v2352_v45, 0.0  ;;  %v2137_v20 = vadd.f32 %v2136_v41, %v1887_v24 }
 0x37b   : > { %v7226_v14 = vadd.f32 %v9091_v43, %v1409_v8  ;;  %v9097_v8 = vld [vmem:[#allocation73_spill] sm:$0xff] }
 0x37c   : > { %v2448_v34 = vpack.c.bf16 %v2400_v53, %v2400_v53  ;;  %v2240_v26 = vmax.f32 %v9092_v22, %v2137_v20  ;;  %v1645_v20 = vpop.f32.mrf.mxu1 }
 0x37d   : > { %v2255_v31 = vmax.f32 %v9093_v51, %v7226_v14 }
 0x37e   : > { %v2536_v19 = vunpack.c.l.b16 %v2448_v34  ;;  %v2301_v49 = vmax.f32 %v2239_v36, %v2240_v26  ;;  %v2148_v26 = vpop.f32.mrf.mxu3 }
 0x380   : > { %v7236_v41 = vpack.c.b16 %v2536_v19, %v2535_v55  ;;  %v2353_v54 = vadd.f32 %v6853_v28, %v2301_v49  ;;  %v1646_v55 = vadd.f32 %v1645_v20, %v7156_v21 }
 0x381   : > { %v1889_v46 = vpop.f32.mrf.mxu2 }
 0x382   : > { %v7238_v62 = vpop.f32.mrf.mxu0  ;;  %v2139_v63 = vadd.f32 %v2138_v16, %v1889_v46  ;;  %v2401_v56 = vmax.f32 %v2353_v54, 0.0  ;;  %v9099_v54 = vld [vmem:[#allocation61_spill] sm:$0xff] }
 0x384   : > { %v2242_v4 = vmax.f32 %v9095_v30, %v2139_v63  ;;  %v2449_v39 = vpack.c.bf16 %v2401_v56, %v2401_v56  ;;  %v2245_v63 = vmax.f32 %v9099_v54, %v1646_v55 }
 0x386   : > { %v2302_v52 = vmax.f32 %v2241_v13, %v2242_v4  ;;  %v2537_v43 = vunpack.c.l.b16 %v2449_v39  ;;  %v2151_v6 = vpop.f32.mrf.mxu3 }
 0x388   : > { %v2354_v25 = vadd.f32 %v6853_v28, %v2302_v52 }
 0x389   : > { %v1892_v33 = vpop.f32.mrf.mxu2 }
 0x38a   : > { %v1414_v36 = vpop.f32.mrf.mxu0  ;;  %v2402_v60 = vmax.f32 %v2354_v25, 0.0  ;;  %v2142_v0 = vadd.f32 %v2141_v12, %v1892_v33  ;;  %v9101_v33 = vld [vmem:[#allocation22_spill] sm:$0xff] }
 0x38b   : > { %v7245_v45 = vadd.f32 %v9096_v37, %v1414_v36 }
 0x38c   : > { %v2450_v24 = vpack.c.bf16 %v2402_v60, %v2402_v60  ;;  %v2244_v16 = vmax.f32 %v9097_v8, %v2142_v0  ;;  %v9102_v60 = vld [vmem:[#allocation77_spill] sm:$0xff] }
 0x38d   : > { %v2259_v53 = vmax.f32 %v9098_v42, %v7245_v45 }
 0x38e   : > { %v2538_v34 = vunpack.c.l.b16 %v2450_v24  ;;  %v2303_v22 = vmax.f32 %v2243_v47, %v2244_v16  ;;  %v9103_v16 = vld [vmem:[#allocation9_spill] sm:$0xff]  ;;  %v2153_v55 = vpop.f32.mrf.mxu3 }
 0x38f   : > { %v1651_v20 = vadd.f32 %v9103_v16, %v7178_v29  ;;  %v9108_v16 = vld [vmem:[#allocation96_spill] sm:$0xff] }
 0x390   : > { %v7254_v12 = vpack.c.b16 %v2538_v34, %v2537_v43  ;;  %v2355_v35 = vadd.f32 %v6853_v28, %v2303_v22 }
 0x391   : > { %v1894_v19 = vpop.f32.mrf.mxu2 }
 0x392   : > { %v7256_v49 = vpop.f32.mrf.mxu0  ;;  %v2144_v46 = vadd.f32 %v2143_v1, %v1894_v19  ;;  %v2403_v30 = vmax.f32 %v2355_v35, 0.0  ;;  %v5452_v19 = vld [vmem:[%s8867_s3 + $0x170] sm:$0xf]  ;;  %v9105_v35 = vld [vmem:[#allocation78_spill] sm:$0xff] }
 0x393   : > { %v5453_v40 = vor.u32 %v5754_v50, %v5452_v19  ;;  %v9109_v19 = vld [vmem:[#allocation11_spill] sm:$0xff]  ;;  %v9110_v50 = vld [vmem:[#allocation81_spill] sm:$0xff] }
 0x394   : > { %v2246_v13 = vmax.f32 %v9100_v27, %v2144_v46  ;;  %v2451_v21 = vpack.c.bf16 %v2403_v30, %v2403_v30  ;;  %v5752_v27 = vld [vmem:[%s8867_s3 + $0x164] sm:$0xf0] }
 0x395   : > { %3289 = vmatpush.bf16.msra.mxu0 %v5453_v40  ;;  %v9111_v40 = vmax.f32 %v9109_v19, %v9110_v50 }
 0x396   : > { %v2304_v4 = vmax.f32 %v2245_v63, %v2246_v13  ;;  %v2539_v37 = vunpack.c.l.b16 %v2451_v21 }
 0x398   : > { %v2356_v9 = vadd.f32 %v6853_v28, %v2304_v4 }
 0x399   : > { %v1897_v47 = vpop.f32.mrf.mxu2 }
 0x39a   : > { %v1419_v56 = vpop.f32.mrf.mxu0  ;;  %v2404_v52 = vmax.f32 %v2356_v9, 0.0  ;;  %v2147_v25 = vadd.f32 %v2146_v61, %v1897_v47 }
 0x39b   : > { %v7263_v36 = vadd.f32 %v9101_v33, %v1419_v56  ;;  %v5436_v33 = vld [vmem:[%s8867_s3 + $0x150] sm:$0xf] }
 0x39c   : > { %v2452_v39 = vpack.c.bf16 %v2404_v52, %v2404_v52  ;;  %v2248_v1 = vmax.f32 %v6595_v48, %v2147_v25  ;;  %v9106_v52 = vld [vmem:[#allocation26_spill] sm:$0xff] }
 0x39d   : > { %v2263_v0 = vmax.f32 %v9102_v60, %v7263_v36  ;;  %v5572_v36 = vld [vmem:[%s8867_s3 + $0x260] sm:$0xf] }
 0x39e   : > { %v2540_v24 = vunpack.c.l.b16 %v2452_v39  ;;  %v2305_v8 = vmax.f32 %v2247_v17, %v2248_v1  ;;  %v9104_v17 = vld [vmem:[#allocation65_spill] sm:$0xff] }
 0x39f   : > { %v2249_v29 = vmax.f32 %v9104_v17, %v1651_v20  ;;  %v5750_v39 = vld [vmem:[%s8867_s3 + $0x154] sm:$0xf0] }
 0x3a0   : > { %v7273_v43 = vpack.c.b16 %v2540_v24, %v2539_v37  ;;  %v2357_v22 = vadd.f32 %v6853_v28, %v2305_v8  ;;  %v5437_v1 = vor.u32 %v5750_v39, %v5436_v33  ;;  %v9107_v24 = vld [vmem:[#allocation80_spill] sm:$0xff]  ;;  %v9116_v33 = vld [vmem:[#allocation98_spill] sm:$0xff] }
 0x3a1   : > { %v1899_v61 = vpop.f32.mrf.mxu2 }
 0x3a2   : > { %v7275_v34 = vpop.f32.mrf.mxu0  ;;  %v2149_v48 = vadd.f32 %v2148_v26, %v1899_v61  ;;  %v2405_v54 = vmax.f32 %v2357_v22, 0.0  ;;  %v5444_v26 = vld [vmem:[%s8867_s3 + $0x160] sm:$0xf]  ;;  %v2156_v61 = vpop.f32.mrf.mxu3 }
 0x3a3   : > { %v5445_v13 = vor.u32 %v5752_v27, %v5444_v26 }
 0x3a4   : > { %v2250_v46 = vmax.f32 %v9105_v35, %v2149_v48  ;;  %v2453_v47 = vpack.c.bf16 %v2405_v54, %v2405_v54  ;;  %v5748_v35 = vld [vmem:[%s8867_s3 + $0x144] sm:$0xf0]  ;;  %v9112_v54 = vld [vmem:[#allocation12_spill] sm:$0xff] }
 0x3a5   : > { %3290 = vmatpush.bf16.msra.mxu0 %v5445_v13 }
 0x3a6   : > { %v2306_v63 = vmax.f32 %v2249_v29, %v2250_v46  ;;  %v2541_v22 = vunpack.c.l.b16 %v2453_v47  ;;  %v5428_v29 = vld [vmem:[%s8867_s3 + $0x140] sm:$0xf] }
 0x3a7   : > { %v5429_v46 = vor.u32 %v5748_v35, %v5428_v29 }
 0x3a8   : > { %v2358_v30 = vadd.f32 %v6853_v28, %v2306_v63  ;;  %v1656_v63 = vadd.f32 %v9112_v54, %v7211_v10  ;;  %v5746_v10 = vld [vmem:[%s8867_s3 + $0x134] sm:$0xf0] }
 0x3a9   : > { %v1902_v4 = vpop.f32.mrf.mxu2  ;;  %3291 = vmatpush.bf16.msra.mxu0 %v5437_v1 }
 0x3aa   : > { %v1931_v9 = vpop.f32.mrf.mxu0  ;;  %v2406_v56 = vmax.f32 %v2358_v30, 0.0  ;;  %v2152_v21 = vadd.f32 %v2151_v6, %v1902_v4  ;;  %v9113_v30 = vld [vmem:[#allocation28_spill] sm:$0xff] }
 0x3ab   : > { %v1932_v25 = vadd.f32 %v1931_v9, %v9106_v52  ;;  %v5420_v9 = vld [vmem:[%s8867_s3 + $0x130] sm:$0xf]  ;;  %v9115_v52 = vld [vmem:[#allocation82_spill] sm:$0xff] }
 0x3ac   : > { %v2454_v37 = vpack.c.bf16 %v2406_v56, %v2406_v56  ;;  %v2252_v8 = vmax.f32 %v9107_v24, %v2152_v21  ;;  %v5421_v47 = vor.u32 %v5746_v10, %v5420_v9  ;;  %v9114_v56 = vld [vmem:[#allocation68_spill] sm:$0xff]  ;;  %v9117_v24 = vld [vmem:[#allocation13_spill] sm:$0xff] }
 0x3ad   : > { %v2172_v20 = vmax.f32 %v1932_v25, %v9108_v16  ;;  %3292 = vmatpush.bf16.msra.mxu0 %v5429_v46  ;;  %v2253_v21 = vmax.f32 %v9114_v56, %v1656_v63  ;;  %v9121_v9 = vld [vmem:[#allocation84_spill] sm:$0xff] }
 0x3ae   : > { %v2542_v6 = vunpack.c.l.b16 %v2454_v37  ;;  %v2307_v48 = vmax.f32 %v2251_v38, %v2252_v8  ;;  %v9118_v8 = vld [vmem:[#allocation83_spill] sm:$0xff] }
 0x3af   : > { %v2267_v17 = vmax.f32 %v9111_v40, %v2172_v20  ;;  %v9119_v16 = vmax.f32 %v9117_v24, %v9118_v8  ;;  %v5396_v24 = vld [vmem:[%s8867_s3 + $0x100] sm:$0xf]  ;;  %v5740_v8 = vld [vmem:[%s8867_s3 + $0x104] sm:$0xf0] }
 0x3b0   : > { %v7316_v26 = vpack.c.b16 %v2542_v6, %v2541_v22  ;;  %v2359_v18 = vadd.f32 %v6853_v28, %v2307_v48  ;;  %v2158_v22 = vpop.f32.mrf.mxu3  ;;  %v5412_v6 = vld [vmem:[%s8867_s3 + $0x120] sm:$0xf]  ;;  %v5744_v48 = vld [vmem:[%s8867_s3 + $0x124] sm:$0xf0] }
 0x3b1   : > { %v2319_v2 = vadd.f32 %v6853_v28, %v2267_v17  ;;  %v1904_v38 = vpop.f32.mrf.mxu2  ;;  %3293 = vmatpush.bf16.msra.mxu0 %v5421_v47  ;;  %v5413_v19 = vor.u32 %v5744_v48, %v5412_v6  ;;  %v9122_v47 = vld [vmem:[#allocation100_spill] sm:$0xff] }
 0x3b2   : > { %v1933_v27 = vpop.f32.mrf.mxu0  ;;  %v2154_v13 = vadd.f32 %v2153_v55, %v1904_v38  ;;  %v2407_v1 = vmax.f32 %v2359_v18, 0.0 }
 0x3b3   : > { %v1934_v4 = vadd.f32 %v1933_v27, %v9113_v30  ;;  %v2367_v37 = vmax.f32 %v2319_v2, 0.0  ;;  %v9120_v2 = vld [vmem:[#allocation30_spill] sm:$0xff]  ;;  %v5404_v27 = vld [vmem:[%s8867_s3 + $0x110] sm:$0xf] }
 0x3b4   : > { %v2254_v25 = vmax.f32 %v9115_v52, %v2154_v13  ;;  %v2455_v17 = vpack.c.bf16 %v2407_v1, %v2407_v1  ;;  %v5742_v13 = vld [vmem:[%s8867_s3 + $0x114] sm:$0xf0] }
 0x3b5   : > { %v2174_v39 = vmax.f32 %v1934_v4, %v9116_v33  ;;  %v2415_v29 = vpack.c.bf16 %v2367_v37, %v2367_v37  ;;  %3294 = vmatpush.bf16.msra.mxu0 %v5413_v19  ;;  %v5405_v30 = vor.u32 %v5742_v13, %v5404_v27  ;;  %v9124_v1 = vld [vmem:[#allocation85_spill] sm:$0xff]  ;;  %v9128_v27 = vld [vmem:[#allocation72_spill] sm:$0xff] }
 0x3b6   : > { %v2308_v55 = vmax.f32 %v2253_v21, %v2254_v25  ;;  %v2585_v21 = vunpack.c.l.b16 %v2455_v17  ;;  %v5326_v19 = vld [vmem:[%s8867_s3 + $0x78] sm:$0xf0] }
 0x3b7   : > { %v2268_v20 = vmax.f32 %v9119_v16, %v2174_v39  ;;  %v2503_v52 = vunpack.c.l.b16 %v2415_v29  ;;  %v9123_v39 = vld [vmem:[#allocation15_spill] sm:$0xff]  ;;  %v5397_v16 = vor.u32 %v5740_v8, %v5396_v24 }
 0x3b8   : > { %v2360_v50 = vadd.f32 %v6853_v28, %v2308_v55  ;;  %v9125_v37 = vmax.f32 %v9123_v39, %v9124_v1  ;;  %v2161_v51 = vpop.f32.mrf.mxu3 }
 0x3b9   : > { %v2320_v40 = vadd.f32 %v6853_v28, %v2268_v20  ;;  %v1907_v35 = vpop.f32.mrf.mxu2  ;;  %3295 = vmatpush.bf16.msra.mxu0 %v5405_v30  ;;  %v9126_v20 = vld [vmem:[#allocation16_spill] sm:$0xff]  ;;  %v9129_v30 = vld [vmem:[#allocation86_spill] sm:$0xff] }
 0x3ba   : > { %v1936_v46 = vpop.f32.mrf.mxu0  ;;  %v2408_v54 = vmax.f32 %v2360_v50, 0.0  ;;  %v2157_v18 = vadd.f32 %v2156_v61, %v1907_v35  ;;  %v1661_v6 = vadd.f32 %v9126_v20, %v7238_v62  ;;  %v5580_v50 = vld [vmem:[%s8867_s3 + $0x270] sm:$0xf]  ;;  %v7380_v62 = vld [vmem:[%s8866_s2] ss:$0 sm:$0xff] }
 0x3bb   : > { %v2368_v63 = vmax.f32 %v2320_v40, 0.0  ;;  %v1937_v38 = vadd.f32 %v1936_v46, %v9120_v2 }
 0x3bc   : > { %v2456_v28 = vpack.c.bf16 %v2408_v54, %v2408_v54  ;;  %v2256_v10 = vmax.f32 %v9121_v9, %v2157_v18  ;;  %v5786_v54 = vld [vmem:[%s8867_s3 + $0x274] sm:$0xf0]  ;;  %v9127_v18 = vld [vmem:[#allocation31_spill] sm:$0xff]  ;;  %v2257_v13 = vmax.f32 %v9128_v27, %v1661_v6 }
 0x3bd   : > { %v2416_v4 = vpack.c.bf16 %v2368_v63, %v2368_v63  ;;  %v2176_v56 = vmax.f32 %v1937_v38, %v9122_v47  ;;  %3296 = vmatpush.bf16.msra.mxu0 %v5397_v16  ;;  %v5581_v38 = vor.u32 %v5786_v54, %v5580_v50 }
 0x3be   : > { %v2586_v61 = vunpack.c.l.b16 %v2456_v28  ;;  %v2309_v33 = vmax.f32 %v2255_v31, %v2256_v10  ;;  %v5721_v31 = vld [vmem:[%s8867_s3 + $0x74] sm:$0xf] }
 0x3bf   : > { %v2504_v25 = vunpack.c.l.b16 %v2416_v4  ;;  %v2269_v55 = vmax.f32 %v9125_v37, %v2176_v56  ;;  %v5329_v46 = vor.u32 %v5721_v31, %v5326_v19  ;;  %v9130_v4 = vld [vmem:[#allocation101_spill] sm:$0xff]  ;;  %3491 = vmatpush.bf16.msra.mxu1 %v5581_v38  ;;  %v9134_v19 = vld [vmem:[#allocation32_spill] sm:$0xff] }
 0x3c0   : > { %v7364_v48 = vpack.c.b16 %v2586_v61, %v2585_v21  ;;  %v2361_v40 = vadd.f32 %v7380_v62, %v2309_v33  ;;  %v9131_v21 = vld [vmem:[#allocation17_spill] sm:$0xff]  ;;  %v5760_v33 = vld [vmem:[%s8867_s3 + $0x1a4] sm:$0xf0] }
 0x3c1   : > { %v7366_v14 = vpack.c.b16 %v2504_v25, %v2503_v52  ;;  %v2321_v17 = vadd.f32 %v7380_v62, %v2269_v55  ;;  %v1909_v29 = vpop.f32.mrf.mxu2  ;;  %3592 = vmatpush.bf16.msra.mxu3 %v5329_v46  ;;  %v9132_v52 = vld [vmem:[#allocation87_spill] sm:$0xff]  ;;  %v5476_v25 = vld [vmem:[%s8867_s3 + $0x1a0] sm:$0xf] }
 0x3c2   : > { %v1938_v35 = vpop.f32.mrf.mxu0  ;;  %v2159_v63 = vadd.f32 %v2158_v22, %v1909_v29  ;;  %v2409_v10 = vmax.f32 %v2361_v40, 0.0  ;;  %v9133_v61 = vmax.f32 %v9131_v21, %v9132_v52  ;;  %v5477_v39 = vor.u32 %v5760_v33, %v5476_v25  ;;  %v5468_v40 = vld [vmem:[%s8867_s3 + $0x190] sm:$0xf]  ;;  %v2163_v29 = vpop.f32.mrf.mxu3  ;;  %v5756_v21 = vld [vmem:[%s8867_s3 + $0x184] sm:$0xf0] }
 0x3c3   : > { %v1939_v2 = vadd.f32 %v1938_v35, %v9127_v18  ;;  %3095 = vmatmul.bf16.vlgmr.msrb.gmra.mxu1 %v7366_v14  ;;  %v2369_v47 = vmax.f32 %v2321_v17, 0.0  ;;  %v5758_v17 = vld [vmem:[%s8867_s3 + $0x194] sm:$0xf0] }
 0x3c4   : > { %v2258_v28 = vmax.f32 %v9129_v30, %v2159_v63  ;;  %v2457_v55 = vpack.c.bf16 %v2409_v10, %v2409_v10  ;;  %3395 = vmatpush.bf16.msra.mxu2 %v5477_v39  ;;  %v5469_v35 = vor.u32 %v5758_v17, %v5468_v40  ;;  %v9135_v63 = vld [vmem:[#allocation88_spill] sm:$0xff]  ;;  %v9145_v17 = vld [vmem:[#allocation21_spill] sm:$0xff] }
 0x3c5   : > { %v2178_v9 = vmax.f32 %v1939_v2, %v9130_v4  ;;  %v2417_v24 = vpack.c.bf16 %v2369_v47, %v2369_v47  ;;  %v9136_v2 = vld [vmem:[#allocation102_spill] sm:$0xff]  ;;  %v9137_v4 = vld [vmem:[#allocation19_spill] sm:$0xff] }
 0x3c6   : > { %v2310_v56 = vmax.f32 %v2257_v13, %v2258_v28  ;;  %v2591_v27 = vunpack.c.l.b16 %v2457_v55 }
 0x3c7   : > { %v2270_v22 = vmax.f32 %v9133_v61, %v2178_v9  ;;  %v9138_v9 = vld [vmem:[#allocation89_spill] sm:$0xff]  ;;  %v9140_v61 = vld [vmem:[#allocation20_spill] sm:$0xff] }
 0x3c8   : > { %v2362_v1 = vadd.f32 %v7380_v62, %v2310_v56  ;;  %3396 = vmatpush.bf16.msra.mxu2 %v5469_v35  ;;  %v9139_v10 = vmax.f32 %v9137_v4, %v9138_v9  ;;  %v5460_v56 = vld [vmem:[%s8867_s3 + $0x180] sm:$0xf]  ;;  %v9146_v35 = vld [vmem:[#allocation91_spill] sm:$0xff] }
 0x3c9   : > { %v2322_v37 = vadd.f32 %v7380_v62, %v2270_v22  ;;  %v1912_v8 = vpop.f32.mrf.mxu2  ;;  %v5461_v52 = vor.u32 %v5756_v21, %v5460_v56  ;;  %v1666_v22 = vadd.f32 %v9140_v61, %v7256_v49  ;;  %v9150_v21 = vld [vmem:[#allocation104_spill] sm:$0xff] }
 0x3ca   : > { %v1941_v16 = vpop.f32.mrf.mxu0  ;;  %v2410_v20 = vmax.f32 %v2362_v1, 0.0  ;;  %v2162_v31 = vadd.f32 %v2161_v51, %v1912_v8  ;;  %v2505_v51 = vunpack.c.l.b16 %v2417_v24  ;;  %v9142_v24 = vld [vmem:[#allocation76_spill] sm:$0xff]  ;;  %v9143_v8 = vld [vmem:[#allocation90_spill] sm:$0xff] }
 0x3cb   : > { %v2370_v6 = vmax.f32 %v2322_v37, 0.0  ;;  %v1942_v50 = vadd.f32 %v1941_v16, %v9134_v19  ;;  %v9141_v37 = vld [vmem:[#allocation33_spill] sm:$0xff]  ;;  %v2261_v49 = vmax.f32 %v9142_v24, %v1666_v22 }
 0x3cc   : > { %v2458_v46 = vpack.c.bf16 %v2410_v20, %v2410_v20  ;;  %v2260_v18 = vmax.f32 %v9135_v63, %v2162_v31  ;;  %3397 = vmatpush.bf16.msra.mxu2 %v5461_v52  ;;  %v9144_v20 = vld [vmem:[#allocation103_spill] sm:$0xff] }
 0x3cd   : > { %v2418_v54 = vpack.c.bf16 %v2370_v6, %v2370_v6  ;;  %v2180_v38 = vmax.f32 %v1942_v50, %v9136_v2  ;;  %v2166_v50 = vpop.f32.mrf.mxu3 }
 0x3ce   : > { %v2592_v13 = vunpack.c.l.b16 %v2458_v46  ;;  %v2311_v28 = vmax.f32 %v2259_v53, %v2260_v18  ;;  %v9147_v46 = vmax.f32 %v9145_v17, %v9146_v35  ;;  %v9155_v35 = vld [vmem:[#allocation35_spill] sm:$0xff] }
 0x3cf   : > { %v2506_v30 = vunpack.c.l.b16 %v2418_v54  ;;  %v2271_v47 = vmax.f32 %v9139_v10, %v2180_v38 }
 0x3d0   : > { %v7426_v25 = vpack.c.b16 %v2592_v13, %v2591_v27  ;;  %v2363_v42 = vadd.f32 %v7380_v62, %v2311_v28  ;;  %v9148_v28 = vld [vmem:[#allocation34_spill] sm:$0xff] }
 0x3d1   : > { %v7428_v45 = vpack.c.b16 %v2506_v30, %v2505_v51  ;;  %v2323_v53 = vadd.f32 %v7380_v62, %v2271_v47  ;;  %v1914_v33 = vpop.f32.mrf.mxu2  ;;  %v9149_v47 = vld [vmem:[#allocation92_spill] sm:$0xff] }
 0x3d2   : > { %v1943_v39 = vpop.f32.mrf.mxu0  ;;  %v2164_v1 = vadd.f32 %v2163_v29, %v1914_v33  ;;  %v2411_v31 = vmax.f32 %v2363_v42, 0.0 }
 0x3d3   : > { %v1944_v55 = vadd.f32 %v1943_v39, %v9141_v37  ;;  %3100 = vmatmul.bf16.gmra.mxu1 %v7428_v45  ;;  %3196 = vmatmul.bf16.vlgmr.msrb.gmra.mxu3 %v7428_v45  ;;  %v2371_v19 = vmax.f32 %v2323_v53, 0.0  ;;  %v9151_v39 = vld [vmem:[#allocation23_spill] sm:$0xff] }
 0x3d4   : > { %v2262_v16 = vmax.f32 %v9143_v8, %v2164_v1  ;;  %v2459_v18 = vpack.c.bf16 %v2411_v31, %v2411_v31  ;;  %v9152_v1 = vld [vmem:[#allocation93_spill] sm:$0xff] }
 0x3d5   : > { %v2182_v6 = vmax.f32 %v1944_v55, %v9144_v20  ;;  %v2419_v2 = vpack.c.bf16 %v2371_v19, %v2371_v19  ;;  %v9153_v37 = vmax.f32 %v9151_v39, %v9152_v1  ;;  %v2168_v24 = vpop.f32.mrf.mxu3  ;;  %v5719_v20 = vld [vmem:[%s8867_s3 + $0x64] sm:$0xf] }
 0x3d6   : > { %v2312_v40 = vmax.f32 %v2261_v49, %v2262_v16  ;;  %v2597_v61 = vunpack.c.l.b16 %v2459_v18  ;;  %v9154_v49 = vld [vmem:[#allocation24_spill] sm:$0xff]  ;;  %v9157_v18 = vld [vmem:[#allocation94_spill] sm:$0xff] }
 0x3d7   : > { %v2272_v29 = vmax.f32 %v9147_v46, %v2182_v6  ;;  %v2507_v22 = vunpack.c.l.b16 %v2419_v2  ;;  %v1671_v8 = vadd.f32 %v9154_v49, %v7275_v34  ;;  %v5318_v6 = vld [vmem:[%s8867_s3 + $0x68] sm:$0xf0]  ;;  %v9163_v1 = vld [vmem:[#allocation106_spill] sm:$0xff] }
 0x3d8   : > { %v2364_v54 = vadd.f32 %v7380_v62, %v2312_v40  ;;  %v5784_v40 = vld [vmem:[%s8867_s3 + $0x264] sm:$0xf0] }
 0x3d9   : > { %v2324_v63 = vadd.f32 %v7380_v62, %v2272_v29  ;;  %v1917_v38 = vpop.f32.mrf.mxu2  ;;  %v5573_v29 = vor.u32 %v5784_v40, %v5572_v36 }
 0x3da   : > { %v1946_v27 = vpop.f32.mrf.mxu0  ;;  %v2412_v51 = vmax.f32 %v2364_v54, 0.0  ;;  %v2167_v30 = vadd.f32 %v2166_v50, %v1917_v38  ;;  %v5321_v50 = vor.u32 %v5719_v20, %v5318_v6  ;;  %v9156_v54 = vld [vmem:[#allocation79_spill] sm:$0xff]  ;;  %v9158_v38 = vld [vmem:[#allocation105_spill] sm:$0xff] }
 0x3db   : > { %v2372_v13 = vmax.f32 %v2324_v63, 0.0  ;;  %v1947_v4 = vadd.f32 %v1946_v27, %v9148_v28  ;;  %v2265_v63 = vmax.f32 %v9156_v54, %v1671_v8  ;;  %3492 = vmatpush.bf16.msra.mxu1 %v5573_v29  ;;  %v9160_v28 = vld [vmem:[#allocation95_spill] sm:$0xff]  ;;  %v9165_v20 = vld [vmem:[#allocation97_spill] sm:$0xff] }
 0x3dc   : > { %v2460_v9 = vpack.c.bf16 %v2412_v51, %v2412_v51  ;;  %v2264_v56 = vmax.f32 %v9149_v47, %v2167_v30  ;;  %3593 = vmatpush.bf16.msra.mxu3 %v5321_v50  ;;  %v9159_v30 = vld [vmem:[#allocation25_spill] sm:$0xff]  ;;  %v9164_v8 = vld [vmem:[#allocation27_spill] sm:$0xff] }
 0x3dd   : > { %v2420_v10 = vpack.c.bf16 %v2372_v13, %v2372_v13  ;;  %v2184_v52 = vmax.f32 %v1947_v4, %v9150_v21  ;;  %v9161_v4 = vmax.f32 %v9159_v30, %v9160_v28  ;;  %v9166_v6 = vmax.f32 %v9164_v8, %v9165_v20 }
 0x3de   : > { %v2598_v42 = vunpack.c.l.b16 %v2460_v9  ;;  %v2313_v33 = vmax.f32 %v2263_v0, %v2264_v56 }
 0x3df   : > { %v2508_v53 = vunpack.c.l.b16 %v2420_v10  ;;  %v2273_v55 = vmax.f32 %v9153_v37, %v2184_v52 }
 0x3e0   : > { %v7465_v60 = vpack.c.b16 %v2598_v42, %v2597_v61  ;;  %v2365_v0 = vadd.f32 %v7380_v62, %v2313_v33 }
 0x3e1   : > { %v7454_v16 = vpack.c.b16 %v2508_v53, %v2507_v22  ;;  %v2325_v34 = vadd.f32 %v7380_v62, %v2273_v55  ;;  %v1919_v31 = vpop.f32.mrf.mxu2  ;;  %v9162_v22 = vld [vmem:[#allocation36_spill] sm:$0xff] }
 0x3e2   : > { %v1948_v19 = vpop.f32.mrf.mxu0  ;;  %v2169_v17 = vadd.f32 %v2168_v24, %v1919_v31  ;;  %v2413_v10 = vmax.f32 %v2365_v0, 0.0 }
 0x3e3   : > { %v1949_v46 = vadd.f32 %v1948_v19, %v9155_v35  ;;  %3105 = vmatmul.bf16.gmra.mxu1 %v7454_v16  ;;  %3201 = vmatmul.bf16.gmra.mxu3 %v7454_v16  ;;  %v2373_v51 = vmax.f32 %v2325_v34, 0.0 }
 0x3e4   : > { %3297 = vmatmul.bf16.vlgmr.msra.gmra.mxu0 %v7454_v16  ;;  %v2266_v2 = vmax.f32 %v9157_v18, %v2169_v17  ;;  %v2461_v33 = vpack.c.bf16 %v2413_v10, %v2413_v10  ;;  %v9167_v17 = vld [vmem:[#allocation37_spill] sm:$0xff]  ;;  %v9170_v18 = vld [vmem:[#allocation99_spill] sm:$0xff]  ;;  %v5717_v10 = vld [vmem:[%s8867_s3 + $0x54] sm:$0xf] }
 0x3e5   : > { %v2186_v27 = vmax.f32 %v1949_v46, %v9158_v38  ;;  %v2421_v21 = vpack.c.bf16 %v2373_v51, %v2373_v51  ;;  %v9168_v46 = vld [vmem:[#allocation107_spill] sm:$0xff] }
 0x3e6   : > { %v2314_v13 = vmax.f32 %v2265_v63, %v2266_v2  ;;  %v2603_v0 = vunpack.c.l.b16 %v2461_v33  ;;  %v9169_v63 = vld [vmem:[#allocation29_spill] sm:$0xff]  ;;  %v5780_v33 = vld [vmem:[%s8867_s3 + $0x244] sm:$0xf0] }
 0x3e7   : > { %v2274_v9 = vmax.f32 %v9161_v4, %v2186_v27  ;;  %v2509_v24 = vunpack.c.l.b16 %v2421_v21  ;;  %v9171_v2 = vmax.f32 %v9169_v63, %v9170_v18  ;;  %v5782_v21 = vld [vmem:[%s8867_s3 + $0x254] sm:$0xf0] }
 0x3e8   : > { %v2366_v56 = vadd.f32 %v7380_v62, %v2314_v13 }
 0x3e9   : > { %v2326_v47 = vadd.f32 %v7380_v62, %v2274_v9 }
 0x3ea   : > { %v1951_v52 = vpop.f32.mrf.mxu0  ;;  %v2414_v53 = vmax.f32 %v2366_v56, 0.0 }
 0x3eb   : > { %v2374_v61 = vmax.f32 %v2326_v47, 0.0  ;;  %v1952_v42 = vadd.f32 %v1951_v52, %v9162_v22  ;;  %v5564_v47 = vld [vmem:[%s8867_s3 + $0x250] sm:$0xf]  ;;  %v5302_v22 = vld [vmem:[%s8867_s3 + $0x48] sm:$0xf0] }
 0x3ec   : > { %v2462_v55 = vpack.c.bf16 %v2414_v53, %v2414_v53  ;;  %v5565_v52 = vor.u32 %v5782_v21, %v5564_v47 }
 0x3ed   : > { %v2422_v39 = vpack.c.bf16 %v2374_v61, %v2374_v61  ;;  %v2188_v37 = vmax.f32 %v1952_v42, %v9163_v1  ;;  %v5715_v61 = vld [vmem:[%s8867_s3 + $0x44] sm:$0xf]  ;;  %v5556_v42 = vld [vmem:[%s8867_s3 + $0x240] sm:$0xf] }
 0x3ee   : > { %v2604_v34 = vunpack.c.l.b16 %v2462_v55  ;;  %3493 = vmatpush.bf16.msra.mxu1 %v5565_v52  ;;  %v5305_v53 = vor.u32 %v5715_v61, %v5302_v22  ;;  %v5711_v61 = vld [vmem:[%s8867_s3 + $0x24] sm:$0xf]  ;;  %v5286_v22 = vld [vmem:[%s8867_s3 + $0x28] sm:$0xf0] }
 0x3ef   : > { %v2510_v49 = vunpack.c.l.b16 %v2422_v39  ;;  %v2275_v36 = vmax.f32 %v9166_v6, %v2188_v37  ;;  %v5557_v39 = vor.u32 %v5780_v33, %v5556_v42  ;;  %v5289_v42 = vor.u32 %v5711_v61, %v5286_v22 }
 0x3f0   : > { %v7491_v19 = vpack.c.b16 %v2604_v34, %v2603_v0  ;;  %v5548_v0 = vld [vmem:[%s8867_s3 + $0x230] sm:$0xf]  ;;  %v5778_v34 = vld [vmem:[%s8867_s3 + $0x234] sm:$0xf0] }
 0x3f1   : > { %v7489_v31 = vpack.c.b16 %v2510_v49, %v2509_v24  ;;  %v2327_v40 = vadd.f32 %v7380_v62, %v2275_v36  ;;  %v5713_v24 = vld [vmem:[%s8867_s3 + $0x34] sm:$0xf]  ;;  %v5294_v49 = vld [vmem:[%s8867_s3 + $0x38] sm:$0xf0] }
 0x3f2   : > { %v1953_v50 = vpop.f32.mrf.mxu0  ;;  %3494 = vmatpush.bf16.msra.mxu1 %v5557_v39  ;;  %v5297_v8 = vor.u32 %v5713_v24, %v5294_v49  ;;  %v5776_v24 = vld [vmem:[%s8867_s3 + $0x224] sm:$0xf0] }
 0x3f3   : > { %v1954_v35 = vadd.f32 %v1953_v50, %v9167_v17  ;;  %3110 = vmatmul.bf16.gmra.mxu1 %v7489_v31  ;;  %3206 = vmatmul.bf16.gmra.mxu3 %v7489_v31  ;;  %v2375_v54 = vmax.f32 %v2327_v40, 0.0  ;;  %v5549_v50 = vor.u32 %v5778_v34, %v5548_v0 }
 0x3f4   : > { %3302 = vmatmul.bf16.gmra.mxu0 %v7489_v31  ;;  %3398 = vmatmul.bf16.vlgmr.msra.gmra.mxu2 %v7489_v31 }
 0x3f5   : > { %v2190_v29 = vmax.f32 %v1954_v35, %v9168_v46  ;;  %v2423_v51 = vpack.c.bf16 %v2375_v54, %v2375_v54 }
 0x3f6   : > { %3495 = vmatpush.bf16.msra.mxu1 %v5549_v50 }
 0x3f7   : > { %v2276_v38 = vmax.f32 %v9171_v2, %v2190_v29  ;;  %v2511_v28 = vunpack.c.l.b16 %v2423_v51 }
 0x3f9   : > { %v2328_v27 = vadd.f32 %v7380_v62, %v2276_v38  ;;  %v5310_v62 = vld [vmem:[%s8867_s3 + $0x58] sm:$0xf0] }
 0x3fa   : > { %v5313_v56 = vor.u32 %v5717_v10, %v5310_v62 }
 0x3fb   : > { %v2376_v13 = vmax.f32 %v2328_v27, 0.0 }
 0x3fc   : > { %3594 = vmatpush.bf16.msra.mxu3 %v5313_v56 }
 0x3fd   : > { %v2424_v30 = vpack.c.bf16 %v2376_v13, %v2376_v13 }
 0x3ff   : > { %v2512_v4 = vunpack.c.l.b16 %v2424_v30 }
 0x400   : > { %3595 = vmatpush.bf16.msra.mxu3 %v5305_v53 }
 0x401   : > { %v7504_v9 = vpack.c.b16 %v2512_v4, %v2511_v28 }
 0x403   : > { %3115 = vmatmul.bf16.gmra.mxu1 %v7504_v9  ;;  %3211 = vmatmul.bf16.gmra.mxu3 %v7504_v9 }
 0x404   : > { %3307 = vmatmul.bf16.gmra.mxu0 %v7504_v9  ;;  %3403 = vmatmul.bf16.gmra.mxu2 %v7504_v9 }
 0x405   : > { %3596 = vmatpush.bf16.msra.mxu3 %v5297_v8 }
 0x409   : > { %3597 = vmatpush.bf16.msra.mxu3 %v5289_v42  ;;  %v5709_v42 = vld [vmem:[%s8867_s3 + $0x14] sm:$0xf] }
 0x413   : > { %3120 = vmatmul.bf16.gmra.mxu1 %v6898_v57  ;;  %3216 = vmatmul.bf16.gmra.mxu3 %v6898_v57 }
 0x414   : > { %3312 = vmatmul.bf16.gmra.mxu0 %v6898_v57  ;;  %3408 = vmatmul.bf16.gmra.mxu2 %v6898_v57 }
 0x423   : > { %3125 = vmatmul.bf16.gmra.mxu1 %v6932_v58  ;;  %3221 = vmatmul.bf16.gmra.mxu3 %v6932_v58 }
 0x424   : > { %3317 = vmatmul.bf16.gmra.mxu0 %v6932_v58  ;;  %3413 = vmatmul.bf16.gmra.mxu2 %v6932_v58 }
 0x433   : > { %3130 = vmatmul.bf16.gmra.mxu1 %v6966_v15  ;;  %3226 = vmatmul.bf16.gmra.mxu3 %v6966_v15 }
 0x434   : > { %3322 = vmatmul.bf16.gmra.mxu0 %v6966_v15  ;;  %3418 = vmatmul.bf16.gmra.mxu2 %v6966_v15 }
 0x440   : > { %v3096_v1 = vpop.f32.mrf.mxu1 }
 0x443   : > { %3135 = vmatmul.bf16.gmra.mxu1 %v7000_v11  ;;  %3231 = vmatmul.bf16.gmra.mxu3 %v7000_v11 }
 0x444   : > { %3327 = vmatmul.bf16.gmra.mxu0 %v7000_v11  ;;  %3423 = vmatmul.bf16.gmra.mxu2 %v7000_v11 }
 0x448   : > { %v3098_v37 = vpop.f32.mrf.mxu1 }
 0x450   : > { %v3101_v55 = vpop.f32.mrf.mxu1 }
 0x453   : > { %3138 = vmatmul.bf16.gmra.mxu1 %v7034_v32  ;;  %3236 = vmatmul.bf16.gmra.mxu3 %v7034_v32 }
 0x454   : > { %3332 = vmatmul.bf16.gmra.mxu0 %v7034_v32  ;;  %3428 = vmatmul.bf16.gmra.mxu2 %v7034_v32 }
 0x456   : > { %v3197_v20 = vpop.f32.mrf.mxu3 }
 0x457   : > { %v3198_v6 = vadd.f32 %v3197_v20, %v3096_v1 }
 0x458   : > { %v3103_v36 = vpop.f32.mrf.mxu1 }
 0x45e   : > { %v3199_v40 = vpop.f32.mrf.mxu3 }
 0x45f   : > { %v3200_v17 = vadd.f32 %v3199_v40, %v3098_v37 }
 0x460   : > { %v3106_v35 = vpop.f32.mrf.mxu1 }
 0x461   : > { %v3298_v46 = vpop.f32.mrf.mxu0 }
 0x462   : > { %v3299_v29 = vadd.f32 %v3298_v46, %v3198_v6 }
 0x463   : > { %3141 = vmatmul.bf16.gmra.mxu1 %v7082_v44  ;;  %3239 = vmatmul.bf16.gmra.mxu3 %v7082_v44 }
 0x464   : > { %3337 = vmatmul.bf16.gmra.mxu0 %v7082_v44  ;;  %3433 = vmatmul.bf16.gmra.mxu2 %v7082_v44 }
 0x466   : > { %v3202_v54 = vpop.f32.mrf.mxu3 }
 0x467   : > { %v3203_v63 = vadd.f32 %v3202_v54, %v3101_v55  ;;  %v5540_v55 = vld [vmem:[%s8867_s3 + $0x220] sm:$0xf] }
 0x468   : > { %v3108_v18 = vpop.f32.mrf.mxu1  ;;  %v5541_v8 = vor.u32 %v5776_v24, %v5540_v55 }
 0x469   : > { %v3300_v2 = vpop.f32.mrf.mxu0 }
 0x46a   : > { %v3301_v38 = vadd.f32 %v3300_v2, %v3200_v17  ;;  %3496 = vmatpush.bf16.msra.mxu1 %v5541_v8  ;;  %v5532_v8 = vld [vmem:[%s8867_s3 + $0x210] sm:$0xf] }
 0x46e   : > { %v3204_v27 = vpop.f32.mrf.mxu3 }
 0x46f   : > { %v3205_v51 = vadd.f32 %v3204_v27, %v3103_v36 }
 0x470   : > { %v3111_v13 = vpop.f32.mrf.mxu1 }
 0x471   : > { %v3303_v30 = vpop.f32.mrf.mxu0 }
 0x472   : > { %v3304_v28 = vadd.f32 %v3303_v30, %v3203_v63 }
 0x473   : > { %3144 = vmatmul.bf16.gmra.mxu1 %v7107_v23  ;;  %3242 = vmatmul.bf16.gmra.mxu3 %v7107_v23 }
 0x474   : > { %3340 = vmatmul.bf16.gmra.mxu0 %v7107_v23  ;;  %3438 = vmatmul.bf16.gmra.mxu2 %v7107_v23 }
 0x476   : > { %v3207_v4 = vpop.f32.mrf.mxu3 }
 0x477   : > { %v3208_v10 = vadd.f32 %v3207_v4, %v3106_v35  ;;  %v3399_v62 = vpop.f32.mrf.mxu2 }
 0x478   : > { %v7574_v47 = vadd.f32 %v3399_v62, %v3299_v29  ;;  %v3113_v56 = vpop.f32.mrf.mxu1 }
 0x479   : > { %v3305_v21 = vpop.f32.mrf.mxu0 }
 0x47a   : > { %v3306_v52 = vadd.f32 %v3305_v21, %v3205_v51 }
 0x47e   : > { %v3209_v53 = vpop.f32.mrf.mxu3 }
 0x47f   : > { %v3210_v33 = vadd.f32 %v3209_v53, %v3108_v18  ;;  %v3401_v39 = vpop.f32.mrf.mxu2  ;;  %v5278_v53 = vld [vmem:[%s8867_s3 + $0x18] sm:$0xf0] }
 0x480   : > { %v7582_v1 = vadd.f32 %v3401_v39, %v3301_v38  ;;  %v3116_v37 = vpop.f32.mrf.mxu1 }
 0x481   : > { %v3308_v49 = vpop.f32.mrf.mxu0 }
 0x482   : > { %v3309_v20 = vadd.f32 %v3308_v49, %v3208_v10 }
 0x483   : > { %3147 = vmatmul.bf16.gmra.mxu1 %v7133_v59  ;;  %3245 = vmatmul.bf16.gmra.mxu3 %v7133_v59 }
 0x484   : > { %3343 = vmatmul.bf16.gmra.mxu0 %v7133_v59  ;;  %3441 = vmatmul.bf16.gmra.mxu2 %v7133_v59 }
 0x486   : > { %v3212_v6 = vpop.f32.mrf.mxu3 }
 0x487   : > { %v3213_v36 = vadd.f32 %v3212_v6, %v3111_v13  ;;  %v3404_v0 = vpop.f32.mrf.mxu2 }
 0x488   : > { %v7594_v34 = vadd.f32 %v3404_v0, %v3304_v28  ;;  %v3118_v50 = vpop.f32.mrf.mxu1 }
 0x489   : > { %v3310_v40 = vpop.f32.mrf.mxu0 }
 0x48a   : > { %v3311_v17 = vadd.f32 %v3310_v40, %v3210_v33  ;;  %v5281_v33 = vor.u32 %v5709_v42, %v5278_v53 }
 0x48c   : > { %3598 = vmatpush.bf16.msra.mxu3 %v5281_v33 }
 0x48e   : > { %v3214_v35 = vpop.f32.mrf.mxu3 }
 0x48f   : > { %v3215_v46 = vadd.f32 %v3214_v35, %v3113_v56  ;;  %v3406_v29 = vpop.f32.mrf.mxu2 }
 0x490   : > { %v7596_v54 = vadd.f32 %v3406_v29, %v3306_v52  ;;  %v3121_v63 = vpop.f32.mrf.mxu1 }
 0x491   : > { %v3313_v18 = vpop.f32.mrf.mxu0 }
 0x492   : > { %v3314_v2 = vadd.f32 %v3313_v18, %v3213_v36 }
 0x493   : > { %3152 = vmatmul.bf16.gmra.mxu1 %v7154_v3  ;;  %3248 = vmatmul.bf16.gmra.mxu3 %v7154_v3 }
 0x494   : > { %3346 = vmatmul.bf16.gmra.mxu0 %v7154_v3  ;;  %3444 = vmatmul.bf16.gmra.mxu2 %v7154_v3 }
 0x496   : > { %v3217_v38 = vpop.f32.mrf.mxu3 }
 0x497   : > { %v3218_v27 = vadd.f32 %v3217_v38, %v3116_v37  ;;  %v3409_v51 = vpop.f32.mrf.mxu2 }
 0x498   : > { %v7602_v13 = vadd.f32 %v3409_v51, %v3309_v20  ;;  %v3123_v30 = vpop.f32.mrf.mxu1  ;;  %v5774_v20 = vld [vmem:[%s8867_s3 + $0x214] sm:$0xf0] }
 0x499   : > { %v3315_v28 = vpop.f32.mrf.mxu0  ;;  %v5533_v36 = vor.u32 %v5774_v20, %v5532_v8  ;;  %v5270_v8 = vld [vmem:[%s8867_s3 + $0x8] sm:$0xf0] }
 0x49a   : > { %v3316_v4 = vadd.f32 %v3315_v28, %v3215_v46 }
 0x49b   : > { %3497 = vmatpush.bf16.msra.mxu1 %v5533_v36 }
 0x49e   : > { %v3219_v10 = vpop.f32.mrf.mxu3 }
 0x49f   : > { %v3220_v62 = vadd.f32 %v3219_v10, %v3118_v50  ;;  %v3411_v56 = vpop.f32.mrf.mxu2 }
 0x4a0   : > { %v7604_v21 = vadd.f32 %v3411_v56, %v3311_v17  ;;  %v3126_v52 = vpop.f32.mrf.mxu1 }
 0x4a1   : > { %v3318_v61 = vpop.f32.mrf.mxu0 }
 0x4a2   : > { %v3319_v22 = vadd.f32 %v3318_v61, %v3218_v27 }
 0x4a3   : > { %3157 = vmatmul.bf16.gmra.mxu1 %v7176_v5  ;;  %3253 = vmatmul.bf16.gmra.mxu3 %v7176_v5 }
 0x4a4   : > { %3349 = vmatmul.bf16.gmra.mxu0 %v7176_v5  ;;  %3447 = vmatmul.bf16.gmra.mxu2 %v7176_v5 }
 0x4a6   : > { %v3222_v39 = vpop.f32.mrf.mxu3 }
 0x4a7   : > { %v3223_v37 = vadd.f32 %v3222_v39, %v3121_v63  ;;  %v3414_v55 = vpop.f32.mrf.mxu2 }
 0x4a8   : > { %v7616_v24 = vadd.f32 %v3414_v55, %v3314_v2  ;;  %v3128_v49 = vpop.f32.mrf.mxu1 }
 0x4a9   : > { %v3320_v6 = vpop.f32.mrf.mxu0 }
 0x4aa   : > { %v3321_v0 = vadd.f32 %v3320_v6, %v3220_v62 }
 0x4ae   : > { %v3224_v50 = vpop.f32.mrf.mxu3 }
 0x4af   : > { %v3225_v40 = vadd.f32 %v3224_v50, %v3123_v30  ;;  %v3416_v17 = vpop.f32.mrf.mxu2 }
 0x4b0   : > { %v7624_v35 = vadd.f32 %v3416_v17, %v3316_v4  ;;  %v3131_v46 = vpop.f32.mrf.mxu1 }
 0x4b1   : > { %v3323_v29 = vpop.f32.mrf.mxu0 }
 0x4b2   : > { %v3324_v63 = vadd.f32 %v3323_v29, %v3223_v37  ;;  %v5772_v29 = vld [vmem:[%s8867_s3 + $0x204] sm:$0xf0] }
 0x4b3   : > { %3162 = vmatmul.bf16.gmra.mxu1 %v7203_v7  ;;  %3258 = vmatmul.bf16.gmra.mxu3 %v7203_v7 }
 0x4b4   : > { %3354 = vmatmul.bf16.gmra.mxu0 %v7203_v7  ;;  %3450 = vmatmul.bf16.gmra.mxu2 %v7203_v7 }
 0x4b6   : > { %v3227_v18 = vpop.f32.mrf.mxu3 }
 0x4b7   : > { %v3228_v2 = vadd.f32 %v3227_v18, %v3126_v52  ;;  %v3419_v38 = vpop.f32.mrf.mxu2 }
 0x4b8   : > { %v7630_v27 = vadd.f32 %v3419_v38, %v3319_v22  ;;  %v3133_v51 = vpop.f32.mrf.mxu1 }
 0x4b9   : > { %v3325_v30 = vpop.f32.mrf.mxu0 }
 0x4ba   : > { %v3326_v28 = vadd.f32 %v3325_v30, %v3225_v40 }
 0x4be   : > { %v3229_v4 = vpop.f32.mrf.mxu3 }
 0x4bf   : > { %v3230_v10 = vadd.f32 %v3229_v4, %v3128_v49  ;;  %v3421_v62 = vpop.f32.mrf.mxu2  ;;  %v5707_v49 = vld [vmem:[%s8867_s3 + $0x4] sm:$0xf] }
 0x4c0   : > { %v7632_v56 = vadd.f32 %v3421_v62, %v3321_v0  ;;  %v3136_v61 = vpop.f32.mrf.mxu1  ;;  %v5273_v6 = vor.u32 %v5707_v49, %v5270_v8  ;;  %v5735_v8 = vld [vmem:[%s8867_s3 + $0xe4] sm:$0xf] }
 0x4c1   : > { %v3328_v42 = vpop.f32.mrf.mxu0 }
 0x4c2   : > { %v3329_v53 = vadd.f32 %v3328_v42, %v3228_v2  ;;  %3599 = vmatpush.bf16.msra.mxu3 %v5273_v6 }
 0x4c3   : > { %3167 = vmatmul.bf16.gmra.mxu1 %v7236_v41  ;;  %3263 = vmatmul.bf16.gmra.mxu3 %v7236_v41 }
 0x4c4   : > { %3359 = vmatmul.bf16.gmra.mxu0 %v7236_v41  ;;  %3455 = vmatmul.bf16.gmra.mxu2 %v7236_v41 }
 0x4c6   : > { %v3232_v52 = vpop.f32.mrf.mxu3 }
 0x4c7   : > { %v3233_v22 = vadd.f32 %v3232_v52, %v3131_v46  ;;  %v3424_v33 = vpop.f32.mrf.mxu2  ;;  %v5524_v46 = vld [vmem:[%s8867_s3 + $0x200] sm:$0xf] }
 0x4c8   : > { %v7638_v39 = vadd.f32 %v3424_v33, %v3324_v63  ;;  %v3137_v37 = vpop.f32.mrf.mxu1  ;;  %v5525_v18 = vor.u32 %v5772_v29, %v5524_v46  ;;  %v5737_v33 = vld [vmem:[%s8867_s3 + $0xf4] sm:$0xf]  ;;  %v5374_v46 = vld [vmem:[%s8867_s3 + $0xd8] sm:$0xf0] }
 0x4c9   : > { %v3330_v55 = vpop.f32.mrf.mxu0 }
 0x4ca   : > { %v3331_v20 = vadd.f32 %v3330_v55, %v3230_v10  ;;  %3498 = vmatpush.bf16.msra.mxu1 %v5525_v18 }
 0x4ce   : > { %v3234_v36 = vpop.f32.mrf.mxu3 }
 0x4cf   : > { %v3235_v0 = vadd.f32 %v3234_v36, %v3133_v51  ;;  %v3426_v50 = vpop.f32.mrf.mxu2 }
 0x4d0   : > { %v7646_v40 = vadd.f32 %v3426_v50, %v3326_v28  ;;  %v3139_v17 = vpop.f32.mrf.mxu1 }
 0x4d1   : > { %v3333_v63 = vpop.f32.mrf.mxu0  ;;  %v5733_v17 = vld [vmem:[%s8867_s3 + $0xd4] sm:$0xf] }
 0x4d2   : > { %v3334_v2 = vadd.f32 %v3333_v63, %v3233_v22  ;;  %v5377_v29 = vor.u32 %v5733_v17, %v5374_v46 }
 0x4d3   : > { %3172 = vmatmul.bf16.gmra.mxu1 %v7254_v12  ;;  %3268 = vmatmul.bf16.gmra.mxu3 %v7254_v12 }
 0x4d4   : > { %3364 = vmatmul.bf16.gmra.mxu0 %v7254_v12  ;;  %3460 = vmatmul.bf16.gmra.mxu2 %v7254_v12 }
 0x4d6   : > { %v3237_v38 = vpop.f32.mrf.mxu3 }
 0x4d7   : > { %v3429_v51 = vpop.f32.mrf.mxu2  ;;  %v5454_v38 = vld [vmem:[%s8867_s3 + $0x178] sm:$0xf0] }
 0x4d8   : > { %v7658_v30 = vadd.f32 %v3429_v51, %v3329_v53  ;;  %v3140_v28 = vpop.f32.mrf.mxu1  ;;  %v5390_v53 = vld [vmem:[%s8867_s3 + $0xf8] sm:$0xf0]  ;;  %v5731_v51 = vld [vmem:[%s8867_s3 + $0xc4] sm:$0xf] }
 0x4d9   : > { %v3335_v4 = vpop.f32.mrf.mxu0  ;;  %v5393_v37 = vor.u32 %v5737_v33, %v5390_v53  ;;  %v5729_v33 = vld [vmem:[%s8867_s3 + $0xb4] sm:$0xf] }
 0x4da   : > { %v3336_v10 = vadd.f32 %v3335_v4, %v3235_v0  ;;  %v5785_v53 = vld [vmem:[%s8867_s3 + $0x274] sm:$0xf] }
 0x4db   : > { %3693 = vmatpush.bf16.msrb.mxu0 %v5393_v37  ;;  %v5582_v37 = vld [vmem:[%s8867_s3 + $0x278] sm:$0xf0] }
 0x4de   : > { %v3238_v62 = vpop.f32.mrf.mxu3 }
 0x4df   : > { %v3431_v61 = vpop.f32.mrf.mxu2 }
 0x4e0   : > { %v7660_v42 = vadd.f32 %v3431_v61, %v3331_v20  ;;  %v3142_v52 = vpop.f32.mrf.mxu1  ;;  %v5382_v20 = vld [vmem:[%s8867_s3 + $0xe8] sm:$0xf0] }
 0x4e1   : > { %v3338_v22 = vpop.f32.mrf.mxu0  ;;  %v5385_v0 = vor.u32 %v5735_v8, %v5382_v20  ;;  %v5366_v61 = vld [vmem:[%s8867_s3 + $0xc8] sm:$0xf0] }
 0x4e2   : > { %v5369_v22 = vor.u32 %v5731_v51, %v5366_v61  ;;  %v5342_v61 = vld [vmem:[%s8867_s3 + $0x98] sm:$0xf0] }
 0x4e3   : > { %3177 = vmatmul.bf16.gmra.mxu1 %v7273_v43  ;;  %3273 = vmatmul.bf16.gmra.mxu3 %v7273_v43 }
 0x4e4   : > { %3369 = vmatmul.bf16.gmra.mxu0 %v7273_v43  ;;  %3465 = vmatmul.bf16.gmra.mxu2 %v7273_v43 }
 0x4e5   : > { %3694 = vmatpush.bf16.msrb.mxu0 %v5385_v0  ;;  %v5518_v0 = vld [vmem:[%s8867_s3 + $0x1f8] sm:$0xf0] }
 0x4e6   : > { %v3240_v55 = vpop.f32.mrf.mxu3 }
 0x4e7   : > { %v3434_v49 = vpop.f32.mrf.mxu2  ;;  %v5585_v55 = vor.u32 %v5785_v53, %v5582_v37  ;;  %v5723_v37 = vld [vmem:[%s8867_s3 + $0x84] sm:$0xf] }
 0x4e8   : > { %v7678_v6 = vadd.f32 %v3434_v49, %v3334_v2  ;;  %v3143_v36 = vpop.f32.mrf.mxu1  ;;  %v5753_v2 = vld [vmem:[%s8867_s3 + $0x174] sm:$0xf] }
 0x4e9   : > { %v3339_v50 = vpop.f32.mrf.mxu0  ;;  %3695 = vmatpush.bf16.msrb.mxu0 %v5377_v29  ;;  %v5457_v62 = vor.u32 %v5753_v2, %v5454_v38  ;;  %3996 = vmatpush.bf16.msrb.mxu3 %v5585_v55  ;;  %v5769_v36 = vld [vmem:[%s8867_s3 + $0x1f4] sm:$0xf]  ;;  %v5350_v29 = vld [vmem:[%s8867_s3 + $0xa8] sm:$0xf0] }
 0x4ea   : > { %v5727_v50 = vld [vmem:[%s8867_s3 + $0xa4] sm:$0xf]  ;;  %v5521_v46 = vor.u32 %v5769_v36, %v5518_v0  ;;  %v5334_v55 = vld [vmem:[%s8867_s3 + $0x88] sm:$0xf0] }
 0x4eb   : > { %3794 = vmatpush.bf16.msrb.mxu2 %v5457_v62  ;;  %v5353_v38 = vor.u32 %v5727_v50, %v5350_v29  ;;  %v5725_v62 = vld [vmem:[%s8867_s3 + $0x94] sm:$0xf]  ;;  %v5337_v0 = vor.u32 %v5723_v37, %v5334_v55  ;;  %v5398_v37 = vld [vmem:[%s8867_s3 + $0x108] sm:$0xf0] }
 0x4ec   : > { %3895 = vmatpush.bf16.msrb.mxu1 %v5521_v46  ;;  %v5422_v46 = vld [vmem:[%s8867_s3 + $0x138] sm:$0xf0] }
 0x4ed   : > { %3696 = vmatpush.bf16.msrb.mxu0 %v5369_v22 }
 0x4ee   : > { %v3241_v63 = vpop.f32.mrf.mxu3 }
 0x4ef   : > { %v3436_v18 = vpop.f32.mrf.mxu2  ;;  %v5751_v63 = vld [vmem:[%s8867_s3 + $0x164] sm:$0xf] }
 0x4f0   : > { %v7695_v28 = vadd.f32 %v3436_v18, %v3336_v10  ;;  %v3145_v4 = vpop.f32.mrf.mxu1  ;;  %v5358_v10 = vld [vmem:[%s8867_s3 + $0xb8] sm:$0xf0]  ;;  %v5446_v18 = vld [vmem:[%s8867_s3 + $0x168] sm:$0xf0] }
 0x4f1   : > { %v3341_v52 = vpop.f32.mrf.mxu0  ;;  %v5361_v49 = vor.u32 %v5729_v33, %v5358_v10  ;;  %v5449_v51 = vor.u32 %v5751_v63, %v5446_v18  ;;  %v5749_v4 = vld [vmem:[%s8867_s3 + $0x154] sm:$0xf]  ;;  %v5345_v33 = vor.u32 %v5725_v62, %v5342_v61 }
 0x4f2   : > { %v5438_v52 = vld [vmem:[%s8867_s3 + $0x158] sm:$0xf0]  ;;  %v5741_v61 = vld [vmem:[%s8867_s3 + $0x114] sm:$0xf] }
 0x4f3   : > { %3182 = vmatmul.bf16.gmra.mxu1 %v7316_v26  ;;  %3278 = vmatmul.bf16.gmra.mxu3 %v7316_v26  ;;  %v5441_v22 = vor.u32 %v5749_v4, %v5438_v52  ;;  %v5406_v52 = vld [vmem:[%s8867_s3 + $0x118] sm:$0xf0] }
 0x4f4   : > { %3374 = vmatmul.bf16.gmra.mxu0 %v7316_v26  ;;  %3470 = vmatmul.bf16.gmra.mxu2 %v7316_v26 }
 0x4f5   : > { %3697 = vmatpush.bf16.msrb.mxu0 %v5361_v49  ;;  %3795 = vmatpush.bf16.msrb.mxu2 %v5449_v51  ;;  %v5747_v49 = vld [vmem:[%s8867_s3 + $0x144] sm:$0xf] }
 0x4f6   : > { %v3243_v8 = vpop.f32.mrf.mxu3 }
 0x4f7   : > { %v3439_v20 = vpop.f32.mrf.mxu2 }
 0x4f8   : > { %v3146_v17 = vpop.f32.mrf.mxu1  ;;  %v5430_v20 = vld [vmem:[%s8867_s3 + $0x148] sm:$0xf0] }
 0x4f9   : > { %v3342_v2 = vpop.f32.mrf.mxu0  ;;  %3698 = vmatpush.bf16.msrb.mxu0 %v5353_v38  ;;  %3796 = vmatpush.bf16.msrb.mxu2 %v5441_v22  ;;  %v5433_v50 = vor.u32 %v5747_v49, %v5430_v20  ;;  %v5745_v17 = vld [vmem:[%s8867_s3 + $0x134] sm:$0xf]  ;;  %v5414_v38 = vld [vmem:[%s8867_s3 + $0x128] sm:$0xf0]  ;;  %v5409_v22 = vor.u32 %v5741_v61, %v5406_v52 }
 0x4fa   : > { %v5425_v29 = vor.u32 %v5745_v17, %v5422_v46  ;;  %v5743_v2 = vld [vmem:[%s8867_s3 + $0x124] sm:$0xf] }
 0x4fb   : > { %v5417_v62 = vor.u32 %v5743_v2, %v5414_v38 }
 0x4fd   : > { %3699 = vmatpush.bf16.msrb.mxu0 %v5345_v33  ;;  %3797 = vmatpush.bf16.msrb.mxu2 %v5433_v50 }
 0x4fe   : > { %v3244_v10 = vpop.f32.mrf.mxu3 }
 0x4ff   : > { %v3440_v53 = vpop.f32.mrf.mxu2 }
 0x500   : > { %v3148_v8 = vpop.f32.mrf.mxu1  ;;  %v5739_v53 = vld [vmem:[%s8867_s3 + $0x104] sm:$0xf] }
 0x501   : > { %v3344_v36 = vpop.f32.mrf.mxu0  ;;  %3700 = vmatpush.bf16.msrb.mxu0 %v5337_v0  ;;  %3798 = vmatpush.bf16.msrb.mxu2 %v5425_v29  ;;  %v5401_v20 = vor.u32 %v5739_v53, %v5398_v37  ;;  %v5783_v29 = vld [vmem:[%s8867_s3 + $0x264] sm:$0xf] }
 0x503   : > { %3283 = vmatmul.bf16.gmra.mxu3 %v7364_v48  ;;  %3499 = vmatmul.bf16.vlgmr.msra.gmra.mxu1 %v7504_v9 }
 0x504   : > { %3379 = vmatmul.bf16.gmra.mxu0 %v7364_v48  ;;  %3475 = vmatmul.bf16.gmra.mxu2 %v7364_v48 }
 0x505   : > { %3799 = vmatpush.bf16.msrb.mxu2 %v5417_v62  ;;  %v5510_v62 = vld [vmem:[%s8867_s3 + $0x1e8] sm:$0xf0] }
 0x506   : > { %v3246_v63 = vpop.f32.mrf.mxu3 }
 0x507   : > { %v3442_v18 = vpop.f32.mrf.mxu2  ;;  %v5574_v63 = vld [vmem:[%s8867_s3 + $0x268] sm:$0xf0] }
 0x508   : > { %v3150_v51 = vpop.f32.mrf.mxu1  ;;  %v5577_v18 = vor.u32 %v5783_v29, %v5574_v63 }
 0x509   : > { %v3345_v4 = vpop.f32.mrf.mxu0  ;;  %3800 = vmatpush.bf16.msrb.mxu2 %v5409_v22 }
 0x50a   : > { %3997 = vmatpush.bf16.msrb.mxu3 %v5577_v18 }
 0x50d   : > { %3801 = vmatpush.bf16.msrb.mxu2 %v5401_v20 }
 0x50e   : > { %v3247_v33 = vpop.f32.mrf.mxu3 }
 0x50f   : > { %v3443_v10 = vpop.f32.mrf.mxu2 }
 0x510   : > { %v3153_v55 = vpop.f32.mrf.mxu1 }
 0x511   : > { %v3347_v49 = vpop.f32.mrf.mxu0 }
 0x513   : > { %3504 = vmatmul.bf16.gmra.mxu1 %v6898_v57  ;;  %3600 = vmatmul.bf16.vlgmr.msra.gmra.mxu3 %v7366_v14 }
 0x514   : > { %3384 = vmatmul.bf16.gmra.mxu0 %v7426_v25  ;;  %3480 = vmatmul.bf16.gmra.mxu2 %v7426_v25 }
 0x516   : > { %v3249_v36 = vpop.f32.mrf.mxu3 }
 0x517   : > { %v3250_v0 = vadd.f32 %v3249_v36, %v3148_v8  ;;  %v3445_v50 = vpop.f32.mrf.mxu2  ;;  %v5767_v8 = vld [vmem:[%s8867_s3 + $0x1e4] sm:$0xf] }
 0x518   : > { %v3155_v17 = vpop.f32.mrf.mxu1  ;;  %v5513_v52 = vor.u32 %v5767_v8, %v5510_v62 }
 0x519   : > { %v3348_v46 = vpop.f32.mrf.mxu0 }
 0x51a   : > { %3896 = vmatpush.bf16.msrb.mxu1 %v5513_v52 }
 0x51e   : > { %v3251_v14 = vpop.f32.mrf.mxu3 }
 0x51f   : > { %v3252_v2 = vadd.f32 %v3251_v14, %v3150_v51  ;;  %v3446_v38 = vpop.f32.mrf.mxu2 }
 0x520   : > { %v3158_v4 = vpop.f32.mrf.mxu1 }
 0x521   : > { %v3350_v61 = vpop.f32.mrf.mxu0 }
 0x522   : > { %v3351_v22 = vadd.f32 %v3350_v61, %v3250_v0 }
 0x523   : > { %3509 = vmatmul.bf16.gmra.mxu1 %v6932_v58  ;;  %3605 = vmatmul.bf16.gmra.mxu3 %v7428_v45 }
 0x524   : > { %3485 = vmatmul.bf16.gmra.mxu2 %v7465_v60  ;;  %3701 = vmatmul.bf16.vlgmr.msrb.gmra.mxu0 %v7428_v45 }
 0x526   : > { %v3254_v51 = vpop.f32.mrf.mxu3 }
 0x527   : > { %v3255_v33 = vadd.f32 %v3254_v51, %v3153_v55  ;;  %v3448_v10 = vpop.f32.mrf.mxu2 }
 0x528   : > { %v3160_v53 = vpop.f32.mrf.mxu1 }
 0x529   : > { %v3352_v37 = vpop.f32.mrf.mxu0 }
 0x52a   : > { %v3353_v49 = vadd.f32 %v3352_v37, %v3252_v2 }
 0x52e   : > { %v3256_v20 = vpop.f32.mrf.mxu3 }
 0x52f   : > { %v3257_v36 = vadd.f32 %v3256_v20, %v3155_v17  ;;  %v3449_v50 = vpop.f32.mrf.mxu2 }
 0x530   : > { %v3163_v46 = vpop.f32.mrf.mxu1  ;;  %v5502_v50 = vld [vmem:[%s8867_s3 + $0x1d8] sm:$0xf0] }
 0x531   : > { %v3355_v0 = vpop.f32.mrf.mxu0 }
 0x532   : > { %v3356_v29 = vadd.f32 %v3355_v0, %v3255_v33 }
 0x533   : > { %3514 = vmatmul.bf16.gmra.mxu1 %v6966_v15  ;;  %3610 = vmatmul.bf16.gmra.mxu3 %v7454_v16 }
 0x534   : > { %3706 = vmatmul.bf16.gmra.mxu0 %v7454_v16  ;;  %3802 = vmatmul.bf16.vlgmr.msrb.gmra.mxu2 %v7454_v16  ;;  %v5781_v16 = vld [vmem:[%s8867_s3 + $0x254] sm:$0xf] }
 0x536   : > { %v3259_v45 = vpop.f32.mrf.mxu3 }
 0x537   : > { %v3260_v55 = vadd.f32 %v3259_v45, %v3158_v4  ;;  %v3451_v63 = vpop.f32.mrf.mxu2  ;;  %v5566_v4 = vld [vmem:[%s8867_s3 + $0x258] sm:$0xf0] }
 0x538   : > { %v7810_v18 = vadd.f32 %v3451_v63, %v3351_v22  ;;  %v3165_v14 = vpop.f32.mrf.mxu1  ;;  %v5569_v22 = vor.u32 %v5781_v16, %v5566_v4 }
 0x539   : > { %v3357_v2 = vpop.f32.mrf.mxu0 }
 0x53a   : > { %v3358_v17 = vadd.f32 %v3357_v2, %v3257_v36  ;;  %3998 = vmatpush.bf16.msrb.mxu3 %v5569_v22  ;;  %v5765_v36 = vld [vmem:[%s8867_s3 + $0x1d4] sm:$0xf] }
 0x53b   : > { %v5505_v45 = vor.u32 %v5765_v36, %v5502_v50 }
 0x53d   : > { %3897 = vmatpush.bf16.msrb.mxu1 %v5505_v45 }
 0x53e   : > { %v3261_v38 = vpop.f32.mrf.mxu3 }
 0x53f   : > { %v3262_v8 = vadd.f32 %v3261_v38, %v3160_v53  ;;  %v3453_v62 = vpop.f32.mrf.mxu2 }
 0x540   : > { %v7812_v61 = vadd.f32 %v3453_v62, %v3353_v49  ;;  %v3168_v52 = vpop.f32.mrf.mxu1 }
 0x541   : > { %v3360_v51 = vpop.f32.mrf.mxu0 }
 0x542   : > { %v3361_v33 = vadd.f32 %v3360_v51, %v3260_v55 }
 0x543   : > { %3519 = vmatmul.bf16.gmra.mxu1 %v7000_v11  ;;  %3615 = vmatmul.bf16.gmra.mxu3 %v7489_v31 }
 0x544   : > { %3711 = vmatmul.bf16.gmra.mxu0 %v7489_v31  ;;  %3807 = vmatmul.bf16.gmra.mxu2 %v7489_v31 }
 0x546   : > { %v3264_v10 = vpop.f32.mrf.mxu3 }
 0x547   : > { %v3265_v53 = vadd.f32 %v3264_v10, %v3163_v46  ;;  %v3456_v37 = vpop.f32.mrf.mxu2 }
 0x548   : > { %v7824_v49 = vadd.f32 %v3456_v37, %v3356_v29  ;;  %v3170_v20 = vpop.f32.mrf.mxu1 }
 0x549   : > { %v3362_v0 = vpop.f32.mrf.mxu0 }
 0x54a   : > { %v3363_v55 = vadd.f32 %v3362_v0, %v3262_v8 }
 0x54e   : > { %v3266_v63 = vpop.f32.mrf.mxu3 }
 0x54f   : > { %v3267_v2 = vadd.f32 %v3266_v63, %v3165_v14  ;;  %v3458_v46 = vpop.f32.mrf.mxu2 }
 0x550   : > { %v7832_v38 = vadd.f32 %v3458_v46, %v3358_v17  ;;  %v3173_v29 = vpop.f32.mrf.mxu1 }
 0x551   : > { %v3365_v62 = vpop.f32.mrf.mxu0 }
 0x552   : > { %v3366_v51 = vadd.f32 %v3365_v62, %v3265_v53 }
 0x553   : > { %3524 = vmatmul.bf16.gmra.mxu1 %v7034_v32  ;;  %3620 = vmatmul.bf16.gmra.mxu3 %v7504_v9 }
 0x554   : > { %3716 = vmatmul.bf16.gmra.mxu0 %v7504_v9  ;;  %3812 = vmatmul.bf16.gmra.mxu2 %v7504_v9 }
 0x556   : > { %v3269_v16 = vpop.f32.mrf.mxu3 }
 0x557   : > { %v3270_v4 = vadd.f32 %v3269_v16, %v3168_v52  ;;  %v3461_v8 = vpop.f32.mrf.mxu2  ;;  %v5779_v16 = vld [vmem:[%s8867_s3 + $0x244] sm:$0xf] }
 0x558   : > { %v7838_v22 = vadd.f32 %v3461_v8, %v3361_v33  ;;  %v3175_v14 = vpop.f32.mrf.mxu1 }
 0x559   : > { %v3367_v10 = vpop.f32.mrf.mxu0 }
 0x55a   : > { %v3368_v17 = vadd.f32 %v3367_v10, %v3267_v2 }
 0x55e   : > { %v3271_v37 = vpop.f32.mrf.mxu3 }
 0x55f   : > { %v3272_v36 = vadd.f32 %v3271_v37, %v3170_v20  ;;  %v3463_v50 = vpop.f32.mrf.mxu2 }
 0x560   : > { %v7840_v53 = vadd.f32 %v3463_v50, %v3363_v55  ;;  %v3178_v0 = vpop.f32.mrf.mxu1 }
 0x561   : > { %v3370_v45 = vpop.f32.mrf.mxu0 }
 0x562   : > { %9172 = vst [vmem:[#allocation38_spill] sm:$0xff] %v7840_v53  ;;  %v3371_v63 = vadd.f32 %v3370_v45, %v3270_v4  ;;  %v5558_v4 = vld [vmem:[%s8867_s3 + $0x248] sm:$0xf0] }
 0x563   : > { %3529 = vmatmul.bf16.gmra.mxu1 %v7082_v44  ;;  %3625 = vmatmul.bf16.gmra.mxu3 %v6898_v57  ;;  %v5561_v8 = vor.u32 %v5779_v16, %v5558_v4  ;;  %v5494_v45 = vld [vmem:[%s8867_s3 + $0x1c8] sm:$0xf0] }
 0x564   : > { %3721 = vmatmul.bf16.gmra.mxu0 %v6898_v57  ;;  %3817 = vmatmul.bf16.gmra.mxu2 %v6898_v57 }
 0x565   : > { %3999 = vmatpush.bf16.msrb.mxu3 %v5561_v8 }
 0x566   : > { %v3274_v52 = vpop.f32.mrf.mxu3 }
 0x567   : > { %v3275_v33 = vadd.f32 %v3274_v52, %v3173_v29  ;;  %v3466_v46 = vpop.f32.mrf.mxu2 }
 0x568   : > { %v7846_v2 = vadd.f32 %v3466_v46, %v3366_v51  ;;  %v3180_v20 = vpop.f32.mrf.mxu1 }
 0x569   : > { %v3372_v62 = vpop.f32.mrf.mxu0 }
 0x56a   : > { %9173 = vst [vmem:[#allocation39_spill] sm:$0xff] %v7846_v2  ;;  %v3373_v55 = vadd.f32 %v3372_v62, %v3272_v36  ;;  %v5763_v36 = vld [vmem:[%s8867_s3 + $0x1c4] sm:$0xf] }
 0x56b   : > { %v5497_v46 = vor.u32 %v5763_v36, %v5494_v45 }
 0x56d   : > { %3898 = vmatpush.bf16.msrb.mxu1 %v5497_v46 }
 0x56e   : > { %v3276_v10 = vpop.f32.mrf.mxu3 }
 0x56f   : > { %v3277_v37 = vadd.f32 %v3276_v10, %v3175_v14  ;;  %v3468_v50 = vpop.f32.mrf.mxu2 }
 0x570   : > { %v7854_v29 = vadd.f32 %v3468_v50, %v3368_v17  ;;  %v3183_v51 = vpop.f32.mrf.mxu1 }
 0x571   : > { %v3375_v52 = vpop.f32.mrf.mxu0 }
 0x572   : > { %9174 = vst [vmem:[#allocation6_spill] sm:$0xff] %v7854_v29  ;;  %v3376_v62 = vadd.f32 %v3375_v52, %v3275_v33 }
 0x573   : > { %3534 = vmatmul.bf16.gmra.mxu1 %v7107_v23  ;;  %3630 = vmatmul.bf16.gmra.mxu3 %v6932_v58 }
 0x574   : > { %3726 = vmatmul.bf16.gmra.mxu0 %v6932_v58  ;;  %3822 = vmatmul.bf16.gmra.mxu2 %v6932_v58 }
 0x576   : > { %v3279_v14 = vpop.f32.mrf.mxu3 }
 0x577   : > { %v3280_v17 = vadd.f32 %v3279_v14, %v3178_v0  ;;  %v3471_v16 = vpop.f32.mrf.mxu2 }
 0x578   : > { %v7866_v4 = vadd.f32 %v3471_v16, %v3371_v63  ;;  %v3185_v8 = vpop.f32.mrf.mxu1 }
 0x579   : > { %v3377_v10 = vpop.f32.mrf.mxu0 }
 0x57a   : > { %v3378_v50 = vadd.f32 %v3377_v10, %v3277_v37 }
 0x57e   : > { %v3281_v29 = vpop.f32.mrf.mxu3 }
 0x57f   : > { %v3282_v36 = vadd.f32 %v3281_v29, %v3180_v20  ;;  %v3473_v33 = vpop.f32.mrf.mxu2 }
 0x580   : > { %v7868_v45 = vadd.f32 %v3473_v33, %v3373_v55  ;;  %v3500_v52 = vpop.f32.mrf.mxu1 }
 0x581   : > { %v3380_v2 = vpop.f32.mrf.mxu0  ;;  %v7871_v53 = vadd.f32 %v3500_v52, %v7574_v47 }
 0x582   : > { %v3381_v58 = vadd.f32 %v3380_v2, %v3280_v17 }
 0x583   : > { %3539 = vmatmul.bf16.gmra.mxu1 %v7133_v59  ;;  %3635 = vmatmul.bf16.gmra.mxu3 %v6966_v15 }
 0x584   : > { %3731 = vmatmul.bf16.gmra.mxu0 %v6966_v15  ;;  %3827 = vmatmul.bf16.gmra.mxu2 %v6966_v15 }
 0x586   : > { %v3284_v0 = vpop.f32.mrf.mxu3 }
 0x587   : > { %v3285_v63 = vadd.f32 %v3284_v0, %v3183_v51  ;;  %v3476_v20 = vpop.f32.mrf.mxu2 }
 0x588   : > { %v7877_v37 = vadd.f32 %v3476_v20, %v3376_v62  ;;  %v3502_v55 = vpop.f32.mrf.mxu1  ;;  %v5761_v20 = vld [vmem:[%s8867_s3 + $0x1b4] sm:$0xf] }
 0x589   : > { %v3382_v29 = vpop.f32.mrf.mxu0  ;;  %v7880_v46 = vadd.f32 %v3502_v55, %v7582_v1  ;;  %v5777_v1 = vld [vmem:[%s8867_s3 + $0x234] sm:$0xf]  ;;  %v5486_v55 = vld [vmem:[%s8867_s3 + $0x1b8] sm:$0xf0] }
 0x58a   : > { %v3383_v47 = vadd.f32 %v3382_v29, %v3282_v36 }
 0x58e   : > { %v3286_v2 = vpop.f32.mrf.mxu3 }
 0x58f   : > { %v3287_v14 = vadd.f32 %v3286_v2, %v3185_v8  ;;  %v3478_v17 = vpop.f32.mrf.mxu2 }
 0x590   : > { %v7882_v16 = vadd.f32 %v3478_v17, %v3378_v50  ;;  %v3505_v10 = vpop.f32.mrf.mxu1  ;;  %v5489_v17 = vor.u32 %v5761_v20, %v5486_v55 }
 0x591   : > { %v3385_v33 = vpop.f32.mrf.mxu0  ;;  %v7885_v52 = vadd.f32 %v3505_v10, %v7594_v34  ;;  %v5550_v34 = vld [vmem:[%s8867_s3 + $0x238] sm:$0xf0] }
 0x592   : > { %v3386_v51 = vadd.f32 %v3385_v33, %v3285_v63  ;;  %v5553_v8 = vor.u32 %v5777_v1, %v5550_v34  ;;  %3899 = vmatpush.bf16.msrb.mxu1 %v5489_v17 }
 0x593   : > { %9175 = vst [vmem:[#allocation40_spill] sm:$0xff] %v7885_v52  ;;  %3542 = vmatmul.bf16.gmra.mxu1 %v7154_v3  ;;  %3640 = vmatmul.bf16.gmra.mxu3 %v7000_v11 }
 0x594   : > { %3736 = vmatmul.bf16.gmra.mxu0 %v7000_v11  ;;  %3832 = vmatmul.bf16.gmra.mxu2 %v7000_v11 }
 0x595   : > { %4000 = vmatpush.bf16.msrb.mxu3 %v5553_v8 }
 0x596   : > { %v3601_v50 = vpop.f32.mrf.mxu3 }
 0x597   : > { %v3481_v36 = vpop.f32.mrf.mxu2 }
 0x598   : > { %v7899_v0 = vadd.f32 %v3481_v36, %v3381_v58  ;;  %v3507_v63 = vpop.f32.mrf.mxu1 }
 0x599   : > { %v3387_v29 = vpop.f32.mrf.mxu0  ;;  %v7908_v2 = vadd.f32 %v3507_v63, %v7596_v54 }
 0x59a   : > { %v3388_v10 = vadd.f32 %v3387_v29, %v3287_v14 }
 0x59e   : > { %v3603_v58 = vpop.f32.mrf.mxu3 }
 0x59f   : > { %v3483_v1 = vpop.f32.mrf.mxu2 }
 0x5a0   : > { %v7912_v34 = vadd.f32 %v3483_v1, %v3383_v47  ;;  %v3510_v8 = vpop.f32.mrf.mxu1 }
 0x5a1   : > { %v7915_v36 = vadd.f32 %v3510_v8, %v7602_v13  ;;  %v3702_v62 = vpop.f32.mrf.mxu0 }
 0x5a2   : > { %v3703_v52 = vadd.f32 %v3702_v62, %v3601_v50 }
 0x5a3   : > { %9176 = vst [vmem:[#allocation41_spill] sm:$0xff] %v7915_v36  ;;  %3545 = vmatmul.bf16.gmra.mxu1 %v7176_v5  ;;  %3643 = vmatmul.bf16.gmra.mxu3 %v7034_v32 }
 0x5a4   : > { %3741 = vmatmul.bf16.gmra.mxu0 %v7034_v32  ;;  %3837 = vmatmul.bf16.gmra.mxu2 %v7034_v32 }
 0x5a6   : > { %v3606_v54 = vpop.f32.mrf.mxu3 }
 0x5a7   : > { %v3486_v14 = vpop.f32.mrf.mxu2 }
 0x5a8   : > { %v7921_v63 = vadd.f32 %v3486_v14, %v3386_v51  ;;  %v3512_v47 = vpop.f32.mrf.mxu1 }
 0x5a9   : > { %v7924_v20 = vadd.f32 %v3512_v47, %v7604_v21  ;;  %v3704_v13 = vpop.f32.mrf.mxu0 }
 0x5aa   : > { %v3705_v55 = vadd.f32 %v3704_v13, %v3603_v58 }
 0x5ab   : > { %9177 = vst [vmem:[#allocation42_spill] sm:$0xff] %v7924_v20 }
 0x5ae   : > { %v3608_v29 = vpop.f32.mrf.mxu3 }
 0x5af   : > { %v3488_v62 = vpop.f32.mrf.mxu2 }
 0x5b0   : > { %v7926_v50 = vadd.f32 %v3488_v62, %v3388_v10  ;;  %v3515_v17 = vpop.f32.mrf.mxu1  ;;  %v5775_v62 = vld [vmem:[%s8867_s3 + $0x224] sm:$0xf] }
 0x5b1   : > { %v7929_v1 = vadd.f32 %v3515_v17, %v7616_v24  ;;  %v3707_v8 = vpop.f32.mrf.mxu0  ;;  %v5542_v17 = vld [vmem:[%s8867_s3 + $0x228] sm:$0xf0] }
 0x5b2   : > { %v3708_v33 = vadd.f32 %v3707_v8, %v3606_v54  ;;  %v5545_v8 = vor.u32 %v5775_v62, %v5542_v17 }
 0x5b3   : > { %9178 = vst [vmem:[#allocation43_spill] sm:$0xff] %v7929_v1  ;;  %3548 = vmatmul.bf16.gmra.mxu1 %v7203_v7  ;;  %3646 = vmatmul.bf16.gmra.mxu3 %v7082_v44 }
 0x5b4   : > { %3744 = vmatmul.bf16.gmra.mxu0 %v7082_v44  ;;  %3842 = vmatmul.bf16.gmra.mxu2 %v7082_v44 }
 0x5b5   : > { %4001 = vmatpush.bf16.msrb.mxu3 %v5545_v8 }
 0x5b6   : > { %v3611_v21 = vpop.f32.mrf.mxu3 }
 0x5b7   : > { %v3803_v10 = vpop.f32.mrf.mxu2 }
 0x5b8   : > { %v7937_v58 = vadd.f32 %v3803_v10, %v3703_v52  ;;  %v3517_v14 = vpop.f32.mrf.mxu1 }
 0x5b9   : > { %v7940_v24 = vadd.f32 %v3517_v14, %v7624_v35  ;;  %v3709_v54 = vpop.f32.mrf.mxu0  ;;  %v5478_v14 = vld [vmem:[%s8867_s3 + $0x1a8] sm:$0xf0] }
 0x5ba   : > { %v3710_v47 = vadd.f32 %v3709_v54, %v3608_v29  ;;  %v5759_v29 = vld [vmem:[%s8867_s3 + $0x1a4] sm:$0xf] }
 0x5bb   : > { %9179 = vst [vmem:[#allocation44_spill] sm:$0xff] %v7940_v24  ;;  %v5481_v24 = vor.u32 %v5759_v29, %v5478_v14 }
 0x5bd   : > { %3900 = vmatpush.bf16.msrb.mxu1 %v5481_v24 }
 0x5be   : > { %v3613_v52 = vpop.f32.mrf.mxu3 }
 0x5bf   : > { %v3805_v10 = vpop.f32.mrf.mxu2 }
 0x5c0   : > { %v7950_v51 = vadd.f32 %v3805_v10, %v3705_v55  ;;  %v3520_v35 = vpop.f32.mrf.mxu1 }
 0x5c1   : > { %v7959_v54 = vadd.f32 %v3520_v35, %v7630_v27  ;;  %v3712_v13 = vpop.f32.mrf.mxu0 }
 0x5c2   : > { %v3713_v62 = vadd.f32 %v3712_v13, %v3611_v21 }
 0x5c3   : > { %9180 = vst [vmem:[#allocation45_spill] sm:$0xff] %v7959_v54  ;;  %3551 = vmatmul.bf16.gmra.mxu1 %v7236_v41  ;;  %3649 = vmatmul.bf16.gmra.mxu3 %v7107_v23 }
 0x5c4   : > { %3747 = vmatmul.bf16.gmra.mxu0 %v7107_v23  ;;  %3845 = vmatmul.bf16.gmra.mxu2 %v7107_v23 }
 0x5c6   : > { %v3616_v55 = vpop.f32.mrf.mxu3 }
 0x5c7   : > { %v3808_v17 = vpop.f32.mrf.mxu2 }
 0x5c8   : > { %v7965_v8 = vadd.f32 %v3808_v17, %v3708_v33  ;;  %v3522_v10 = vpop.f32.mrf.mxu1 }
 0x5c9   : > { %v7968_v27 = vadd.f32 %v3522_v10, %v7632_v56  ;;  %v3714_v35 = vpop.f32.mrf.mxu0 }
 0x5ca   : > { %v3715_v29 = vadd.f32 %v3714_v35, %v3613_v52 }
 0x5cb   : > { %9181 = vst [vmem:[#allocation46_spill] sm:$0xff] %v7968_v27 }
 0x5ce   : > { %v3618_v21 = vpop.f32.mrf.mxu3 }
 0x5cf   : > { %v3810_v13 = vpop.f32.mrf.mxu2 }
 0x5d0   : > { %v7970_v14 = vadd.f32 %v3810_v13, %v3710_v47  ;;  %v3525_v20 = vpop.f32.mrf.mxu1 }
 0x5d1   : > { %v7973_v1 = vadd.f32 %v3525_v20, %v7638_v39  ;;  %v3717_v36 = vpop.f32.mrf.mxu0 }
 0x5d2   : > { %v3718_v24 = vadd.f32 %v3717_v36, %v3616_v55 }
 0x5d3   : > { %9182 = vst [vmem:[#allocation47_spill] sm:$0xff] %v7973_v1  ;;  %3556 = vmatmul.bf16.gmra.mxu1 %v7254_v12  ;;  %3652 = vmatmul.bf16.gmra.mxu3 %v7133_v59 }
 0x5d4   : > { %3750 = vmatmul.bf16.gmra.mxu0 %v7133_v59  ;;  %3848 = vmatmul.bf16.gmra.mxu2 %v7133_v59 }
 0x5d6   : > { %v3621_v56 = vpop.f32.mrf.mxu3 }
 0x5d7   : > { %v3813_v47 = vpop.f32.mrf.mxu2 }
 0x5d8   : > { %v7981_v52 = vadd.f32 %v3813_v47, %v3713_v62  ;;  %v3527_v17 = vpop.f32.mrf.mxu1  ;;  %v5757_v47 = vld [vmem:[%s8867_s3 + $0x194] sm:$0xf] }
 0x5d9   : > { %v7984_v39 = vadd.f32 %v3527_v17, %v7646_v40  ;;  %v3719_v36 = vpop.f32.mrf.mxu0  ;;  %v5773_v40 = vld [vmem:[%s8867_s3 + $0x214] sm:$0xf]  ;;  %v5470_v17 = vld [vmem:[%s8867_s3 + $0x198] sm:$0xf0] }
 0x5da   : > { %v3720_v20 = vadd.f32 %v3719_v36, %v3618_v21  ;;  %v5473_v55 = vor.u32 %v5757_v47, %v5470_v17 }
 0x5db   : > { %9183 = vst [vmem:[#allocation48_spill] sm:$0xff] %v7984_v39 }
 0x5dc   : > { %3901 = vmatpush.bf16.msrb.mxu1 %v5473_v55 }
 0x5de   : > { %v3623_v10 = vpop.f32.mrf.mxu3 }
 0x5df   : > { %v3815_v35 = vpop.f32.mrf.mxu2 }
 0x5e0   : > { %v7988_v13 = vadd.f32 %v3815_v35, %v3715_v29  ;;  %v3530_v33 = vpop.f32.mrf.mxu1  ;;  %v5534_v29 = vld [vmem:[%s8867_s3 + $0x218] sm:$0xf0] }
 0x5e1   : > { %v7991_v1 = vadd.f32 %v3530_v33, %v7658_v30  ;;  %v3722_v54 = vpop.f32.mrf.mxu0  ;;  %v5537_v30 = vor.u32 %v5773_v40, %v5534_v29 }
 0x5e2   : > { %9184 = vst [vmem:[#allocation49_spill] sm:$0xff] %v7988_v13  ;;  %v3723_v62 = vadd.f32 %v3722_v54, %v3621_v56 }
 0x5e3   : > { %3561 = vmatmul.bf16.gmra.mxu1 %v7273_v43  ;;  %3657 = vmatmul.bf16.gmra.mxu3 %v7154_v3 }
 0x5e4   : > { %3753 = vmatmul.bf16.gmra.mxu0 %v7154_v3  ;;  %3851 = vmatmul.bf16.gmra.mxu2 %v7154_v3 }
 0x5e5   : > { %4002 = vmatpush.bf16.msrb.mxu3 %v5537_v30 }
 0x5e6   : > { %v3626_v21 = vpop.f32.mrf.mxu3 }
 0x5e7   : > { %v3818_v33 = vpop.f32.mrf.mxu2 }
 0x5e8   : > { %v8003_v54 = vadd.f32 %v3818_v33, %v3718_v24  ;;  %v3532_v56 = vpop.f32.mrf.mxu1 }
 0x5e9   : > { %v8012_v36 = vadd.f32 %v3532_v56, %v7660_v42  ;;  %v3724_v35 = vpop.f32.mrf.mxu0 }
 0x5ea   : > { %9185 = vst [vmem:[#allocation50_spill] sm:$0xff] %v8003_v54  ;;  %v3725_v40 = vadd.f32 %v3724_v35, %v3623_v10 }
 0x5eb   : > { %9186 = vst [vmem:[#allocation51_spill] sm:$0xff] %v8012_v36 }
 0x5ee   : > { %v3628_v29 = vpop.f32.mrf.mxu3 }
 0x5ef   : > { %v3820_v30 = vpop.f32.mrf.mxu2 }
 0x5f0   : > { %v8014_v24 = vadd.f32 %v3820_v30, %v3720_v20  ;;  %v3535_v33 = vpop.f32.mrf.mxu1 }
 0x5f1   : > { %v8017_v39 = vadd.f32 %v3535_v33, %v7678_v6  ;;  %v3727_v27 = vpop.f32.mrf.mxu0 }
 0x5f2   : > { %v3728_v13 = vadd.f32 %v3727_v27, %v3626_v21 }
 0x5f3   : > { %9187 = vst [vmem:[#allocation2_spill] sm:$0xff] %v8017_v39  ;;  %3566 = vmatmul.bf16.gmra.mxu1 %v7316_v26  ;;  %3662 = vmatmul.bf16.gmra.mxu3 %v7176_v5 }
 0x5f4   : > { %3758 = vmatmul.bf16.gmra.mxu0 %v7176_v5  ;;  %3854 = vmatmul.bf16.gmra.mxu2 %v7176_v5 }
 0x5f6   : > { %v3631_v42 = vpop.f32.mrf.mxu3 }
 0x5f7   : > { %v3823_v20 = vpop.f32.mrf.mxu2 }
 0x5f8   : > { %v8025_v55 = vadd.f32 %v3823_v20, %v3723_v62  ;;  %v3537_v10 = vpop.f32.mrf.mxu1 }
 0x5f9   : > { %v8028_v6 = vadd.f32 %v3537_v10, %v7695_v28  ;;  %v3729_v27 = vpop.f32.mrf.mxu0 }
 0x5fa   : > { %v3730_v21 = vadd.f32 %v3729_v27, %v3628_v29 }
 0x5fb   : > { %9188 = vst [vmem:[#allocation52_spill] sm:$0xff] %v8028_v6 }
 0x5fe   : > { %v3633_v47 = vpop.f32.mrf.mxu3 }
 0x5ff   : > { %v3825_v17 = vpop.f32.mrf.mxu2 }
 0x600   : > { %v8032_v35 = vadd.f32 %v3825_v17, %v3725_v40  ;;  %v3540_v30 = vpop.f32.mrf.mxu1  ;;  %v5771_v40 = vld [vmem:[%s8867_s3 + $0x204] sm:$0xf] }
 0x601   : > { %v3732_v33 = vpop.f32.mrf.mxu0 }
 0x602   : > { %v3733_v54 = vadd.f32 %v3732_v33, %v3631_v42  ;;  %v5526_v42 = vld [vmem:[%s8867_s3 + $0x208] sm:$0xf0] }
 0x603   : > { %3571 = vmatmul.bf16.gmra.mxu1 %v7364_v48  ;;  %3667 = vmatmul.bf16.gmra.mxu3 %v7203_v7  ;;  %v5529_v17 = vor.u32 %v5771_v40, %v5526_v42 }
 0x604   : > { %3763 = vmatmul.bf16.gmra.mxu0 %v7203_v7  ;;  %3859 = vmatmul.bf16.gmra.mxu2 %v7203_v7 }
 0x605   : > { %4003 = vmatpush.bf16.msrb.mxu3 %v5529_v17 }
 0x606   : > { %v3636_v28 = vpop.f32.mrf.mxu3 }
 0x607   : > { %v3828_v62 = vpop.f32.mrf.mxu2 }
 0x608   : > { %v8038_v29 = vadd.f32 %v3828_v62, %v3728_v13  ;;  %v3541_v20 = vpop.f32.mrf.mxu1  ;;  %v5755_v13 = vld [vmem:[%s8867_s3 + $0x184] sm:$0xf]  ;;  %v5462_v62 = vld [vmem:[%s8867_s3 + $0x188] sm:$0xf0] }
 0x609   : > { %v3734_v10 = vpop.f32.mrf.mxu0  ;;  %v5465_v36 = vor.u32 %v5755_v13, %v5462_v62 }
 0x60a   : > { %v3735_v27 = vadd.f32 %v3734_v10, %v3633_v47 }
 0x60b   : > { %3902 = vmatpush.bf16.msrb.mxu1 %v5465_v36 }
 0x60e   : > { %v3638_v30 = vpop.f32.mrf.mxu3 }
 0x60f   : > { %v3830_v33 = vpop.f32.mrf.mxu2 }
 0x610   : > { %v8046_v56 = vadd.f32 %v3830_v33, %v3730_v21  ;;  %v3543_v6 = vpop.f32.mrf.mxu1 }
 0x611   : > { %v3737_v20 = vpop.f32.mrf.mxu0 }
 0x612   : > { %v3738_v39 = vadd.f32 %v3737_v20, %v3636_v28 }
 0x613   : > { %3576 = vmatmul.bf16.gmra.mxu1 %v7426_v25  ;;  %3672 = vmatmul.bf16.gmra.mxu3 %v7236_v41 }
 0x614   : > { %3768 = vmatmul.bf16.gmra.mxu0 %v7236_v41  ;;  %3864 = vmatmul.bf16.gmra.mxu2 %v7236_v41 }
 0x616   : > { %v3641_v6 = vpop.f32.mrf.mxu3 }
 0x617   : > { %v3833_v21 = vpop.f32.mrf.mxu2 }
 0x618   : > { %v8058_v47 = vadd.f32 %v3833_v21, %v3733_v54  ;;  %v3544_v10 = vpop.f32.mrf.mxu1 }
 0x619   : > { %v3739_v40 = vpop.f32.mrf.mxu0 }
 0x61a   : > { %v3740_v42 = vadd.f32 %v3739_v40, %v3638_v30 }
 0x61e   : > { %v3642_v17 = vpop.f32.mrf.mxu3 }
 0x61f   : > { %v3835_v33 = vpop.f32.mrf.mxu2 }
 0x620   : > { %v8060_v13 = vadd.f32 %v3835_v33, %v3735_v27  ;;  %v3546_v28 = vpop.f32.mrf.mxu1 }
 0x621   : > { %v3742_v62 = vpop.f32.mrf.mxu0 }
 0x623   : > { %3581 = vmatmul.bf16.gmra.mxu1 %v7465_v60  ;;  %3677 = vmatmul.bf16.gmra.mxu3 %v7254_v12 }
 0x624   : > { %3773 = vmatmul.bf16.gmra.mxu0 %v7254_v12  ;;  %3869 = vmatmul.bf16.gmra.mxu2 %v7254_v12 }
 0x626   : > { %v3644_v36 = vpop.f32.mrf.mxu3 }
 0x627   : > { %v3838_v54 = vpop.f32.mrf.mxu2 }
 0x628   : > { %v8066_v20 = vadd.f32 %v3838_v54, %v3738_v39  ;;  %v3547_v6 = vpop.f32.mrf.mxu1 }
 0x629   : > { %v3743_v30 = vpop.f32.mrf.mxu0 }
 0x62e   : > { %v3645_v21 = vpop.f32.mrf.mxu3 }
 0x62f   : > { %v3840_v10 = vpop.f32.mrf.mxu2 }
 0x630   : > { %v8068_v27 = vadd.f32 %v3840_v10, %v3740_v42  ;;  %v3549_v40 = vpop.f32.mrf.mxu1 }
 0x631   : > { %v3745_v17 = vpop.f32.mrf.mxu0 }
 0x633   : > { %3586 = vmatmul.bf16.gmra.mxu1 %v7491_v19  ;;  %3682 = vmatmul.bf16.gmra.mxu3 %v7273_v43 }
 0x634   : > { %3778 = vmatmul.bf16.gmra.mxu0 %v7273_v43  ;;  %3874 = vmatmul.bf16.gmra.mxu2 %v7273_v43 }
 0x636   : > { %v3647_v33 = vpop.f32.mrf.mxu3 }
 0x637   : > { %v3843_v28 = vpop.f32.mrf.mxu2 }
 0x638   : > { %v3550_v39 = vpop.f32.mrf.mxu1 }
 0x639   : > { %v3746_v62 = vpop.f32.mrf.mxu0 }
 0x63e   : > { %v3648_v36 = vpop.f32.mrf.mxu3 }
 0x63f   : > { %v3844_v54 = vpop.f32.mrf.mxu2 }
 0x640   : > { %v3552_v6 = vpop.f32.mrf.mxu1 }
 0x641   : > { %v8075_v42 = vadd.f32 %v3552_v6, %v7810_v18  ;;  %v3748_v30 = vpop.f32.mrf.mxu0 }
 0x643   : > { %3687 = vmatmul.bf16.gmra.mxu3 %v7316_v26  ;;  %3903 = vmatmul.bf16.vlgmr.msrb.gmra.mxu1 %v7489_v31  ;;  %v9192_v31 = vld [vmem:[#allocation6_spill] sm:$0xff] }
 0x644   : > { %3783 = vmatmul.bf16.gmra.mxu0 %v7316_v26  ;;  %3879 = vmatmul.bf16.gmra.mxu2 %v7316_v26 }
 0x646   : > { %v3650_v21 = vpop.f32.mrf.mxu3 }
 0x647   : > { %v3846_v10 = vpop.f32.mrf.mxu2 }
 0x648   : > { %v3554_v40 = vpop.f32.mrf.mxu1 }
 0x649   : > { %v8082_v17 = vadd.f32 %v3554_v40, %v7812_v61  ;;  %v3749_v33 = vpop.f32.mrf.mxu0 }
 0x64e   : > { %v3651_v28 = vpop.f32.mrf.mxu3 }
 0x64f   : > { %v3847_v39 = vpop.f32.mrf.mxu2 }
 0x650   : > { %v3557_v18 = vpop.f32.mrf.mxu1 }
 0x651   : > { %v8085_v62 = vadd.f32 %v3557_v18, %v7824_v49  ;;  %v3751_v36 = vpop.f32.mrf.mxu0  ;;  %v9189_v18 = vld [vmem:[#allocation38_spill] sm:$0xff] }
 0x653   : > { %3908 = vmatmul.bf16.gmra.mxu1 %v7504_v9  ;;  %4004 = vmatmul.bf16.vlgmr.msrb.gmra.mxu3 %v7504_v9 }
 0x654   : > { %3788 = vmatmul.bf16.gmra.mxu0 %v7364_v48  ;;  %3884 = vmatmul.bf16.gmra.mxu2 %v7364_v48 }
 0x656   : > { %v8093_v61 = vpop.f32.mrf.mxu3 }
 0x657   : > { %v3849_v54 = vpop.f32.mrf.mxu2 }
 0x658   : > { %v3559_v6 = vpop.f32.mrf.mxu1 }
 0x659   : > { %v8096_v30 = vadd.f32 %v3559_v6, %v7832_v38  ;;  %v3752_v49 = vpop.f32.mrf.mxu0 }
 0x65e   : > { %v8100_v10 = vpop.f32.mrf.mxu3 }
 0x65f   : > { %v3850_v40 = vpop.f32.mrf.mxu2 }
 0x660   : > { %v3562_v33 = vpop.f32.mrf.mxu1  ;;  %v9190_v40 = vld [vmem:[#allocation39_spill] sm:$0xff] }
 0x661   : > { %v8103_v9 = vadd.f32 %v3562_v33, %v7838_v22  ;;  %v4212_v33 = vld [vmem:[%s8869_s5 + $0xf8] sm:$0xff] }
 0x662   : > { %4336 = vmatpush.msra.mxu2 %v4212_v33  ;;  %v4211_v33 = vld [vmem:[%s8869_s5 + $0xf0] sm:$0xff] }
 0x663   : > { %3913 = vmatmul.bf16.gmra.mxu1 %v6898_v57  ;;  %4009 = vmatmul.bf16.gmra.mxu3 %v6898_v57  ;;  %v9191_v57 = vld [vmem:[#allocation108_spill] sm:$0xff] }
 0x664   : > { %3889 = vmatmul.bf16.gmra.mxu2 %v7426_v25 }
 0x665   : > { %4337 = vmatpush.msra.mxu2 %v4211_v33 }
 0x666   : > { %v8108_v28 = vpop.f32.mrf.mxu3 }
 0x667   : > { %v3852_v38 = vpop.f32.mrf.mxu2 }
 0x668   : > { %v3564_v39 = vpop.f32.mrf.mxu1 }
 0x669   : > { %v8111_v36 = vadd.f32 %v3564_v39, %v9189_v18 }
 0x66e   : > { %v8113_v54 = vpop.f32.mrf.mxu3 }
 0x66f   : > { %v3853_v6 = vpop.f32.mrf.mxu2 }
 0x670   : > { %v3567_v49 = vpop.f32.mrf.mxu1 }
 0x671   : > { %v8116_v22 = vadd.f32 %v3567_v49, %v9190_v40 }
 0x673   : > { %3918 = vmatmul.bf16.gmra.mxu1 %v9191_v57  ;;  %4014 = vmatmul.bf16.gmra.mxu3 %v9191_v57 }
 0x676   : > { %v8122_v21 = vpop.f32.mrf.mxu3 }
 0x678   : > { %v3569_v38 = vpop.f32.mrf.mxu1 }
 0x679   : > { %v8125_v39 = vadd.f32 %v3569_v38, %v9192_v31  ;;  %v4196_v31 = vld [vmem:[%s8869_s5 + $0x78] sm:$0xff] }
 0x67a   : > { %4313 = vmatpush.msra.mxu0 %v4196_v31 }
 0x67b   : > { %9193 = vst [vmem:[#allocation53_spill] sm:$0xff] %v8125_v39 }
 0x67e   : > { %v8129_v6 = vpop.f32.mrf.mxu3 }
 0x680   : > { %v3572_v49 = vpop.f32.mrf.mxu1 }
 0x681   : > { %v8132_v40 = vadd.f32 %v3572_v49, %v7866_v4 }
 0x683   : > { %9194 = vst [vmem:[#allocation54_spill] sm:$0xff] %v8132_v40  ;;  %3923 = vmatmul.bf16.gmra.mxu1 %v6966_v15  ;;  %4019 = vmatmul.bf16.gmra.mxu3 %v6966_v15 }
 0x686   : > { %v8142_v57 = vpop.f32.mrf.mxu3 }
 0x688   : > { %v3574_v38 = vpop.f32.mrf.mxu1 }
 0x689   : > { %v8145_v4 = vadd.f32 %v3574_v38, %v7868_v45 }
 0x68b   : > { %9195 = vst [vmem:[#allocation55_spill] sm:$0xff] %v8145_v4 }
 0x68e   : > { %v8147_v49 = vpop.f32.mrf.mxu3 }
 0x690   : > { %v3577_v18 = vpop.f32.mrf.mxu1 }
 0x691   : > { %v8150_v39 = vadd.f32 %v3577_v18, %v7877_v37  ;;  %v4195_v18 = vld [vmem:[%s8869_s5 + $0x70] sm:$0xff]  ;;  %v4194_v37 = vld [vmem:[%s8869_s5 + $0x68] sm:$0xff] }
 0x692   : > { %4314 = vmatpush.msra.mxu0 %v4195_v18  ;;  %v4210_v18 = vld [vmem:[%s8869_s5 + $0xe8] sm:$0xff] }
 0x693   : > { %9196 = vst [vmem:[#allocation3_spill] sm:$0xff] %v8150_v39  ;;  %3928 = vmatmul.bf16.gmra.mxu1 %v7000_v11  ;;  %4024 = vmatmul.bf16.gmra.mxu3 %v7000_v11 }
 0x694   : > { %4338 = vmatpush.msra.mxu2 %v4210_v18  ;;  %4315 = vmatpush.msra.mxu0 %v4194_v37  ;;  %v4193_v37 = vld [vmem:[%s8869_s5 + $0x60] sm:$0xff]  ;;  %v4186_v18 = vld [vmem:[%s8869_s5 + $0x28] sm:$0xff] }
 0x696   : > { %v8159_v45 = vpop.f32.mrf.mxu3  ;;  %4316 = vmatpush.msra.mxu0 %v4193_v37  ;;  %v4189_v37 = vld [vmem:[%s8869_s5 + $0x40] sm:$0xff] }
 0x698   : > { %v3579_v31 = vpop.f32.mrf.mxu1 }
 0x699   : > { %v8162_v38 = vadd.f32 %v3579_v31, %v7882_v16 }
 0x69b   : > { %9197 = vst [vmem:[#allocation56_spill] sm:$0xff] %v8162_v38 }
 0x69e   : > { %v8169_v11 = vpop.f32.mrf.mxu3 }
 0x6a0   : > { %v3582_v15 = vpop.f32.mrf.mxu1 }
 0x6a1   : > { %v8172_v39 = vadd.f32 %v3582_v15, %v7899_v0 }
 0x6a3   : > { %9198 = vst [vmem:[#allocation58_spill] sm:$0xff] %v8172_v39  ;;  %3933 = vmatmul.bf16.gmra.mxu1 %v7034_v32  ;;  %4029 = vmatmul.bf16.gmra.mxu3 %v7034_v32  ;;  %v4206_v39 = vld [vmem:[%s8869_s5 + $0xc8] sm:$0xff] }
 0x6a6   : > { %v8176_v16 = vpop.f32.mrf.mxu3 }
 0x6a8   : > { %v3584_v33 = vpop.f32.mrf.mxu1 }
 0x6a9   : > { %v8179_v31 = vadd.f32 %v3584_v33, %v7912_v34  ;;  %v4190_v34 = vld [vmem:[%s8869_s5 + $0x48] sm:$0xff] }
 0x6ab   : > { %9199 = vst [vmem:[#allocation59_spill] sm:$0xff] %v8179_v31 }
 0x6ae   : > { %v8187_v0 = vpop.f32.mrf.mxu3 }
 0x6af   : > { %9200 = vst [vmem:[#allocation4_spill] sm:$0xff] %v8187_v0  ;;  %v8287_v0 = vld [vmem:[%s8868_s4] ss:$0 sm:$0xff] }
 0x6b0   : > { %v3587_v15 = vpop.f32.mrf.mxu1 }
 0x6b1   : > { %v8190_v32 = vadd.f32 %v3587_v15, %v7921_v63  ;;  %v4192_v63 = vld [vmem:[%s8869_s5 + $0x58] sm:$0xff] }
 0x6b2   : > { %4317 = vmatpush.msra.mxu0 %v4192_v63  ;;  %v4188_v63 = vld [vmem:[%s8869_s5 + $0x38] sm:$0xff] }
 0x6b3   : > { %9201 = vst [vmem:[#allocation60_spill] sm:$0xff] %v8190_v32  ;;  %3938 = vmatmul.bf16.gmra.mxu1 %v7082_v44  ;;  %4034 = vmatmul.bf16.gmra.mxu3 %v7082_v44  ;;  %v4209_v44 = vld [vmem:[%s8869_s5 + $0xe0] sm:$0xff] }
 0x6b4   : > { %4339 = vmatpush.msra.mxu2 %v4209_v44  ;;  %v4187_v44 = vld [vmem:[%s8869_s5 + $0x30] sm:$0xff] }
 0x6b6   : > { %v8196_v33 = vpop.f32.mrf.mxu3 }
 0x6b7   : > { %9202 = vst [vmem:[#allocation8_spill] sm:$0xff] %v8196_v33 }
 0x6b8   : > { %v3589_v38 = vpop.f32.mrf.mxu1 }
 0x6b9   : > { %v8199_v4 = vadd.f32 %v3589_v38, %v7926_v50  ;;  %v4191_v50 = vld [vmem:[%s8869_s5 + $0x50] sm:$0xff] }
 0x6ba   : > { %4318 = vmatpush.msra.mxu0 %v4191_v50 }
 0x6bb   : > { %9203 = vst [vmem:[#allocation62_spill] sm:$0xff] %v8199_v4 }
 0x6bc   : > { %4319 = vmatpush.msra.mxu0 %v4190_v34 }
 0x6be   : > { %v8215_v38 = vpop.f32.mrf.mxu3  ;;  %4320 = vmatpush.msra.mxu0 %v4189_v37  ;;  %v4184_v37 = vld [vmem:[%s8869_s5 + $0x18] sm:$0xff] }
 0x6bf   : > { %9204 = vst [vmem:[#allocation63_spill] sm:$0xff] %v8215_v38 }
 0x6c0   : > { %v3904_v15 = vpop.f32.mrf.mxu1  ;;  %4321 = vmatpush.msra.mxu0 %v4188_v63  ;;  %v4183_v63 = vld [vmem:[%s8869_s5 + $0x10] sm:$0xff] }
 0x6c2   : > { %4322 = vmatpush.msra.mxu0 %v4187_v44 }
 0x6c3   : > { %3943 = vmatmul.bf16.gmra.mxu1 %v7107_v23  ;;  %4039 = vmatmul.bf16.gmra.mxu3 %v7107_v23  ;;  %v4185_v23 = vld [vmem:[%s8869_s5 + $0x20] sm:$0xff] }
 0x6c4   : > { %4323 = vmatpush.msra.mxu0 %v4186_v18  ;;  %v4182_v18 = vld [vmem:[%s8869_s5 + $0x8] sm:$0xff] }
 0x6c6   : > { %v8231_v50 = vpop.f32.mrf.mxu3  ;;  %4324 = vmatpush.msra.mxu0 %v4185_v23  ;;  %v4181_v23 = vld [vmem:[%s8869_s5] sm:$0xff] }
 0x6c7   : > { %9205 = vst [vmem:[#allocation5_spill] sm:$0xff] %v8231_v50 }
 0x6c8   : > { %v3906_v34 = vpop.f32.mrf.mxu1  ;;  %4325 = vmatpush.msra.mxu0 %v4184_v37  ;;  %v4208_v37 = vld [vmem:[%s8869_s5 + $0xd8] sm:$0xff] }
 0x6c9   : > { %4340 = vmatpush.msra.mxu2 %v4208_v37  ;;  %v4203_v37 = vld [vmem:[%s8869_s5 + $0xb0] sm:$0xff] }
 0x6ca   : > { %4326 = vmatpush.msra.mxu0 %v4183_v63 }
 0x6cc   : > { %4327 = vmatpush.msra.mxu0 %v4182_v18  ;;  %v4207_v18 = vld [vmem:[%s8869_s5 + $0xd0] sm:$0xff] }
 0x6cd   : > { %4341 = vmatpush.msra.mxu2 %v4207_v18 }
 0x6ce   : > { %v8242_v4 = vpop.f32.mrf.mxu3  ;;  %4328 = vmatpush.msra.mxu0 %v4181_v23  ;;  %v4204_v23 = vld [vmem:[%s8869_s5 + $0xb8] sm:$0xff] }
 0x6cf   : > { %9206 = vst [vmem:[#allocation64_spill] sm:$0xff] %v8242_v4  ;;  %4342 = vmatpush.msra.mxu2 %v4206_v39  ;;  %v3905_v39 = vadd.f32 %v3904_v15, %v7937_v58  ;;  %v4201_v58 = vld [vmem:[%s8869_s5 + $0xa0] sm:$0xff] }
 0x6d0   : > { %v3909_v44 = vpop.f32.mrf.mxu1 }
 0x6d1   : > { %v3910_v18 = vadd.f32 %v3909_v44, %v7965_v8  ;;  %v9207_v8 = vld [vmem:[#allocation40_spill] sm:$0xff]  ;;  %v4200_v44 = vld [vmem:[%s8869_s5 + $0x98] sm:$0xff] }
 0x6d3   : > { %3946 = vmatmul.bf16.gmra.mxu1 %v7133_v59  ;;  %4044 = vmatmul.bf16.gmra.mxu3 %v7133_v59  ;;  %v4205_v59 = vld [vmem:[%s8869_s5 + $0xc0] sm:$0xff] }
 0x6d4   : > { %4343 = vmatpush.msra.mxu2 %v4205_v59  ;;  %v4202_v59 = vld [vmem:[%s8869_s5 + $0xa8] sm:$0xff] }
 0x6d6   : > { %v4005_v63 = vpop.f32.mrf.mxu3  ;;  %4344 = vmatpush.msra.mxu2 %v4204_v23 }
 0x6d7   : > { %v4006_v50 = vadd.f32 %v4005_v63, %v3905_v39 }
 0x6d8   : > { %v3911_v31 = vpop.f32.mrf.mxu1  ;;  %4345 = vmatpush.msra.mxu2 %v4203_v37  ;;  %v4199_v37 = vld [vmem:[%s8869_s5 + $0x90] sm:$0xff] }
 0x6da   : > { %4346 = vmatpush.msra.mxu2 %v4202_v59 }
 0x6dc   : > { %4347 = vmatpush.msra.mxu2 %v4201_v58  ;;  %v4227_v58 = vld [vmem:[%s8869_s5 + $0x170] sm:$0xff] }
 0x6de   : > { %v4007_v32 = vpop.f32.mrf.mxu3  ;;  %4348 = vmatpush.msra.mxu2 %v4200_v44  ;;  %v4224_v44 = vld [vmem:[%s8869_s5 + $0x158] sm:$0xff] }
 0x6e0   : > { %v8264_v4 = vpop.f32.mrf.mxu1  ;;  %4349 = vmatpush.msra.mxu2 %v4199_v37  ;;  %v4221_v37 = vld [vmem:[%s8869_s5 + $0x140] sm:$0xff] }
 0x6e3   : > { %3949 = vmatmul.bf16.gmra.mxu1 %v7154_v3  ;;  %4047 = vmatmul.bf16.gmra.mxu3 %v7154_v3 }
 0x6e6   : > { %v4010_v38 = vpop.f32.mrf.mxu3 }
 0x6e7   : > { %v4011_v33 = vadd.f32 %v4010_v38, %v3910_v18  ;;  %v9208_v38 = vmax.f32 %v7871_v53, %v9207_v8 }
 0x6e8   : > { %v8279_v40 = vpop.f32.mrf.mxu1 }
 0x6e9   : > { %v4098_v3 = vmax.f32 %v4006_v50, %v4011_v33  ;;  %v3907_v33 = vadd.f32 %v3906_v34, %v7950_v51  ;;  %v3912_v50 = vadd.f32 %v3911_v31, %v7970_v14  ;;  %v4197_v14 = vld [vmem:[%s8869_s5 + $0x80] sm:$0xff]  ;;  %v9209_v31 = vmax.f32 %v7880_v46, %v7908_v2  ;;  %v4226_v2 = vld [vmem:[%s8869_s5 + $0x168] sm:$0xff] }
 0x6eb   : > { %v4101_v15 = vmax.f32 %v9208_v38, %v4098_v3  ;;  %v4008_v39 = vadd.f32 %v4007_v32, %v3907_v33  ;;  %v4198_v3 = vld [vmem:[%s8869_s5 + $0x88] sm:$0xff]  ;;  %v4228_v32 = vld [vmem:[%s8869_s5 + $0x178] sm:$0xff]  ;;  %v4223_v33 = vld [vmem:[%s8869_s5 + $0x150] sm:$0xff] }
 0x6ec   : > { %4350 = vmatpush.msra.mxu2 %v4198_v3  ;;  %4359 = vmatpush.msrb.mxu0 %v4228_v32  ;;  %v9210_v3 = vld [vmem:[#allocation50_spill] sm:$0xff] }
 0x6ed   : > { %v4107_v63 = vadd.f32 %v8287_v0, %v4101_v15  ;;  %v4225_v15 = vld [vmem:[%s8869_s5 + $0x160] sm:$0xff] }
 0x6ee   : > { %v4012_v23 = vpop.f32.mrf.mxu3  ;;  %4351 = vmatpush.msra.mxu2 %v4197_v14  ;;  %4360 = vmatpush.msrb.mxu0 %v4227_v58 }
 0x6ef   : > { %v4109_v53 = vmax.f32 %v4107_v63, 0.0  ;;  %v4013_v18 = vadd.f32 %v4012_v23, %v3912_v50  ;;  %v4222_v63 = vld [vmem:[%s8869_s5 + $0x148] sm:$0xff] }
 0x6f0   : > { %v3919_v59 = vpop.f32.mrf.mxu1  ;;  %4361 = vmatpush.msrb.mxu0 %v4226_v2  ;;  %v9214_v2 = vld [vmem:[#allocation49_spill] sm:$0xff] }
 0x6f1   : > { %v4100_v51 = vmax.f32 %v4008_v39, %v4013_v18  ;;  %4329 = vmatmul.f32.vlgmr.msra.gmra.mxu0 %v4109_v53  ;;  %v4220_v39 = vld [vmem:[%s8869_s5 + $0x138] sm:$0xff]  ;;  %v4219_v53 = vld [vmem:[%s8869_s5 + $0x130] sm:$0xff]  ;;  %v3915_v18 = vadd.f32 %v8264_v4, %v7981_v52  ;;  %v9212_v52 = vld [vmem:[#allocation43_spill] sm:$0xff] }
 0x6f2   : > { %4362 = vmatpush.msrb.mxu0 %v4225_v15  ;;  %v3917_v15 = vadd.f32 %v8279_v40, %v9214_v2 }
 0x6f3   : > { %v4102_v34 = vmax.f32 %v9209_v31, %v4100_v51  ;;  %3952 = vmatmul.bf16.gmra.mxu1 %v7176_v5  ;;  %4050 = vmatmul.bf16.gmra.mxu3 %v7176_v5  ;;  %v3920_v51 = vadd.f32 %v3919_v59, %v9210_v3 }
 0x6f4   : > { %4363 = vmatpush.msrb.mxu0 %v4224_v44 }
 0x6f5   : > { %v4108_v8 = vadd.f32 %v8287_v0, %v4102_v34 }
 0x6f6   : > { %v4015_v38 = vpop.f32.mrf.mxu3  ;;  %4364 = vmatpush.msrb.mxu0 %v4223_v33 }
 0x6f7   : > { %v4110_v46 = vmax.f32 %v4108_v8, 0.0  ;;  %v4016_v31 = vadd.f32 %v4015_v38, %v3915_v18  ;;  %v4217_v8 = vld [vmem:[%s8869_s5 + $0x120] sm:$0xff]  ;;  %v4216_v38 = vld [vmem:[%s8869_s5 + $0x118] sm:$0xff] }
 0x6f8   : > { %v3921_v5 = vpop.f32.mrf.mxu1  ;;  %4365 = vmatpush.msrb.mxu0 %v4222_v63 }
 0x6f9   : > { %4332 = vmatmul.f32.gmra.mxu0 %v4110_v46  ;;  %v9211_v46 = vld [vmem:[#allocation41_spill] sm:$0xff]  ;;  %v3922_v44 = vadd.f32 %v3921_v5, %v8014_v24  ;;  %v4213_v24 = vld [vmem:[%s8869_s5 + $0x100] sm:$0xff] }
 0x6fa   : > { %4366 = vmatpush.msrb.mxu0 %v4221_v37  ;;  %v9213_v4 = vmax.f32 %v9211_v46, %v9212_v52  ;;  %v4215_v37 = vld [vmem:[%s8869_s5 + $0x110] sm:$0xff]  ;;  %v9215_v5 = vld [vmem:[#allocation42_spill] sm:$0xff]  ;;  %v4242_v52 = vld [vmem:[%s8869_s5 + $0x1e8] sm:$0xff] }
 0x6fc   : > { %4367 = vmatpush.msrb.mxu0 %v4220_v39 }
 0x6fe   : > { %v4017_v50 = vpop.f32.mrf.mxu3  ;;  %4368 = vmatpush.msrb.mxu0 %v4219_v53 }
 0x6ff   : > { %v4018_v39 = vadd.f32 %v4017_v50, %v3917_v15  ;;  %v4244_v50 = vld [vmem:[%s8869_s5 + $0x1f8] sm:$0xff]  ;;  %v4238_v15 = vld [vmem:[%s8869_s5 + $0x1c8] sm:$0xff] }
 0x700   : > { %v8337_v23 = vpop.f32.mrf.mxu1  ;;  %4382 = vmatpush.msrb.mxu2 %v4244_v50 }
 0x703   : > { %3955 = vmatmul.bf16.gmra.mxu1 %v7203_v7  ;;  %4053 = vmatmul.bf16.gmra.mxu3 %v7203_v7  ;;  %v4218_v7 = vld [vmem:[%s8869_s5 + $0x128] sm:$0xff] }
 0x704   : > { %4369 = vmatpush.msrb.mxu0 %v4218_v7  ;;  %v4243_v7 = vld [vmem:[%s8869_s5 + $0x1f0] sm:$0xff] }
 0x705   : > { %4383 = vmatpush.msrb.mxu2 %v4243_v7 }
 0x706   : > { %v4020_v14 = vpop.f32.mrf.mxu3  ;;  %4370 = vmatpush.msrb.mxu0 %v4217_v8 }
 0x707   : > { %v4021_v34 = vadd.f32 %v4020_v14, %v3920_v51  ;;  %v4214_v51 = vld [vmem:[%s8869_s5 + $0x108] sm:$0xff]  ;;  %v9216_v14 = vld [vmem:[#allocation44_spill] sm:$0xff]  ;;  %4384 = vmatpush.msrb.mxu2 %v4242_v52 }
 0x708   : > { %v8353_v32 = vpop.f32.mrf.mxu1  ;;  %4371 = vmatpush.msrb.mxu0 %v4216_v38  ;;  %v4239_v38 = vld [vmem:[%s8869_s5 + $0x1d0] sm:$0xff] }
 0x709   : > { %v4112_v58 = vmax.f32 %v4016_v31, %v4021_v34  ;;  %v9217_v31 = vmax.f32 %v9215_v5, %v9216_v14  ;;  %v4234_v5 = vld [vmem:[%s8869_s5 + $0x1a8] sm:$0xff]  ;;  %v4233_v14 = vld [vmem:[%s8869_s5 + $0x1a0] sm:$0xff] }
 0x70a   : > { %4372 = vmatpush.msrb.mxu0 %v4215_v37  ;;  %v4235_v37 = vld [vmem:[%s8869_s5 + $0x1b0] sm:$0xff] }
 0x70b   : > { %v4115_v59 = vmax.f32 %v9213_v4, %v4112_v58  ;;  %v4241_v4 = vld [vmem:[%s8869_s5 + $0x1e0] sm:$0xff] }
 0x70c   : > { %4373 = vmatpush.msrb.mxu0 %v4214_v51  ;;  %4385 = vmatpush.msrb.mxu2 %v4241_v4 }
 0x70d   : > { %v4117_v33 = vadd.f32 %v8287_v0, %v4115_v59  ;;  %v4240_v59 = vld [vmem:[%s8869_s5 + $0x1d8] sm:$0xff] }
 0x70e   : > { %v4022_v63 = vpop.f32.mrf.mxu3  ;;  %4374 = vmatpush.msrb.mxu0 %v4213_v24  ;;  %4386 = vmatpush.msrb.mxu2 %v4240_v59 }
 0x70f   : > { %v4119_v53 = vmax.f32 %v4117_v33, 0.0  ;;  %v4023_v18 = vadd.f32 %v4022_v63, %v3922_v44  ;;  %v4237_v33 = vld [vmem:[%s8869_s5 + $0x1c0] sm:$0xff]  ;;  %v4236_v63 = vld [vmem:[%s8869_s5 + $0x1b8] sm:$0xff] }
 0x710   : > { %v3929_v3 = vpop.f32.mrf.mxu1  ;;  %4387 = vmatpush.msrb.mxu2 %v4239_v38  ;;  %v4230_v38 = vld [vmem:[%s8869_s5 + $0x188] sm:$0xff] }
 0x711   : > { %v4114_v40 = vmax.f32 %v4018_v39, %v4023_v18  ;;  %4352 = vmatmul.f32.vlgmr.msra.gmra.mxu2 %v4119_v53  ;;  %v3925_v39 = vadd.f32 %v8337_v23, %v8025_v55  ;;  %v3930_v53 = vadd.f32 %v3929_v3, %v8038_v29  ;;  %v4232_v29 = vld [vmem:[%s8869_s5 + $0x198] sm:$0xff]  ;;  %v3927_v3 = vadd.f32 %v8353_v32, %v8032_v35  ;;  %v9221_v32 = vld [vmem:[#allocation46_spill] sm:$0xff] }
 0x712   : > { %4388 = vmatpush.msrb.mxu2 %v4238_v15 }
 0x713   : > { %v4116_v34 = vmax.f32 %v9217_v31, %v4114_v40  ;;  %3960 = vmatmul.bf16.gmra.mxu1 %v7236_v41  ;;  %4056 = vmatmul.bf16.gmra.mxu3 %v7236_v41  ;;  %v9218_v31 = vld [vmem:[#allocation45_spill] sm:$0xff] }
 0x714   : > { %4389 = vmatpush.msrb.mxu2 %v4237_v33 }
 0x715   : > { %v4118_v58 = vadd.f32 %v8287_v0, %v4116_v34  ;;  %v9219_v34 = vld [vmem:[#allocation47_spill] sm:$0xff] }
 0x716   : > { %v4025_v8 = vpop.f32.mrf.mxu3  ;;  %4390 = vmatpush.msrb.mxu2 %v4236_v63  ;;  %v9220_v55 = vmax.f32 %v9218_v31, %v9219_v34  ;;  %v9224_v34 = vld [vmem:[#allocation2_spill] sm:$0xff] }
 0x717   : > { %v4120_v46 = vmax.f32 %v4118_v58, 0.0  ;;  %v4026_v51 = vadd.f32 %v4025_v8, %v3925_v39  ;;  %v4231_v8 = vld [vmem:[%s8869_s5 + $0x190] sm:$0xff] }
 0x718   : > { %v3931_v41 = vpop.f32.mrf.mxu1  ;;  %4391 = vmatpush.msrb.mxu2 %v4235_v37 }
 0x719   : > { %4355 = vmatmul.f32.gmra.mxu2 %v4120_v46  ;;  %v3932_v50 = vadd.f32 %v3931_v41, %v8046_v56  ;;  %v4229_v56 = vld [vmem:[%s8869_s5 + $0x180] sm:$0xff]  ;;  %v9222_v41 = vld [vmem:[#allocation48_spill] sm:$0xff] }
 0x71a   : > { %4392 = vmatpush.msrb.mxu2 %v4234_v5  ;;  %v9223_v15 = vmax.f32 %v9221_v32, %v9222_v41  ;;  %v8470_v41 = vpop.f32.mrf.mxu0 }
 0x71c   : > { %4393 = vmatpush.msrb.mxu2 %v4233_v14 }
 0x71e   : > { %v4027_v2 = vpop.f32.mrf.mxu3  ;;  %4394 = vmatpush.msrb.mxu2 %v4232_v29 }
 0x71f   : > { %v4028_v46 = vadd.f32 %v4027_v2, %v3927_v3 }
 0x720   : > { %v3934_v44 = vpop.f32.mrf.mxu1  ;;  %4395 = vmatpush.msrb.mxu2 %v4231_v8  ;;  %v9226_v8 = vld [vmem:[#allocation51_spill] sm:$0xff] }
 0x722   : > { %4396 = vmatpush.msrb.mxu2 %v4230_v38 }
 0x723   : > { %3965 = vmatmul.bf16.gmra.mxu1 %v7254_v12  ;;  %4061 = vmatmul.bf16.gmra.mxu3 %v7254_v12 }
 0x724   : > { %4397 = vmatpush.msrb.mxu2 %v4229_v56 }
 0x726   : > { %v4030_v18 = vpop.f32.mrf.mxu3 }
 0x727   : > { %v4031_v40 = vadd.f32 %v4030_v18, %v3930_v53 }
 0x728   : > { %v3936_v24 = vpop.f32.mrf.mxu1 }
 0x729   : > { %v4122_v12 = vmax.f32 %v4026_v51, %v4031_v40  ;;  %v3935_v51 = vadd.f32 %v3934_v44, %v8058_v47  ;;  %v3937_v29 = vadd.f32 %v3936_v24, %v8060_v13 }
 0x72b   : > { %v4125_v23 = vmax.f32 %v9220_v55, %v4122_v12  ;;  %v9225_v55 = vmax.f32 %v7991_v1, %v9224_v34 }
 0x72d   : > { %v4127_v7 = vadd.f32 %v8287_v0, %v4125_v23 }
 0x72e   : > { %v4032_v58 = vpop.f32.mrf.mxu3 }
 0x72f   : > { %v4129_v52 = vmax.f32 %v4127_v7, 0.0  ;;  %v4033_v4 = vadd.f32 %v4032_v58, %v3932_v50 }
 0x730   : > { %v3939_v59 = vpop.f32.mrf.mxu1 }
 0x731   : > { %v4124_v35 = vmax.f32 %v4028_v46, %v4033_v4  ;;  %4375 = vmatmul.f32.vlgmr.msrb.gmra.mxu0 %v4129_v52  ;;  %v3940_v40 = vadd.f32 %v3939_v59, %v8066_v20  ;;  %v9227_v46 = vld [vmem:[#allocation52_spill] sm:$0xff] }
 0x732   : > { %v9228_v52 = vmax.f32 %v9226_v8, %v9227_v46  ;;  %v4245_v8 = vld [vmem:[%s8869_s5 + $0x200] sm:$0xff]  ;;  %v4276_v46 = vld [vmem:[%s8869_s5 + $0x2f8] sm:$0xff] }
 0x733   : > { %v4126_v33 = vmax.f32 %v9223_v15, %v4124_v35  ;;  %3970 = vmatmul.bf16.gmra.mxu1 %v7273_v43  ;;  %4066 = vmatmul.bf16.gmra.mxu3 %v7273_v43 }
 0x734   : > { %4428 = vmatpush.msra.mxu2 %v4276_v46  ;;  %v4261_v46 = vld [vmem:[%s8869_s5 + $0x280] sm:$0xff] }
 0x735   : > { %v4128_v2 = vadd.f32 %v8287_v0, %v4126_v33  ;;  %v8475_v33 = vpop.f32.mrf.mxu2 }
 0x736   : > { %v4035_v63 = vpop.f32.mrf.mxu3 }
 0x737   : > { %v4130_v37 = vmax.f32 %v4128_v2, 0.0  ;;  %v4036_v12 = vadd.f32 %v4035_v63, %v3935_v51  ;;  %v4258_v63 = vld [vmem:[%s8869_s5 + $0x268] sm:$0xff]  ;;  %v4255_v51 = vld [vmem:[%s8869_s5 + $0x250] sm:$0xff] }
 0x738   : > { %v3941_v39 = vpop.f32.mrf.mxu1 }
 0x739   : > { %4378 = vmatmul.f32.gmra.mxu0 %v4130_v37  ;;  %v3942_v3 = vadd.f32 %v3941_v39, %v8068_v27  ;;  %v4257_v39 = vld [vmem:[%s8869_s5 + $0x260] sm:$0xff] }
 0x73e   : > { %v4037_v53 = vpop.f32.mrf.mxu3 }
 0x73f   : > { %v4038_v7 = vadd.f32 %v4037_v53, %v3937_v29  ;;  %v8491_v53 = vpop.f32.mrf.mxu0 }
 0x740   : > { %v3944_v18 = vpop.f32.mrf.mxu1 }
 0x741   : > { %v8493_v18 = vpop.f32.mrf.mxu2 }
 0x743   : > { %3975 = vmatmul.bf16.gmra.mxu1 %v7316_v26  ;;  %4071 = vmatmul.bf16.gmra.mxu3 %v7316_v26 }
 0x746   : > { %v4040_v5 = vpop.f32.mrf.mxu3 }
 0x747   : > { %v4041_v43 = vadd.f32 %v4040_v5, %v3940_v40  ;;  %v4254_v5 = vld [vmem:[%s8869_s5 + $0x248] sm:$0xff]  ;;  %v3759_v34 = vpop.f32.mrf.mxu0 }
 0x748   : > { %v3945_v14 = vpop.f32.mrf.mxu1 }
 0x749   : > { %v4132_v31 = vmax.f32 %v4036_v12, %v4041_v43  ;;  %v4253_v43 = vld [vmem:[%s8869_s5 + $0x240] sm:$0xff]  ;;  %v4252_v14 = vld [vmem:[%s8869_s5 + $0x238] sm:$0xff] }
 0x74b   : > { %v4135_v23 = vmax.f32 %v9225_v55, %v4132_v31  ;;  %v4251_v31 = vld [vmem:[%s8869_s5 + $0x230] sm:$0xff]  ;;  %v3860_v55 = vpop.f32.mrf.mxu2 }
 0x74d   : > { %v4137_v50 = vadd.f32 %v8287_v0, %v4135_v23 }
 0x74e   : > { %v4042_v26 = vpop.f32.mrf.mxu3 }
 0x74f   : > { %v4139_v47 = vmax.f32 %v4137_v50, 0.0  ;;  %v4043_v44 = vadd.f32 %v4042_v26, %v3942_v3  ;;  %v4250_v3 = vld [vmem:[%s8869_s5 + $0x228] sm:$0xff]  ;;  %v4248_v50 = vld [vmem:[%s8869_s5 + $0x218] sm:$0xff]  ;;  %v3761_v26 = vpop.f32.mrf.mxu0 }
 0x750   : > { %v3947_v20 = vpop.f32.mrf.mxu1 }
 0x751   : > { %v4134_v58 = vmax.f32 %v4038_v7, %v4043_v44  ;;  %4398 = vmatmul.f32.vlgmr.msrb.gmra.mxu2 %v4139_v47  ;;  %v4247_v47 = vld [vmem:[%s8869_s5 + $0x210] sm:$0xff] }
 0x753   : > { %v4136_v4 = vmax.f32 %v9228_v52, %v4134_v58  ;;  %3980 = vmatmul.bf16.gmra.mxu1 %v7364_v48  ;;  %4076 = vmatmul.bf16.gmra.mxu3 %v7364_v48  ;;  %v4260_v48 = vld [vmem:[%s8869_s5 + $0x278] sm:$0xff]  ;;  %v3862_v44 = vpop.f32.mrf.mxu2  ;;  %v4246_v58 = vld [vmem:[%s8869_s5 + $0x208] sm:$0xff]  ;;  %v4275_v52 = vld [vmem:[%s8869_s5 + $0x2f0] sm:$0xff] }
 0x754   : > { %4405 = vmatpush.msra.mxu0 %v4260_v48  ;;  %4429 = vmatpush.msra.mxu2 %v4275_v52  ;;  %v3755_v48 = vadd.f32 %v8470_v41, %v8093_v61  ;;  %v4267_v61 = vld [vmem:[%s8869_s5 + $0x2b0] sm:$0xff]  ;;  %v9230_v52 = vmax.f32 %v8082_v17, %v8096_v30  ;;  %v4290_v17 = vld [vmem:[%s8869_s5 + $0x368] sm:$0xff] }
 0x755   : > { %v4138_v1 = vadd.f32 %v8287_v0, %v4136_v4 }
 0x756   : > { %v4045_v13 = vpop.f32.mrf.mxu3 }
 0x757   : > { %v4140_v27 = vmax.f32 %v4138_v1, 0.0  ;;  %v4274_v1 = vld [vmem:[%s8869_s5 + $0x2e8] sm:$0xff]  ;;  %v8540_v13 = vpop.f32.mrf.mxu0 }
 0x758   : > { %v3948_v24 = vpop.f32.mrf.mxu1  ;;  %4430 = vmatpush.msra.mxu2 %v4274_v1  ;;  %v4292_v1 = vld [vmem:[%s8869_s5 + $0x378] sm:$0xff] }
 0x759   : > { %4401 = vmatmul.f32.gmra.mxu2 %v4140_v27  ;;  %v4273_v24 = vld [vmem:[%s8869_s5 + $0x2e0] sm:$0xff] }
 0x75a   : > { %4431 = vmatpush.msra.mxu2 %v4273_v24  ;;  %v4291_v24 = vld [vmem:[%s8869_s5 + $0x370] sm:$0xff] }
 0x75e   : > { %v4046_v59 = vpop.f32.mrf.mxu3 }
 0x75f   : > { %v4272_v59 = vld [vmem:[%s8869_s5 + $0x2d8] sm:$0xff] }
 0x760   : > { %v3950_v38 = vpop.f32.mrf.mxu1  ;;  %4432 = vmatpush.msra.mxu2 %v4272_v59 }
 0x761   : > { %v8548_v38 = vpop.f32.mrf.mxu2 }
 0x763   : > { %3985 = vmatmul.bf16.gmra.mxu1 %v7426_v25  ;;  %4081 = vmatmul.bf16.gmra.mxu3 %v7426_v25  ;;  %v4259_v25 = vld [vmem:[%s8869_s5 + $0x270] sm:$0xff] }
 0x764   : > { %4406 = vmatpush.msra.mxu0 %v4259_v25  ;;  %v3760_v25 = vadd.f32 %v3759_v34, %v8108_v28  ;;  %v3762_v34 = vadd.f32 %v3761_v26, %v8113_v54 }
 0x766   : > { %v4048_v35 = vpop.f32.mrf.mxu3  ;;  %4407 = vmatpush.msra.mxu0 %v4258_v63  ;;  %v4268_v63 = vld [vmem:[%s8869_s5 + $0x2b8] sm:$0xff] }
 0x767   : > { %v4271_v35 = vld [vmem:[%s8869_s5 + $0x2d0] sm:$0xff] }
 0x768   : > { %v3951_v56 = vpop.f32.mrf.mxu1  ;;  %4408 = vmatpush.msra.mxu0 %v4257_v39  ;;  %4433 = vmatpush.msra.mxu2 %v4271_v35  ;;  %v3856_v39 = vadd.f32 %v8475_v33, %v3755_v48  ;;  %v4266_v33 = vld [vmem:[%s8869_s5 + $0x2a8] sm:$0xff]  ;;  %v4288_v48 = vld [vmem:[%s8869_s5 + $0x358] sm:$0xff] }
 0x769   : > { %v8573_v41 = vpop.f32.mrf.mxu2 }
 0x76e   : > { %v4049_v32 = vpop.f32.mrf.mxu3 }
 0x76f   : > { %v4270_v32 = vld [vmem:[%s8869_s5 + $0x2c8] sm:$0xff] }
 0x770   : > { %v3953_v15 = vpop.f32.mrf.mxu1  ;;  %4434 = vmatpush.msra.mxu2 %v4270_v32  ;;  %v4289_v32 = vld [vmem:[%s8869_s5 + $0x360] sm:$0xff] }
 0x773   : > { %3990 = vmatmul.bf16.gmra.mxu1 %v7465_v60  ;;  %4086 = vmatmul.bf16.gmra.mxu3 %v7465_v60  ;;  %v4256_v60 = vld [vmem:[%s8869_s5 + $0x258] sm:$0xff] }
 0x774   : > { %4409 = vmatpush.msra.mxu0 %v4256_v60  ;;  %v3861_v60 = vadd.f32 %v3860_v55, %v3760_v25 }
 0x776   : > { %v4051_v2 = vpop.f32.mrf.mxu3  ;;  %4410 = vmatpush.msra.mxu0 %v4255_v51 }
 0x777   : > { %v4269_v2 = vld [vmem:[%s8869_s5 + $0x2c0] sm:$0xff] }
 0x778   : > { %v3954_v37 = vpop.f32.mrf.mxu1  ;;  %4411 = vmatpush.msra.mxu0 %v4254_v5  ;;  %4435 = vmatpush.msra.mxu2 %v4269_v2  ;;  %v4287_v2 = vld [vmem:[%s8869_s5 + $0x350] sm:$0xff] }
 0x779   : > { %v8567_v37 = vpop.f32.mrf.mxu0 }
 0x77a   : > { %4412 = vmatpush.msra.mxu0 %v4253_v43  ;;  %4436 = vmatpush.msra.mxu2 %v4268_v63 }
 0x77c   : > { %4413 = vmatpush.msra.mxu0 %v4252_v14  ;;  %4437 = vmatpush.msra.mxu2 %v4267_v61  ;;  %v3765_v61 = vadd.f32 %v8540_v13, %v8122_v21  ;;  %v4283_v21 = vld [vmem:[%s8869_s5 + $0x330] sm:$0xff] }
 0x77e   : > { %v4052_v40 = vpop.f32.mrf.mxu3  ;;  %4414 = vmatpush.msra.mxu0 %v4251_v31  ;;  %v3757_v31 = vadd.f32 %v8491_v53, %v8100_v10  ;;  %4438 = vmatpush.msra.mxu2 %v4266_v33  ;;  %v4264_v10 = vld [vmem:[%s8869_s5 + $0x298] sm:$0xff] }
 0x780   : > { %v3956_v12 = vpop.f32.mrf.mxu1  ;;  %4415 = vmatpush.msra.mxu0 %v4250_v3  ;;  %v3863_v3 = vadd.f32 %v3862_v44, %v3762_v34 }
 0x781   : > { %v3957_v28 = vadd.f32 %v3956_v12, %v3856_v39  ;;  %v4265_v12 = vld [vmem:[%s8869_s5 + $0x2a0] sm:$0xff]  ;;  %v4286_v39 = vld [vmem:[%s8869_s5 + $0x348] sm:$0xff] }
 0x782   : > { %4439 = vmatpush.msra.mxu2 %v4265_v12 }
 0x783   : > { %4091 = vmatmul.bf16.gmra.mxu3 %v7491_v19  ;;  %v4249_v19 = vld [vmem:[%s8869_s5 + $0x220] sm:$0xff] }
 0x784   : > { %4416 = vmatpush.msra.mxu0 %v4249_v19  ;;  %v9229_v19 = vmax.f32 %v8075_v42, %v8085_v62  ;;  %4440 = vmatpush.msra.mxu2 %v4264_v10 }
 0x786   : > { %v4054_v23 = vpop.f32.mrf.mxu3  ;;  %4417 = vmatpush.msra.mxu0 %v4248_v50 }
 0x787   : > { %v3858_v23 = vadd.f32 %v8493_v18, %v3757_v31  ;;  %v4263_v18 = vld [vmem:[%s8869_s5 + $0x290] sm:$0xff] }
 0x788   : > { %v8511_v29 = vpop.f32.mrf.mxu1  ;;  %4418 = vmatpush.msra.mxu0 %v4247_v47  ;;  %v3870_v47 = vpop.f32.mrf.mxu2  ;;  %4441 = vmatpush.msra.mxu2 %v4263_v18 }
 0x789   : > { %v3959_v54 = vadd.f32 %v8511_v29, %v3858_v23  ;;  %v4282_v23 = vld [vmem:[%s8869_s5 + $0x328] sm:$0xff] }
 0x78a   : > { %4419 = vmatpush.msra.mxu0 %v4246_v58 }
 0x78c   : > { %4420 = vmatpush.msra.mxu0 %v4245_v8  ;;  %v4262_v8 = vld [vmem:[%s8869_s5 + $0x288] sm:$0xff] }
 0x78d   : > { %4442 = vmatpush.msra.mxu2 %v4262_v8 }
 0x78e   : > { %v4055_v7 = vpop.f32.mrf.mxu3  ;;  %4451 = vmatpush.msrb.mxu0 %v4292_v1 }
 0x78f   : > { %v3769_v7 = vpop.f32.mrf.mxu0  ;;  %4443 = vmatpush.msra.mxu2 %v4261_v46  ;;  %v4308_v46 = vld [vmem:[%s8869_s5 + $0x3f8] sm:$0xff] }
 0x790   : > { %v3961_v20 = vpop.f32.mrf.mxu1  ;;  %4452 = vmatpush.msrb.mxu0 %v4291_v24  ;;  %v3872_v30 = vpop.f32.mrf.mxu2 }
 0x791   : > { %v3962_v51 = vadd.f32 %v3961_v20, %v3861_v60  ;;  %4474 = vmatpush.msrb.mxu2 %v4308_v46 }
 0x792   : > { %4453 = vmatpush.msrb.mxu0 %v4290_v17  ;;  %v4304_v17 = vld [vmem:[%s8869_s5 + $0x3d8] sm:$0xff] }
 0x794   : > { %4454 = vmatpush.msrb.mxu0 %v4289_v32 }
 0x796   : > { %v4057_v4 = vpop.f32.mrf.mxu3  ;;  %4455 = vmatpush.msrb.mxu0 %v4288_v48 }
 0x797   : > { %v4058_v5 = vadd.f32 %v4057_v4, %v3957_v28  ;;  %v3771_v59 = vpop.f32.mrf.mxu0  ;;  %v3770_v28 = vadd.f32 %v3769_v7, %v8142_v57 }
 0x798   : > { %v3963_v27 = vpop.f32.mrf.mxu1  ;;  %4456 = vmatpush.msrb.mxu0 %v4287_v2  ;;  %v4301_v2 = vld [vmem:[%s8869_s5 + $0x3c0] sm:$0xff] }
 0x799   : > { %v3964_v53 = vadd.f32 %v3963_v27, %v3863_v3  ;;  %v3871_v33 = vadd.f32 %v3870_v47, %v3770_v28  ;;  %v3772_v3 = vadd.f32 %v3771_v59, %v8147_v49  ;;  %v4300_v28 = vld [vmem:[%s8869_s5 + $0x3b8] sm:$0xff] }
 0x79a   : > { %4457 = vmatpush.msrb.mxu0 %v4286_v39 }
 0x79b   : > { %v3873_v10 = vadd.f32 %v3872_v30, %v3772_v3  ;;  %v4303_v30 = vld [vmem:[%s8869_s5 + $0x3d0] sm:$0xff] }
 0x79e   : > { %v4059_v56 = vpop.f32.mrf.mxu3 }
 0x79f   : > { %v4060_v42 = vadd.f32 %v4059_v56, %v3959_v54  ;;  %v8629_v60 = vpop.f32.mrf.mxu0  ;;  %v9231_v54 = vmax.f32 %v8103_v9, %v8116_v22  ;;  %v4279_v9 = vld [vmem:[%s8869_s5 + $0x310] sm:$0xff] }
 0x7a0   : > { %v8556_v15 = vpop.f32.mrf.mxu1  ;;  %v3775_v39 = vadd.f32 %v8629_v60, %v8159_v45 }
 0x7a6   : > { %v4062_v40 = vpop.f32.mrf.mxu3 }
 0x7a7   : > { %v4063_v43 = vadd.f32 %v4062_v40, %v3962_v51  ;;  %v4285_v51 = vld [vmem:[%s8869_s5 + $0x340] sm:$0xff]  ;;  %v4284_v40 = vld [vmem:[%s8869_s5 + $0x338] sm:$0xff] }
 0x7a8   : > { %v8575_v14 = vpop.f32.mrf.mxu1  ;;  %4458 = vmatpush.msrb.mxu0 %v4285_v51 }
 0x7a9   : > { %v4142_v55 = vmax.f32 %v4058_v5, %v4063_v43  ;;  %v8640_v5 = vpop.f32.mrf.mxu2  ;;  %v3866_v43 = vadd.f32 %v8548_v38, %v3765_v61  ;;  %v3767_v38 = vadd.f32 %v8567_v37, %v8129_v6  ;;  %v4280_v6 = vld [vmem:[%s8869_s5 + $0x318] sm:$0xff] }
 0x7aa   : > { %4459 = vmatpush.msrb.mxu0 %v4284_v40  ;;  %v3876_v40 = vadd.f32 %v8640_v5, %v3775_v39 }
 0x7ab   : > { %v4145_v50 = vmax.f32 %v9229_v19, %v4142_v55  ;;  %v3967_v57 = vadd.f32 %v8556_v15, %v3866_v43  ;;  %v4281_v15 = vld [vmem:[%s8869_s5 + $0x320] sm:$0xff]  ;;  %v3868_v7 = vadd.f32 %v8573_v41, %v3767_v38 }
 0x7ac   : > { %4460 = vmatpush.msrb.mxu0 %v4283_v21 }
 0x7ad   : > { %v4147_v26 = vadd.f32 %v8287_v0, %v4145_v50  ;;  %v8655_v50 = vpop.f32.mrf.mxu0  ;;  %v3969_v49 = vadd.f32 %v8575_v14, %v3868_v7  ;;  %v9236_v7 = vld [vmem:[#allocation3_spill] sm:$0xff] }
 0x7ae   : > { %v4064_v20 = vpop.f32.mrf.mxu3  ;;  %4461 = vmatpush.msrb.mxu0 %v4282_v23  ;;  %v3777_v5 = vadd.f32 %v8655_v50, %v8169_v11  ;;  %v4296_v11 = vld [vmem:[%s8869_s5 + $0x398] sm:$0xff] }
 0x7af   : > { %v4149_v62 = vmax.f32 %v4147_v26, 0.0  ;;  %v4065_v44 = vadd.f32 %v4064_v20, %v3964_v53 }
 0x7b0   : > { %v3971_v58 = vpop.f32.mrf.mxu1  ;;  %4462 = vmatpush.msrb.mxu0 %v4281_v15  ;;  %v9235_v15 = vld [vmem:[#allocation54_spill] sm:$0xff] }
 0x7b1   : > { %v4144_v29 = vmax.f32 %v4060_v42, %v4065_v44  ;;  %4421 = vmatmul.f32.vlgmr.msra.gmra.mxu0 %v4149_v62  ;;  %v3972_v31 = vadd.f32 %v3971_v58, %v3871_v33  ;;  %v8664_v26 = vpop.f32.mrf.mxu2  ;;  %v4278_v62 = vld [vmem:[%s8869_s5 + $0x308] sm:$0xff]  ;;  %v4277_v44 = vld [vmem:[%s8869_s5 + $0x300] sm:$0xff]  ;;  %v9232_v58 = vld [vmem:[#allocation53_spill] sm:$0xff] }
 0x7b2   : > { %4463 = vmatpush.msrb.mxu0 %v4280_v6  ;;  %v9233_v8 = vmax.f32 %v8111_v36, %v9232_v58  ;;  %v4306_v36 = vld [vmem:[%s8869_s5 + $0x3e8] sm:$0xff]  ;;  %v4299_v33 = vld [vmem:[%s8869_s5 + $0x3b0] sm:$0xff]  ;;  %v3878_v3 = vadd.f32 %v8664_v26, %v3777_v5 }
 0x7b3   : > { %v4146_v4 = vmax.f32 %v9230_v52, %v4144_v29  ;;  %v4307_v52 = vld [vmem:[%s8869_s5 + $0x3f0] sm:$0xff] }
 0x7b4   : > { %4464 = vmatpush.msrb.mxu0 %v4279_v9  ;;  %4475 = vmatpush.msrb.mxu2 %v4307_v52  ;;  %v4295_v26 = vld [vmem:[%s8869_s5 + $0x390] sm:$0xff] }
 0x7b5   : > { %v4148_v27 = vadd.f32 %v8287_v0, %v4146_v4  ;;  %v3779_v4 = vpop.f32.mrf.mxu0 }
 0x7b6   : > { %v4067_v35 = vpop.f32.mrf.mxu3  ;;  %4465 = vmatpush.msrb.mxu0 %v4278_v62  ;;  %4476 = vmatpush.msrb.mxu2 %v4306_v36  ;;  %v3780_v61 = vadd.f32 %v3779_v4, %v8176_v16  ;;  %v9238_v62 = vld [vmem:[#allocation55_spill] sm:$0xff]  ;;  %v9241_v36 = vld [vmem:[#allocation8_spill] sm:$0xff] }
 0x7b7   : > { %v4150_v56 = vmax.f32 %v4148_v27, 0.0  ;;  %v4068_v55 = vadd.f32 %v4067_v35, %v3967_v57 }
 0x7b8   : > { %v3973_v25 = vpop.f32.mrf.mxu1  ;;  %4466 = vmatpush.msrb.mxu0 %v4277_v44 }
 0x7b9   : > { %4424 = vmatmul.f32.gmra.mxu0 %v4150_v56  ;;  %v3974_v37 = vadd.f32 %v3973_v25, %v3873_v10  ;;  %v3880_v27 = vpop.f32.mrf.mxu2  ;;  %v4305_v56 = vld [vmem:[%s8869_s5 + $0x3e0] sm:$0xff]  ;;  %v4302_v25 = vld [vmem:[%s8869_s5 + $0x3c8] sm:$0xff]  ;;  %v9237_v10 = vmax.f32 %v9235_v15, %v9236_v7 }
 0x7ba   : > { %4477 = vmatpush.msrb.mxu2 %v4305_v56  ;;  %v3881_v43 = vadd.f32 %v3880_v27, %v3780_v61  ;;  %v9242_v56 = vld [vmem:[#allocation5_spill] sm:$0xff]  ;;  %v9248_v7 = vld [vmem:[#allocation59_spill] sm:$0xff] }
 0x7bc   : > { %4478 = vmatpush.msrb.mxu2 %v4304_v17 }
 0x7bd   : > { %v3781_v32 = vpop.f32.mrf.mxu0 }
 0x7be   : > { %v4069_v63 = vpop.f32.mrf.mxu3  ;;  %4479 = vmatpush.msrb.mxu2 %v4303_v30 }
 0x7bf   : > { %v4070_v22 = vadd.f32 %v4069_v63, %v3969_v49 }
 0x7c0   : > { %v8646_v13 = vpop.f32.mrf.mxu1  ;;  %4480 = vmatpush.msrb.mxu2 %v4302_v25 }
 0x7c1   : > { %v3882_v63 = vpop.f32.mrf.mxu2  ;;  %v3977_v21 = vadd.f32 %v8646_v13, %v3876_v40  ;;  %v4297_v13 = vld [vmem:[%s8869_s5 + $0x3a0] sm:$0xff] }
 0x7c2   : > { %4481 = vmatpush.msrb.mxu2 %v4301_v2 }
 0x7c4   : > { %4482 = vmatpush.msrb.mxu2 %v4300_v28 }
 0x7c6   : > { %v4072_v34 = vpop.f32.mrf.mxu3  ;;  %4483 = vmatpush.msrb.mxu2 %v4299_v33 }
 0x7c7   : > { %v4073_v12 = vadd.f32 %v4072_v34, %v3972_v31  ;;  %v3784_v31 = vpop.f32.mrf.mxu0  ;;  %v4298_v34 = vld [vmem:[%s8869_s5 + $0x3a8] sm:$0xff] }
 0x7c8   : > { %v8671_v20 = vpop.f32.mrf.mxu1  ;;  %4484 = vmatpush.msrb.mxu2 %v4298_v34 }
 0x7c9   : > { %v4152_v19 = vmax.f32 %v4068_v55, %v4073_v12  ;;  %v9234_v55 = vld [vmem:[#allocation4_spill] sm:$0xff]  ;;  %v3885_v38 = vpop.f32.mrf.mxu2  ;;  %v3979_v50 = vadd.f32 %v8671_v20, %v3878_v3 }
 0x7ca   : > { %v3782_v12 = vadd.f32 %v3781_v32, %v9234_v55  ;;  %4485 = vmatpush.msrb.mxu2 %v4297_v13 }
 0x7cb   : > { %v4155_v53 = vmax.f32 %v9231_v54, %v4152_v19 }
 0x7cc   : > { %v3883_v19 = vadd.f32 %v3882_v63, %v3782_v12  ;;  %4486 = vmatpush.msrb.mxu2 %v4296_v11 }
 0x7cd   : > { %v4157_v47 = vadd.f32 %v8287_v0, %v4155_v53 }
 0x7ce   : > { %v4074_v41 = vpop.f32.mrf.mxu3  ;;  %4487 = vmatpush.msrb.mxu2 %v4295_v26  ;;  %v4511_v26 = vld [vmem:[%s8871_s7 + $0x60] sm:$0xff] }
 0x7cf   : > { %v4159_v18 = vmax.f32 %v4157_v47, 0.0  ;;  %v4075_v42 = vadd.f32 %v4074_v41, %v3974_v37  ;;  %v3786_v20 = vpop.f32.mrf.mxu0 }
 0x7d0   : > { %v3981_v35 = vpop.f32.mrf.mxu1 }
 0x7d1   : > { %v4154_v14 = vmax.f32 %v4070_v22, %v4075_v42  ;;  %4444 = vmatmul.f32.vlgmr.msra.gmra.mxu2 %v4159_v18  ;;  %v3982_v57 = vadd.f32 %v3981_v35, %v3881_v43  ;;  %v4294_v22 = vld [vmem:[%s8869_s5 + $0x388] sm:$0xff]  ;;  %v4293_v42 = vld [vmem:[%s8869_s5 + $0x380] sm:$0xff]  ;;  %v3785_v35 = vadd.f32 %v3784_v31, %v9241_v36  ;;  %v9244_v43 = vld [vmem:[#allocation64_spill] sm:$0xff] }
 0x7d2   : > { %4488 = vmatpush.msrb.mxu2 %v4294_v22  ;;  %v9246_v31 = vld [vmem:[#allocation60_spill] sm:$0xff]  ;;  %v4507_v22 = vld [vmem:[%s8871_s7 + $0x40] sm:$0xff]  ;;  %v4559_v36 = vld [vmem:[%s8873_s9 + $0x48] sm:$0xff] }
 0x7d3   : > { %v4156_v29 = vmax.f32 %v9233_v8, %v4154_v14  ;;  %v9239_v14 = vld [vmem:[#allocation56_spill] sm:$0xff]  ;;  %v3887_v8 = vpop.f32.mrf.mxu2  ;;  %v3886_v30 = vadd.f32 %v3885_v38, %v3785_v35 }
 0x7d4   : > { %v9240_v44 = vmax.f32 %v9238_v62, %v9239_v14  ;;  %4489 = vmatpush.msrb.mxu2 %v4293_v42  ;;  %v4505_v42 = vld [vmem:[%s8871_s7 + $0x30] sm:$0xff]  ;;  %v4504_v62 = vld [vmem:[%s8871_s7 + $0x28] sm:$0xff] }
 0x7d5   : > { %v4158_v1 = vadd.f32 %v8287_v0, %v4156_v29 }
 0x7d6   : > { %v4077_v24 = vpop.f32.mrf.mxu3 }
 0x7d7   : > { %v4160_v59 = vmax.f32 %v4158_v1, 0.0  ;;  %v4078_v16 = vadd.f32 %v4077_v24, %v3977_v21  ;;  %v3789_v1 = vpop.f32.mrf.mxu0 }
 0x7d8   : > { %v3983_v51 = vpop.f32.mrf.mxu1  ;;  %v3790_v17 = vadd.f32 %v3789_v1, %v9242_v56  ;;  %v4499_v1 = vld [vmem:[%s8871_s7] sm:$0xff] }
 0x7d9   : > { %4447 = vmatmul.f32.gmra.mxu2 %v4160_v59  ;;  %v3984_v6 = vadd.f32 %v3983_v51, %v3883_v19  ;;  %v9243_v51 = vld [vmem:[#allocation63_spill] sm:$0xff]  ;;  %v5811_v56 = vld [vmem:[%s8870_s6] ss:$0 sm:$0xff] }
 0x7da   : > { %v3787_v40 = vadd.f32 %v3786_v20, %v9243_v51  ;;  %v4506_v20 = vld [vmem:[%s8871_s7 + $0x38] sm:$0xff] }
 0x7db   : > { %v3890_v27 = vpop.f32.mrf.mxu2 }
 0x7dc   : > { %v3891_v32 = vadd.f32 %v3890_v27, %v3790_v17  ;;  %v4558_v17 = vld [vmem:[%s8873_s9 + $0x40] sm:$0xff] }
 0x7de   : > { %v4079_v48 = vpop.f32.mrf.mxu3 }
 0x7df   : > { %v4080_v47 = vadd.f32 %v4079_v48, %v3979_v50  ;;  %v3791_v2 = vpop.f32.mrf.mxu0 }
 0x7e0   : > { %v3986_v53 = vpop.f32.mrf.mxu1  ;;  %v3792_v33 = vadd.f32 %v3791_v2, %v9244_v43 }
 0x7e1   : > { %v3987_v48 = vadd.f32 %v3986_v53, %v3886_v30  ;;  %v4557_v30 = vld [vmem:[%s8873_s9 + $0x38] sm:$0xff] }
 0x7e3   : > { %v3892_v28 = vpop.f32.mrf.mxu2 }
 0x7e6   : > { %v4082_v45 = vpop.f32.mrf.mxu3 }
 0x7e7   : > { %v4083_v60 = vadd.f32 %v4082_v45, %v3982_v57  ;;  %v3888_v45 = vadd.f32 %v3887_v8, %v3787_v40  ;;  %v4502_v8 = vld [vmem:[%s8871_s7 + $0x18] sm:$0xff] }
 0x7e8   : > { %v3988_v46 = vpop.f32.mrf.mxu1  ;;  %v4553_v40 = vld [vmem:[%s8873_s9 + $0x18] sm:$0xff] }
 0x7e9   : > { %v4162_v23 = vmax.f32 %v4078_v16, %v4083_v60  ;;  %v3893_v16 = vadd.f32 %v3892_v28, %v3792_v33  ;;  %v9245_v60 = vld [vmem:[#allocation58_spill] sm:$0xff]  ;;  %v3989_v55 = vadd.f32 %v3988_v46, %v3888_v45 }
 0x7ea   : > { %v9247_v34 = vmax.f32 %v9245_v60, %v9246_v31 }
 0x7eb   : > { %v4165_v54 = vmax.f32 %v9237_v10, %v4162_v23  ;;  %v9249_v10 = vld [vmem:[#allocation62_spill] sm:$0xff] }
 0x7ed   : > { %v4167_v49 = vadd.f32 %v8287_v0, %v4165_v54  ;;  %v9250_v54 = vmax.f32 %v9248_v7, %v9249_v10  ;;  %v4552_v7 = vld [vmem:[%s8873_s9 + $0x10] sm:$0xff]  ;;  %v4551_v10 = vld [vmem:[%s8873_s9 + $0x8] sm:$0xff] }
 0x7ee   : > { %v4084_v37 = vpop.f32.mrf.mxu3 }
 0x7ef   : > { %v4169_v41 = vmax.f32 %v4167_v49, 0.0  ;;  %v4085_v9 = vadd.f32 %v4084_v37, %v3984_v6  ;;  %v4513_v6 = vld [vmem:[%s8871_s7 + $0x70] sm:$0xff]  ;;  %v4512_v49 = vld [vmem:[%s8871_s7 + $0x68] sm:$0xff]  ;;  %v4330_v37 = vpop.f32.mrf.mxu0 }
 0x7f0   : > { %v3991_v59 = vpop.f32.mrf.mxu1  ;;  %4526 = vmatpush.msra.mxu2 %v4513_v6 }
 0x7f1   : > { %v4164_v18 = vmax.f32 %v4080_v47, %v4085_v9  ;;  %4467 = vmatmul.f32.vlgmr.msrb.gmra.mxu0 %v4169_v41  ;;  %v3992_v25 = vadd.f32 %v3991_v59, %v3891_v32  ;;  %v4509_v47 = vld [vmem:[%s8871_s7 + $0x50] sm:$0xff]  ;;  %v4353_v41 = vpop.f32.mrf.mxu2  ;;  %v4508_v9 = vld [vmem:[%s8871_s7 + $0x48] sm:$0xff] }
 0x7f2   : > { %4527 = vmatpush.msra.mxu2 %v4512_v49  ;;  %v4560_v59 = vld [vmem:[%s8873_s9 + $0x50] sm:$0xf] }
 0x7f3   : > { %v4166_v58 = vmax.f32 %v9240_v44, %v4164_v18  ;;  %v4503_v44 = vld [vmem:[%s8871_s7 + $0x20] sm:$0xff]  ;;  %5588 = vmatpush.msk.msra.mxu0 %vm4572_vm2, %v4560_v59 }
 0x7f4   : > { %4528 = vmatpush.msra.mxu2 %v4511_v26 }
 0x7f5   : > { %v4168_v29 = vadd.f32 %v8287_v0, %v4166_v58  ;;  %4582 = vmatpush.msra.mxu0 %v4559_v36 }
 0x7f6   : > { %v4087_v52 = vpop.f32.mrf.mxu3 }
 0x7f7   : > { %v4170_v4 = vmax.f32 %v4168_v29, 0.0  ;;  %v4088_v39 = vadd.f32 %v4087_v52, %v3987_v48  ;;  %v4333_v18 = vpop.f32.mrf.mxu0  ;;  %v4501_v52 = vld [vmem:[%s8871_s7 + $0x10] sm:$0xff]  ;;  %4583 = vmatpush.msra.mxu0 %v4558_v17  ;;  %v4331_v48 = vadd.f32 %v5811_v56, %v4330_v37 }
 0x7f8   : > { %v3993_v57 = vpop.f32.mrf.mxu1  ;;  %v4334_v33 = vadd.f32 %v5811_v56, %v4333_v18 }
 0x7f9   : > { %4470 = vmatmul.f32.gmra.mxu0 %v4170_v4  ;;  %v3994_v12 = vadd.f32 %v3993_v57, %v3893_v16  ;;  %v4356_v14 = vpop.f32.mrf.mxu2  ;;  %v4500_v4 = vld [vmem:[%s8871_s7 + $0x8] sm:$0xff]  ;;  %v4354_v2 = vadd.f32 %v4353_v41, %v4331_v48 }
 0x7fa   : > { %4584 = vmatpush.msra.mxu0 %v4557_v30  ;;  %v4357_v57 = vadd.f32 %v4356_v14, %v4334_v33 }
 0x7fe   : > { %v4089_v24 = vpop.f32.mrf.mxu3 }
 0x7ff   : > { %v4090_v13 = vadd.f32 %v4089_v24, %v3989_v55  ;;  %v4376_v58 = vpop.f32.mrf.mxu0 }
 0x801   : > { %v4399_v29 = vpop.f32.mrf.mxu2 }
 0x806   : > { %v4092_v63 = vpop.f32.mrf.mxu3 }
 0x807   : > { %v4093_v61 = vadd.f32 %v4092_v63, %v3992_v25  ;;  %v4379_v46 = vpop.f32.mrf.mxu0  ;;  %v4556_v25 = vld [vmem:[%s8873_s9 + $0x30] sm:$0xff]  ;;  %v4555_v63 = vld [vmem:[%s8873_s9 + $0x28] sm:$0xff] }
 0x808   : > { %4585 = vmatpush.msra.mxu0 %v4556_v25  ;;  %v4380_v16 = vadd.f32 %v4379_v46, %v4357_v57 }
 0x809   : > { %v4172_v21 = vmax.f32 %v4088_v39, %v4093_v61  ;;  %v4402_v27 = vpop.f32.mrf.mxu2  ;;  %v4377_v39 = vadd.f32 %v4376_v58, %v4354_v2  ;;  %v4554_v61 = vld [vmem:[%s8873_s9 + $0x20] sm:$0xff] }
 0x80a   : > { %4586 = vmatpush.msra.mxu0 %v4555_v63 }
 0x80b   : > { %v4175_v5 = vmax.f32 %v9247_v34, %v4172_v21  ;;  %v4400_v51 = vadd.f32 %v4399_v29, %v4377_v39  ;;  %v4403_v34 = vadd.f32 %v4402_v27, %v4380_v16 }
 0x80c   : > { %4587 = vmatpush.msra.mxu0 %v4554_v61 }
 0x80d   : > { %v4177_v23 = vadd.f32 %v8287_v0, %v4175_v5 }
 0x80e   : > { %v4094_v38 = vpop.f32.mrf.mxu3  ;;  %4588 = vmatpush.msra.mxu0 %v4553_v40 }
 0x80f   : > { %v4179_v3 = vmax.f32 %v4177_v23, 0.0  ;;  %v4095_v19 = vadd.f32 %v4094_v38, %v3994_v12 }
 0x810   : > { %4589 = vmatpush.msra.mxu0 %v4552_v7 }
 0x811   : > { %v4174_v15 = vmax.f32 %v4090_v13, %v4095_v19  ;;  %4490 = vmatmul.f32.vlgmr.msrb.gmra.mxu2 %v4179_v3 }
 0x812   : > { %4590 = vmatpush.msra.mxu0 %v4551_v10 }
 0x813   : > { %v4176_v53 = vmax.f32 %v9250_v54, %v4174_v15  ;;  %v4550_v54 = vld [vmem:[%s8873_s9] sm:$0xff] }
 0x814   : > { %4591 = vmatpush.msra.mxu0 %v4550_v54 }
 0x815   : > { %v4178_v11 = vadd.f32 %v8287_v0, %v4176_v53  ;;  %v4510_v0 = vld [vmem:[%s8871_s7 + $0x58] sm:$0xff]  ;;  %v5812_v53 = vld [vmem:[%s8872_s8] ss:$0 sm:$0xff] }
 0x816   : > { %4529 = vmatpush.msra.mxu2 %v4510_v0  ;;  %v5813_v0 = vld [vmem:[%s8874_s10] ss:$0 sm:$0xff] }
 0x817   : > { %v4180_v50 = vmax.f32 %v4178_v11, 0.0 }
 0x818   : > { %4530 = vmatpush.msra.mxu2 %v4509_v47 }
 0x819   : > { %4493 = vmatmul.f32.gmra.mxu2 %v4180_v50 }
 0x81a   : > { %4531 = vmatpush.msra.mxu2 %v4508_v9 }
 0x81c   : > { %4532 = vmatpush.msra.mxu2 %v4507_v22 }
 0x81e   : > { %4533 = vmatpush.msra.mxu2 %v4506_v20 }
 0x820   : > { %4534 = vmatpush.msra.mxu2 %v4505_v42 }
 0x822   : > { %4535 = vmatpush.msra.mxu2 %v4504_v62 }
 0x824   : > { %4536 = vmatpush.msra.mxu2 %v4503_v44 }
 0x826   : > { %4537 = vmatpush.msra.mxu2 %v4502_v8 }
 0x828   : > { %4538 = vmatpush.msra.mxu2 %v4501_v52 }
 0x82a   : > { %4539 = vmatpush.msra.mxu2 %v4500_v4 }
 0x82c   : > { %4540 = vmatpush.msra.mxu2 %v4499_v1 }
 0x82e   : > { %v4422_v24 = vpop.f32.mrf.mxu0  ;;  %5789 = vmatpush.msk.msrb.mxu2 %vm4572_vm2, %v4560_v59 }
 0x82f   : > { %v4423_v21 = vadd.f32 %v4422_v24, %v4400_v51 }
 0x830   : > { %5790 = vmatpush.msrb.mxu2 %v4559_v36 }
 0x832   : > { %5791 = vmatpush.msrb.mxu2 %v4558_v17 }
 0x834   : > { %5792 = vmatpush.msrb.mxu2 %v4557_v30 }
 0x836   : > { %v4425_v32 = vpop.f32.mrf.mxu0  ;;  %5793 = vmatpush.msrb.mxu2 %v4556_v25 }
 0x837   : > { %v4426_v55 = vadd.f32 %v4425_v32, %v4403_v34 }
 0x838   : > { %5794 = vmatpush.msrb.mxu2 %v4555_v63 }
 0x83a   : > { %5795 = vmatpush.msrb.mxu2 %v4554_v61 }
 0x83c   : > { %5796 = vmatpush.msrb.mxu2 %v4553_v40 }
 0x83e   : > { %5797 = vmatpush.msrb.mxu2 %v4552_v7 }
 0x840   : > { %5798 = vmatpush.msrb.mxu2 %v4551_v10 }
 0x842   : > { %5799 = vmatpush.msrb.mxu2 %v4550_v54 }
 0x854   : > { %v4445_v35 = vpop.f32.mrf.mxu2 }
 0x855   : > { %v4446_v45 = vadd.f32 %v4445_v35, %v4423_v21 }
 0x85c   : > { %v4448_v28 = vpop.f32.mrf.mxu2 }
 0x85d   : > { %v4449_v38 = vadd.f32 %v4448_v28, %v4426_v55 }
 0x86e   : > { %v4468_v43 = vpop.f32.mrf.mxu0 }
 0x86f   : > { %v4469_v60 = vadd.f32 %v4468_v43, %v4446_v45 }
 0x876   : > { %v4471_v23 = vpop.f32.mrf.mxu0 }
 0x877   : > { %v4472_v13 = vadd.f32 %v4471_v23, %v4449_v38 }
 0x894   : > { %v4491_v31 = vpop.f32.mrf.mxu2 }
 0x895   : > { %v4492_v5 = vadd.f32 %v4491_v31, %v4469_v60 }
 0x897   : > { %v4497_v12 = vmax.f32 %v4492_v5, 0.0 }
 0x899   : > { %5586 = vmatmul.msk.f32.vlgmr.msra.gmra.mxu2 %vm4518_vm3, %v4497_v12 }
 0x89c   : > { %v4494_v3 = vpop.f32.mrf.mxu2 }
 0x89d   : > { %v4495_v19 = vadd.f32 %v4494_v3, %v4472_v13 }
 0x89f   : > { %v4498_v15 = vmax.f32 %v4495_v19, 0.0 }
 0x8a1   : > { %5587 = vmatmul.msk.f32.gmra.mxu2 %vm4518_vm3, %v4498_v15 }
 0x91c   : > { %v4542_v11 = vpop.f32.mrf.mxu2 }
 0x91d   : > { %v4543_v50 = vadd.f32 %v5812_v53, %v4542_v11 }
 0x91f   : > { %v4548_v6 = vmax.f32 %v4543_v50, 0.0 }
 0x921   : > { %5589 = vmatmul.msk.f32.vlgmr.msra.gmra.mxu0 %vm4565_vm4, %v4548_v6 }
 0x924   : > { %v4545_v49 = vpop.f32.mrf.mxu2 }
 0x925   : > { %v4546_v37 = vadd.f32 %v5812_v53, %v4545_v49 }
 0x927   : > { %v4549_v26 = vmax.f32 %v4546_v37, 0.0 }
 0x929   : > { %5590 = vmatmul.msk.f32.vlgmr.msrb.gmra.mxu2 %vm4565_vm4, %v4549_v26 }
 0x99e   : > { %v4593_v47 = vpop.f32.mrf.mxu0 }
 0x99f   : > { %v4594_v41 = vadd.f32 %v5813_v0, %v4593_v47 }
 0x9a1   : > { %v4600_v9 = vsel %vm4599_vm5, %v4594_v41, -inf }
 0x9a2   : > { %4601 = vmax.xlane.f32.xlu0 %v4600_v9 }
 0x9ac   : > { %v4596_v22 = vpop.f32.mrf.mxu2 }
 0x9ad   : > { %v4597_v18 = vadd.f32 %v5813_v0, %v4596_v22 }
 0x9af   : > { %v4603_v20 = vsel %vm4599_vm5, %v4597_v18, -inf }
 0x9b0   : > { %4604 = vmax.xlane.f32.xlu0 %v4603_v20 }
 0xa15   : > { %v4602_v42 = vpop.xlane.xlu0 %4601 }
 0xa16   : > { %v4606_v62 = vsub.f32 %v4594_v41, %v4602_v42 }
 0xa18   : > { %v4608_v14 = vmul.f32 1.442695, %v4606_v62 }
 0xa1a   : > { %5814 = vpow2.f32 %v4608_v14 }
 0xa20   : > { %v5815_v44 = vpop.eup %5814 }
 0xa21   : > { %v4612_v58 = vsel %vm4599_vm5, %v5815_v44, 0.0 }
 0xa22   : > { %4613 = vadd.xlane.f32.xlu1 %v4612_v58 }
 0xa23   : > { %v4605_v8 = vpop.xlane.xlu0 %4604 }
 0xa24   : > { %v4607_v29 = vsub.f32 %v4597_v18, %v4605_v8 }
 0xa26   : > { %v4610_v46 = vmul.f32 1.442695, %v4607_v29 }
 0xa28   : > { %5816 = vpow2.f32 %v4610_v46 }
 0xa2e   : > { %v5817_v52 = vpop.eup %5816 }
 0xa2f   : > { %v4615_v4 = vsel %vm4599_vm5, %v5817_v52, 0.0 }
 0xa30   : > { %4616 = vadd.xlane.f32.xlu1 %v4615_v4 }
 0xa95   : > { %v4614_v1 = vpop.xlane.xlu1 %4613 }
 0xa96   : > { %5818 = vrcp.f32 %v4614_v1  ;;  %v4629_v36 = vand.u32 2147483648, %v4614_v1  ;;  %v4627_v56 = vand.u32 2147483647, %v4614_v1  ;;  %vm4623_vm7 = vweird.f32 %v4614_v1 }
 0xa98   : > { %v4630_v32 = vor.u32 1.1754944e-38, %v4629_v36  ;;  %vm4628_vm9 = vcmp.eq.f32.partialorder %v4627_v56, 8.507059e+37 }
 0xa9c   : > { %v5819_v27 = vpop.eup %5818 }
 0xa9d   : > { %v4619_v24 = vmul.f32 %v5819_v27, %v4614_v1  ;;  %vm4624_vm6 = vweird.f32 %v5819_v27 }
 0xa9e   : > { %vm4625_vm8 = vmor %vm4623_vm7, %vm4624_vm6 }
 0xa9f   : > { %v4620_v59 = vsub.f32 1.0, %v4619_v24 }
 0xaa1   : > { %v4621_v35 = vmul.f32 %v5819_v27, %v4620_v59 }
 0xaa3   : > { %v4622_v17 = vadd.f32 %v5819_v27, %v4621_v35  ;;  %v4617_v30 = vpop.xlane.xlu1 %4616 }
 0xaa4   : > { %5820 = vrcp.f32 %v4617_v30  ;;  %v4644_v28 = vand.u32 2147483648, %v4617_v30  ;;  %v4642_v40 = vand.u32 2147483647, %v4617_v30  ;;  %vm4638_vm11 = vweird.f32 %v4617_v30 }
 0xaa5   : > { %v4626_v48 = vsel %vm4625_vm8, %v5819_v27, %v4622_v17 }
 0xaa6   : > { %v4631_v25 = vsel %vm4628_vm9, %v4630_v32, %v4626_v48  ;;  %v4645_v33 = vor.u32 1.1754944e-38, %v4644_v28  ;;  %vm4643_vm13 = vcmp.eq.f32.partialorder %v4642_v40, 8.507059e+37 }
 0xaa7   : > { %v4632_v2 = vmul.f32 %v5815_v44, %v4631_v25 }
 0xaa9   : > { %4648 = vst.msk [vmem:[%s386_s13] sm:$0xff] %vm4599_vm5, %v4632_v2 }
 0xaaa   : > { %v5821_v63 = vpop.eup %5820 }
 0xaab   : > { %v4634_v39 = vmul.f32 %v5821_v63, %v4617_v30  ;;  %vm4639_vm10 = vweird.f32 %v5821_v63 }
 0xaac   : > { %vm4640_vm12 = vmor %vm4638_vm11, %vm4639_vm10 }
 0xaad   : > { %v4635_v61 = vsub.f32 1.0, %v4634_v39 }
 0xaaf   : > { %v4636_v51 = vmul.f32 %v5821_v63, %v4635_v61 }
 0xab1   : > { %v4637_v43 = vadd.f32 %v5821_v63, %v4636_v51 }
 0xab3   : > { %v4641_v21 = vsel %vm4640_vm12, %v5821_v63, %v4637_v43 }
 0xab4   : > { %v4646_v57 = vsel %vm4643_vm13, %v4645_v33, %v4641_v21 }
 0xab5   : > { %v4647_v45 = vmul.f32 %v5817_v52, %v4646_v57 }
 0xab7   : > { %4649 = vst.msk [vmem:[%s386_s13 + $0x8] sm:$0xff] %vm4599_vm5, %v4647_v45 }
 0xab8 PF: > { %s21_s17 = sadd.s32 1, %s5829_s17  }
 0xab9   : > { %p18_p5 = scmp.ge.s32.totalorder %s21_s17, 4  }
 0xabb   :  { %20 = sbr.rel (!%p18_p5) target bundleno = 1 (0x1), region = 94 }

</bundles_post_ra>
